<compile_context>
chip_gen: v6e
topology: v6e:2x2x1
jax: 0.10.0
libtpu: 0.0.40
codegen_flags: <defaults>
</compile_context>

<pallas_src>
import functools

import jax
import jax.numpy as jnp
from jax import lax
from jax.experimental import pallas as pl
from jax.experimental.pallas import tpu as pltpu


def _round_up(x, m):
    return (x + m - 1) // m * m


# -----------------------------------------------------------------------------
# Fused LSTM-AE kernel.
#
#   x_ref        : (T_enc*Bp, P)   time-major, batch/feature padded, flattened 2-D
#   enc_*_ref    : (Le, P, 4P) / (Le, P, 4P) / (Le, 1, 4P)   padded encoder weights
#   dec_*_ref    : (Ld, P, 4P) / (Ld, P, 4P) / (Ld, 1, 4P)   padded decoder weights
#   enc_out_ref  : (T_dec*Bp, P)   encoded_x (last-step broadcast), padded
#   dec_out_ref  : (T_dec*Bp, P)   decoded_x, padded
#   seq_buf      : VMEM (seq_rows, P)    inter-layer sequence (unused if 1 layer)
#   proj_buf     : VMEM (proj_rows, 4P)  hoisted x-projection (+bias), all steps
#
# Gate g (i,f,g,o) lives in lane columns [g*P, (g+1)*P) -> lane-aligned slices.
# Padded FEATURE lanes have zero weights/bias, so they stay exactly 0.
# NOTE: padded BATCH rows (B..Bp) develop nonzero h/c (the bias makes gates
# nonzero even for zero inputs); they are sliced off in the wrapper, so results
# are correct -- do NOT assume they stay zero.
# -----------------------------------------------------------------------------
def _lstm_ae_kernel(x_ref, enc_wih_ref, enc_whh_ref, enc_b_ref,
                    dec_wih_ref, dec_whh_ref, dec_b_ref,
                    enc_out_ref, dec_out_ref,
                    seq_buf, proj_buf,
                    *, t_enc, t_dec, bp):
    P = x_ref.shape[1]
    n_enc = enc_wih_ref.shape[0]
    n_dec = dec_wih_ref.shape[0]

    # Full unroll only for short static sequences; partial otherwise to bound
    # code size and vreg live ranges (gates alone are 4 vregs per step).
    unroll_enc = True if t_enc <= 16 else 8
    unroll_dec = True if t_dec <= 16 else 8

    def sigmoid(v):
        # One EUP tanh per sigmoid (instead of exp + add + reciprocal); the
        # transcendentals sit on the serial h/c dependency chain.
        return 0.5 * jnp.tanh(0.5 * v) + 0.5

    def lstm_cell(gates, h, c):
        i_g = sigmoid(gates[:, 0 * P:1 * P])
        f_g = sigmoid(gates[:, 1 * P:2 * P])
        g_g = jnp.tanh(gates[:, 2 * P:3 * P])
        o_g = sigmoid(gates[:, 3 * P:4 * P])
        c_new = f_g * c + i_g * g_g
        h_new = o_g * jnp.tanh(c_new)
        return h_new, c_new

    def run_recurrence(whh_ref, layer, n_steps, proj_fn, store_fn, unroll):
        # h/c as loop carries -> no VMEM round trips per step; only the
        # recurrent matmul + gate math remain on the critical chain.
        def step(t, carry):
            h, c = carry
            gates = proj_fn(t) + jnp.dot(
                h, whh_ref[layer], preferred_element_type=jnp.float32)
            h, c = lstm_cell(gates, h, c)
            store_fn(t, h)
            return (h, c)

        init = (jnp.zeros((bp, P), jnp.float32),
                jnp.zeros((bp, P), jnp.float32))
        h_last, _ = lax.fori_loop(0, n_steps, step, init, unroll=unroll)
        return h_last

    def proj_slice(t):
        off = pl.multiple_of(t * bp, bp)   # bp is a multiple of 8 (sublane)
        return proj_buf[pl.ds(off, bp)]

    def store_seq(t, h):
        off = pl.multiple_of(t * bp, bp)
        seq_buf[pl.ds(off, bp)] = h

    def store_none(t, h):
        return None

    def store_dec_out(t, h):
        off = pl.multiple_of(t * bp, bp)
        dec_out_ref[pl.ds(off, bp)] = h

    # ------------------------ Encoder stack ------------------------
    rows_enc = t_enc * bp
    h_last = None
    for layer in range(n_enc):
        # Hoisted input projection (+bias): ONE MXU matmul over all timesteps.
        # Layer 0 projects straight from x_ref (no x -> seq_buf copy).
        src = x_ref[...] if layer == 0 else seq_buf[0:rows_enc]
        proj_buf[0:rows_enc] = (
            jnp.dot(src, enc_wih_ref[layer], preferred_element_type=jnp.float32)
            + enc_b_ref[layer])
        # Only the final encoder layer's last h is needed downstream; skip its
        # per-step sequence writes.
        store_fn = store_none if layer == n_enc - 1 else store_seq
        h_last = run_recurrence(enc_wih_ref if False else enc_whh_ref, layer,
                                t_enc, proj_slice, store_fn, unroll_enc)

    # encoded_x = last encoder step broadcast over T_dec: one lane-dense store.
    enc_out_ref[...] = jnp.tile(h_last, (t_dec, 1))

    # ------------------------ Decoder stack ------------------------
    rows_dec = t_dec * bp
    for layer in range(n_dec):
        last = layer == n_dec - 1
        store_fn = store_dec_out if last else store_seq
        if layer == 0:
            # Time-constant input h_last: project ONCE, reuse every step.
            proj0 = (jnp.dot(h_last, dec_wih_ref[0],
                             preferred_element_type=jnp.float32)
                     + dec_b_ref[0])
            proj_fn = lambda t: proj0
        else:
            proj_buf[0:rows_dec] = (
                jnp.dot(seq_buf[0:rows_dec], dec_wih_ref[layer],
                        preferred_element_type=jnp.float32)
                + dec_b_ref[layer])
            proj_fn = proj_slice
        run_recurrence(dec_whh_ref, layer, t_dec, proj_fn, store_fn, unroll_dec)


# -----------------------------------------------------------------------------
# Parameter packing: PyTorch layout -> padded, gate-lane-aligned, stacked layers.
# Done ONCE at load time (outside the jitted forward).
# -----------------------------------------------------------------------------
def _pack_layer(w_ih, w_hh, b_ih, b_hh, in_size, out_size, P):
    # PyTorch: w_ih (4H, I), w_hh (4H, H), gate row-order i, f, g, o.
    wih_t = jnp.transpose(w_ih).astype(jnp.float32)   # (I, 4H)
    whh_t = jnp.transpose(w_hh).astype(jnp.float32)   # (H, 4H)
    bias = (b_ih + b_hh).astype(jnp.float32)          # (4H,)

    wih_p = jnp.zeros((P, 4 * P), jnp.float32)
    whh_p = jnp.zeros((P, 4 * P), jnp.float32)
    b_p = jnp.zeros((4 * P,), jnp.float32)
    for g in range(4):
        wih_p = wih_p.at[:in_size, g * P:g * P + out_size].set(
            wih_t[:, g * out_size:(g + 1) * out_size])
        whh_p = whh_p.at[:out_size, g * P:g * P + out_size].set(
            whh_t[:, g * out_size:(g + 1) * out_size])
        b_p = b_p.at[g * P:g * P + out_size].set(
            bias[g * out_size:(g + 1) * out_size])
    return wih_p, whh_p, b_p.reshape(1, 4 * P)


def pack_params(params, input_size, hidden_size):
    P = _round_up(max(input_size, hidden_size, 1), 128)
    enc, dec = [], []
    for l, p in enumerate(params["encoder"]):
        in_size = input_size if l == 0 else hidden_size
        enc.append(_pack_layer(p["w_ih"], p["w_hh"], p["b_ih"], p["b_hh"],
                               in_size, hidden_size, P))
    for l, p in enumerate(params["decoder"]):
        in_size = hidden_size if l == 0 else input_size
        dec.append(_pack_layer(p["w_ih"], p["w_hh"], p["b_ih"], p["b_hh"],
                               in_size, input_size, P))
    return {
        "enc_wih": jnp.stack([e[0] for e in enc]),
        "enc_whh": jnp.stack([e[1] for e in enc]),
        "enc_b":   jnp.stack([e[2] for e in enc]),
        "dec_wih": jnp.stack([d[0] for d in dec]),
        "dec_whh": jnp.stack([d[1] for d in dec]),
        "dec_b":   jnp.stack([d[2] for d in dec]),
    }


# -----------------------------------------------------------------------------
# Forward pass (single fused pallas_call).
# -----------------------------------------------------------------------------
@functools.partial(jax.jit, static_argnums=(2, 3))
def lstm_ae_forward(packed, x, sequence_length, hidden_size):
    B, T, I = x.shape
    P = packed["enc_wih"].shape[1]
    n_enc = packed["enc_wih"].shape[0]
    n_dec = packed["dec_wih"].shape[0]
    Bp = _round_up(B, 8)

    # Batch-first -> time-major, pad batch to 8 sublanes / features to P lanes,
    # flatten (T, Bp, P) -> (T*Bp, P) so the kernel only sees lane-dense 2-D slabs.
    x_tbf = jnp.transpose(x, (1, 0, 2)).astype(jnp.float32)
    x_pad = jnp.pad(x_tbf, ((0, 0), (0, Bp - B), (0, P - I)))
    x2d = x_pad.reshape(T * Bp, P)

    # Scratch sized to what the kernel actually touches.
    seq_rows = max(T, sequence_length) * Bp if max(n_enc, n_dec) > 1 else 8
    proj_rows = max(T, sequence_length if n_dec > 1 else 0) * Bp

    # VMEM budget derived from actual buffer sizes (feedback), with 2x headroom.
    f32 = 4
    est_bytes = f32 * (
        T * Bp * P                                  # x
        + 2 * sequence_length * Bp * P              # the two outputs
        + seq_rows * P + proj_rows * 4 * P          # scratch
        + sum(int(v.size) for v in packed.values())  # weights
    )
    vmem_limit = min(128 * 1024 * 1024, max(2 * est_bytes, 16 * 1024 * 1024))

    kernel = functools.partial(_lstm_ae_kernel,
                               t_enc=T, t_dec=sequence_length, bp=Bp)

    enc2d, dec2d = pl.pallas_call(
        kernel,
        out_shape=(
            jax.ShapeDtypeStruct((sequence_length * Bp, P), jnp.float32),
            jax.ShapeDtypeStruct((sequence_length * Bp, P), jnp.float32),
        ),
        in_specs=[pl.BlockSpec(memory_space=pltpu.MemorySpace.VMEM)] * 7,
        out_specs=(
            pl.BlockSpec(memory_space=pltpu.MemorySpace.VMEM),
            pl.BlockSpec(memory_space=pltpu.MemorySpace.VMEM),
        ),
        scratch_shapes=[
            pltpu.VMEM((seq_rows, P), jnp.float32),       # seq_buf
            pltpu.VMEM((proj_rows, 4 * P), jnp.float32),  # proj_buf
        ],
        compiler_params=pltpu.CompilerParams(vmem_limit_bytes=int(vmem_limit)),
    )(x2d, packed["enc_wih"], packed["enc_whh"], packed["enc_b"],
      packed["dec_wih"], packed["dec_whh"], packed["dec_b"])

    enc = enc2d.reshape(sequence_length, Bp, P)[:, :B, :hidden_size]
    dec = dec2d.reshape(sequence_length, Bp, P)[:, :B, :I]
    encoded_x = jnp.transpose(enc, (1, 0, 2))   # (B, T_dec, H)
    decoded_x = jnp.transpose(dec, (1, 0, 2))   # (B, T_dec, I)
    return encoded_x, decoded_x


# -----------------------------------------------------------------------------
# Deterministic synthetic parameter init (mirrors nn.LSTM parameter shapes and
# the module's orthogonal(gain=sqrt(2)) init on the layer-0 weights).
# -----------------------------------------------------------------------------
def _orthogonal(key, rows, cols, gain):
    a = jax.random.normal(key, (max(rows, cols), min(rows, cols)), jnp.float32)
    q, _ = jnp.linalg.qr(a)
    q = q[:rows, :cols] if rows >= cols else jnp.transpose(q)[:rows, :cols]
    return gain * q


def _init_lstm_layer(key, in_size, out_size):
    k1, k2, k3, k4 = jax.random.split(key, 4)
    gain = jnp.sqrt(2.0)
    bound = 1.0 / jnp.sqrt(out_size)
    return {
        "w_ih": _orthogonal(k1, 4 * out_size, in_size, gain),
        "w_hh": _orthogonal(k2, 4 * out_size, out_size, gain),
        "b_ih": jax.random.uniform(k3, (4 * out_size,), jnp.float32, -bound, bound),
        "b_hh": jax.random.uniform(k4, (4 * out_size,), jnp.float32, -bound, bound),
    }


def init_lstm_ae_params(key, input_size, hidden_size, num_layers):
    keys = jax.random.split(key, 2 * num_layers)
    enc_layers, dec_layers = [], []
    for l in range(num_layers):
        enc_in = input_size if l == 0 else hidden_size
        dec_in = hidden_size if l == 0 else input_size
        enc_layers.append(_init_lstm_layer(keys[2 * l], enc_in, hidden_size))
        dec_layers.append(_init_lstm_layer(keys[2 * l + 1], dec_in, input_size))
    return {"encoder": enc_layers, "decoder": dec_layers}


# -----------------------------------------------------------------------------
# Pure-JAX reference (PyTorch eval semantics) for the correctness check.
# -----------------------------------------------------------------------------
def _lstm_ae_reference(params, x, sequence_length):
    def layer(x_bt, w_ih, w_hh, b_ih, b_hh):
        B, T, _ = x_bt.shape
        H = w_hh.shape[1]
        h = jnp.zeros((B, H), jnp.float32)
        c = jnp.zeros((B, H), jnp.float32)
        outs = []
        for t in range(T):
            g = x_bt[:, t] @ w_ih.T + h @ w_hh.T + b_ih + b_hh
            i = jax.nn.sigmoid(g[:, 0:H])
            f = jax.nn.sigmoid(g[:, H:2 * H])
            gg = jnp.tanh(g[:, 2 * H:3 * H])
            o = jax.nn.sigmoid(g[:, 3 * H:4 * H])
            c = f * c + i * gg
            h = o * jnp.tanh(c)
            outs.append(h)
        return jnp.stack(outs, axis=1)

    out = x.astype(jnp.float32)
    for p in params["encoder"]:
        out = layer(out, p["w_ih"], p["w_hh"], p["b_ih"], p["b_hh"])
    last = out[:, -1:, :]
    enc = jnp.broadcast_to(last, (x.shape[0], sequence_length, last.shape[-1]))
    dec = enc
    for p in params["decoder"]:
        dec = layer(dec, p["w_ih"], p["w_hh"], p["b_ih"], p["b_hh"])
    return enc, dec


if __name__ == "__main__":
    B, T, INPUT, HIDDEN = 2, 8, 16, 32
    key = jax.random.PRNGKey(0)

    # Exercise both the single-layer path (no seq_buf traffic) and the
    # multi-layer path (seq_buf + proj_buf reuse across layers).
    for num_layers in (1, 2):
        kx, kp = jax.random.split(jax.random.fold_in(key, num_layers))
        x = jax.random.normal(kx, (B, T, INPUT), jnp.float32)

        params = init_lstm_ae_params(kp, INPUT, HIDDEN, num_layers)
        packed = pack_params(params, INPUT, HIDDEN)   # one-time weight repack

        encoded_x, decoded_x = lstm_ae_forward(packed, x, T, HIDDEN)
        jax.block_until_ready((encoded_x, decoded_x))

        assert encoded_x.shape == (B, T, HIDDEN), encoded_x.shape
        assert decoded_x.shape == (B, T, INPUT), decoded_x.shape

        enc_ref, dec_ref = _lstm_ae_reference(params, x, T)
        err_e = float(jnp.max(jnp.abs(encoded_x - enc_ref)))
        err_d = float(jnp.max(jnp.abs(decoded_x - dec_ref)))
        assert err_e < 1e-4 and err_d < 1e-4, (num_layers, err_e, err_d)

    print("KERNEL_OK")
</pallas_src>

<mosaic_0001>
module attributes {stable_mosaic.version = 11 : i64} {
  func.func @_lstm_ae_kernel(%arg0: memref<64x128xf32, #tpu.memory_space<vmem>>, %arg1: memref<1x128x512xf32, #tpu.memory_space<vmem>>, %arg2: memref<1x128x512xf32, #tpu.memory_space<vmem>>, %arg3: memref<1x1x512xf32, #tpu.memory_space<vmem>>, %arg4: memref<1x128x512xf32, #tpu.memory_space<vmem>>, %arg5: memref<1x128x512xf32, #tpu.memory_space<vmem>>, %arg6: memref<1x1x512xf32, #tpu.memory_space<vmem>>, %arg7: memref<64x128xf32, #tpu.memory_space<vmem>>, %arg8: memref<64x128xf32, #tpu.memory_space<vmem>>, %arg9: memref<8x128xf32, #tpu.memory_space<vmem>>, %arg10: memref<64x512xf32, #tpu.memory_space<vmem>>) attributes {dimension_semantics = [], scalar_prefetch = 0 : i64, scratch_operands = 2 : i64, tpu.core_type = #tpu.core_type<tc>} {
    %c0 = arith.constant 0 : index
    %c0_0 = arith.constant 0 : index
    %0 = vector.load %arg0[%c0, %c0_0] : memref<64x128xf32, #tpu.memory_space<vmem>>, vector<64x128xf32>
    %c0_1 = arith.constant 0 : index
    %c0_2 = arith.constant 0 : index
    %c0_3 = arith.constant 0 : index
    %1 = vector.load %arg1[%c0_1, %c0_2, %c0_3] : memref<1x128x512xf32, #tpu.memory_space<vmem>>, vector<1x128x512xf32>
    %2 = vector.shape_cast %1 : vector<1x128x512xf32> to vector<128x512xf32>
    %cst = arith.constant dense<0.000000e+00> : vector<64x512xf32>
    %3 = tpu.matmul %0, %2, %cst {dimension_numbers = #tpu.dot_dimension_numbers<[1], [0], [0], [1], [0, 0, 1, 1], [], []>} : vector<64x128xf32>, vector<128x512xf32>, vector<64x512xf32> -> vector<64x512xf32>
    %c0_4 = arith.constant 0 : index
    %c0_5 = arith.constant 0 : index
    %c0_6 = arith.constant 0 : index
    %4 = vector.load %arg3[%c0_4, %c0_5, %c0_6] : memref<1x1x512xf32, #tpu.memory_space<vmem>>, vector<1x1x512xf32>
    %5 = vector.shape_cast %4 : vector<1x1x512xf32> to vector<1x512xf32>
    %6 = vector.broadcast %5 : vector<1x512xf32> to vector<64x512xf32>
    %7 = arith.addf %3, %6 : vector<64x512xf32>
    %c0_7 = arith.constant 0 : index
    %c0_8 = arith.constant 0 : index
    %8 = vector.load %arg10[%c0_7, %c0_8] : memref<64x512xf32, #tpu.memory_space<vmem>>, vector<64x512xf32>
    tpu.vector_store %arg10[%c0_7, %c0_8], %7 {strides = array<i32>} : memref<64x512xf32, #tpu.memory_space<vmem>>, vector<64x512xf32>,
    %cst_9 = arith.constant 0.000000e+00 : f32
    %9 = vector.broadcast %cst_9 : f32 to vector<8x128xf32>
    %cst_10 = arith.constant 0.000000e+00 : f32
    %10 = vector.broadcast %cst_10 : f32 to vector<8x128xf32>
    %c0_i32 = arith.constant 0 : i32
    %c8_i32 = arith.constant 8 : i32
    %11 = arith.muli %c0_i32, %c8_i32 : i32
    %12 = tpu.assume_multiple %11, 8 : i32
    %13 = arith.index_cast %12 : i32 to index
    %c0_11 = arith.constant 0 : index
    %14 = vector.load %arg10[%13, %c0_11] : memref<64x512xf32, #tpu.memory_space<vmem>>, vector<8x512xf32>
    %c0_12 = arith.constant 0 : index
    %c0_13 = arith.constant 0 : index
    %c0_14 = arith.constant 0 : index
    %15 = vector.load %arg2[%c0_12, %c0_13, %c0_14] : memref<1x128x512xf32, #tpu.memory_space<vmem>>, vector<1x128x512xf32>
    %16 = vector.shape_cast %15 : vector<1x128x512xf32> to vector<128x512xf32>
    %cst_15 = arith.constant dense<0.000000e+00> : vector<8x512xf32>
    %17 = tpu.matmul %9, %16, %cst_15 {dimension_numbers = #tpu.dot_dimension_numbers<[1], [0], [0], [1], [0, 0, 1, 1], [], []>} : vector<8x128xf32>, vector<128x512xf32>, vector<8x512xf32> -> vector<8x512xf32>
    %18 = arith.addf %14, %17 : vector<8x512xf32>
    %19 = vector.extract_strided_slice %18 {offsets = [0, 0], sizes = [8, 128], strides = [1, 1]} : vector<8x512xf32> to vector<8x128xf32>
    %cst_16 = arith.constant 5.000000e-01 : f32
    %20 = vector.broadcast %cst_16 : f32 to vector<8x128xf32>
    %21 = arith.mulf %20, %19 : vector<8x128xf32>
    %22 = math.tanh %21 : vector<8x128xf32>
    %cst_17 = arith.constant 5.000000e-01 : f32
    %23 = vector.broadcast %cst_17 : f32 to vector<8x128xf32>
    %24 = arith.mulf %23, %22 : vector<8x128xf32>
    %cst_18 = arith.constant 5.000000e-01 : f32
    %25 = vector.broadcast %cst_18 : f32 to vector<8x128xf32>
    %26 = arith.addf %24, %25 : vector<8x128xf32>
    %27 = vector.extract_strided_slice %18 {offsets = [0, 128], sizes = [8, 128], strides = [1, 1]} : vector<8x512xf32> to vector<8x128xf32>
    %cst_19 = arith.constant 5.000000e-01 : f32
    %28 = vector.broadcast %cst_19 : f32 to vector<8x128xf32>
    %29 = arith.mulf %28, %27 : vector<8x128xf32>
    %30 = math.tanh %29 : vector<8x128xf32>
    %cst_20 = arith.constant 5.000000e-01 : f32
    %31 = vector.broadcast %cst_20 : f32 to vector<8x128xf32>
    %32 = arith.mulf %31, %30 : vector<8x128xf32>
    %cst_21 = arith.constant 5.000000e-01 : f32
    %33 = vector.broadcast %cst_21 : f32 to vector<8x128xf32>
    %34 = arith.addf %32, %33 : vector<8x128xf32>
    %35 = vector.extract_strided_slice %18 {offsets = [0, 256], sizes = [8, 128], strides = [1, 1]} : vector<8x512xf32> to vector<8x128xf32>
    %36 = math.tanh %35 : vector<8x128xf32>
    %37 = vector.extract_strided_slice %18 {offsets = [0, 384], sizes = [8, 128], strides = [1, 1]} : vector<8x512xf32> to vector<8x128xf32>
    %cst_22 = arith.constant 5.000000e-01 : f32
    %38 = vector.broadcast %cst_22 : f32 to vector<8x128xf32>
    %39 = arith.mulf %38, %37 : vector<8x128xf32>
    %40 = math.tanh %39 : vector<8x128xf32>
    %cst_23 = arith.constant 5.000000e-01 : f32
    %41 = vector.broadcast %cst_23 : f32 to vector<8x128xf32>
    %42 = arith.mulf %41, %40 : vector<8x128xf32>
    %cst_24 = arith.constant 5.000000e-01 : f32
    %43 = vector.broadcast %cst_24 : f32 to vector<8x128xf32>
    %44 = arith.addf %42, %43 : vector<8x128xf32>
    %45 = arith.mulf %34, %10 : vector<8x128xf32>
    %46 = arith.mulf %26, %36 : vector<8x128xf32>
    %47 = arith.addf %45, %46 : vector<8x128xf32>
    %48 = math.tanh %47 : vector<8x128xf32>
    %49 = arith.mulf %44, %48 : vector<8x128xf32>
    %c1_i32 = arith.constant 1 : i32
    %c8_i32_25 = arith.constant 8 : i32
    %50 = arith.muli %c1_i32, %c8_i32_25 : i32
    %51 = tpu.assume_multiple %50, 8 : i32
    %52 = arith.index_cast %51 : i32 to index
    %c0_26 = arith.constant 0 : index
    %53 = vector.load %arg10[%52, %c0_26] : memref<64x512xf32, #tpu.memory_space<vmem>>, vector<8x512xf32>
    %c0_27 = arith.constant 0 : index
    %c0_28 = arith.constant 0 : index
    %c0_29 = arith.constant 0 : index
    %54 = vector.load %arg2[%c0_27, %c0_28, %c0_29] : memref<1x128x512xf32, #tpu.memory_space<vmem>>, vector<1x128x512xf32>
    %55 = vector.shape_cast %54 : vector<1x128x512xf32> to vector<128x512xf32>
    %cst_30 = arith.constant dense<0.000000e+00> : vector<8x512xf32>
    %56 = tpu.matmul %49, %55, %cst_30 {dimension_numbers = #tpu.dot_dimension_numbers<[1], [0], [0], [1], [0, 0, 1, 1], [], []>} : vector<8x128xf32>, vector<128x512xf32>, vector<8x512xf32> -> vector<8x512xf32>
    %57 = arith.addf %53, %56 : vector<8x512xf32>
    %58 = vector.extract_strided_slice %57 {offsets = [0, 0], sizes = [8, 128], strides = [1, 1]} : vector<8x512xf32> to vector<8x128xf32>
    %cst_31 = arith.constant 5.000000e-01 : f32
    %59 = vector.broadcast %cst_31 : f32 to vector<8x128xf32>
    %60 = arith.mulf %59, %58 : vector<8x128xf32>
    %61 = math.tanh %60 : vector<8x128xf32>
    %cst_32 = arith.constant 5.000000e-01 : f32
    %62 = vector.broadcast %cst_32 : f32 to vector<8x128xf32>
    %63 = arith.mulf %62, %61 : vector<8x128xf32>
    %cst_33 = arith.constant 5.000000e-01 : f32
    %64 = vector.broadcast %cst_33 : f32 to vector<8x128xf32>
    %65 = arith.addf %63, %64 : vector<8x128xf32>
    %66 = vector.extract_strided_slice %57 {offsets = [0, 128], sizes = [8, 128], strides = [1, 1]} : vector<8x512xf32> to vector<8x128xf32>
    %cst_34 = arith.constant 5.000000e-01 : f32
    %67 = vector.broadcast %cst_34 : f32 to vector<8x128xf32>
    %68 = arith.mulf %67, %66 : vector<8x128xf32>
    %69 = math.tanh %68 : vector<8x128xf32>
    %cst_35 = arith.constant 5.000000e-01 : f32
    %70 = vector.broadcast %cst_35 : f32 to vector<8x128xf32>
    %71 = arith.mulf %70, %69 : vector<8x128xf32>
    %cst_36 = arith.constant 5.000000e-01 : f32
    %72 = vector.broadcast %cst_36 : f32 to vector<8x128xf32>
    %73 = arith.addf %71, %72 : vector<8x128xf32>
    %74 = vector.extract_strided_slice %57 {offsets = [0, 256], sizes = [8, 128], strides = [1, 1]} : vector<8x512xf32> to vector<8x128xf32>
    %75 = math.tanh %74 : vector<8x128xf32>
    %76 = vector.extract_strided_slice %57 {offsets = [0, 384], sizes = [8, 128], strides = [1, 1]} : vector<8x512xf32> to vector<8x128xf32>
    %cst_37 = arith.constant 5.000000e-01 : f32
    %77 = vector.broadcast %cst_37 : f32 to vector<8x128xf32>
    %78 = arith.mulf %77, %76 : vector<8x128xf32>
    %79 = math.tanh %78 : vector<8x128xf32>
    %cst_38 = arith.constant 5.000000e-01 : f32
    %80 = vector.broadcast %cst_38 : f32 to vector<8x128xf32>
    %81 = arith.mulf %80, %79 : vector<8x128xf32>
    %cst_39 = arith.constant 5.000000e-01 : f32
    %82 = vector.broadcast %cst_39 : f32 to vector<8x128xf32>
    %83 = arith.addf %81, %82 : vector<8x128xf32>
    %84 = arith.mulf %73, %47 : vector<8x128xf32>
    %85 = arith.mulf %65, %75 : vector<8x128xf32>
    %86 = arith.addf %84, %85 : vector<8x128xf32>
    %87 = math.tanh %86 : vector<8x128xf32>
    %88 = arith.mulf %83, %87 : vector<8x128xf32>
    %c2_i32 = arith.constant 2 : i32
    %c8_i32_40 = arith.constant 8 : i32
    %89 = arith.muli %c2_i32, %c8_i32_40 : i32
    %90 = tpu.assume_multiple %89, 8 : i32
    %91 = arith.index_cast %90 : i32 to index
    %c0_41 = arith.constant 0 : index
    %92 = vector.load %arg10[%91, %c0_41] : memref<64x512xf32, #tpu.memory_space<vmem>>, vector<8x512xf32>
    %c0_42 = arith.constant 0 : index
    %c0_43 = arith.constant 0 : index
    %c0_44 = arith.constant 0 : index
    %93 = vector.load %arg2[%c0_42, %c0_43, %c0_44] : memref<1x128x512xf32, #tpu.memory_space<vmem>>, vector<1x128x512xf32>
    %94 = vector.shape_cast %93 : vector<1x128x512xf32> to vector<128x512xf32>
    %cst_45 = arith.constant dense<0.000000e+00> : vector<8x512xf32>
    %95 = tpu.matmul %88, %94, %cst_45 {dimension_numbers = #tpu.dot_dimension_numbers<[1], [0], [0], [1], [0, 0, 1, 1], [], []>} : vector<8x128xf32>, vector<128x512xf32>, vector<8x512xf32> -> vector<8x512xf32>
    %96 = arith.addf %92, %95 : vector<8x512xf32>
    %97 = vector.extract_strided_slice %96 {offsets = [0, 0], sizes = [8, 128], strides = [1, 1]} : vector<8x512xf32> to vector<8x128xf32>
    %cst_46 = arith.constant 5.000000e-01 : f32
    %98 = vector.broadcast %cst_46 : f32 to vector<8x128xf32>
    %99 = arith.mulf %98, %97 : vector<8x128xf32>
    %100 = math.tanh %99 : vector<8x128xf32>
    %cst_47 = arith.constant 5.000000e-01 : f32
    %101 = vector.broadcast %cst_47 : f32 to vector<8x128xf32>
    %102 = arith.mulf %101, %100 : vector<8x128xf32>
    %cst_48 = arith.constant 5.000000e-01 : f32
    %103 = vector.broadcast %cst_48 : f32 to vector<8x128xf32>
    %104 = arith.addf %102, %103 : vector<8x128xf32>
    %105 = vector.extract_strided_slice %96 {offsets = [0, 128], sizes = [8, 128], strides = [1, 1]} : vector<8x512xf32> to vector<8x128xf32>
    %cst_49 = arith.constant 5.000000e-01 : f32
    %106 = vector.broadcast %cst_49 : f32 to vector<8x128xf32>
    %107 = arith.mulf %106, %105 : vector<8x128xf32>
    %108 = math.tanh %107 : vector<8x128xf32>
    %cst_50 = arith.constant 5.000000e-01 : f32
    %109 = vector.broadcast %cst_50 : f32 to vector<8x128xf32>
    %110 = arith.mulf %109, %108 : vector<8x128xf32>
    %cst_51 = arith.constant 5.000000e-01 : f32
    %111 = vector.broadcast %cst_51 : f32 to vector<8x128xf32>
    %112 = arith.addf %110, %111 : vector<8x128xf32>
    %113 = vector.extract_strided_slice %96 {offsets = [0, 256], sizes = [8, 128], strides = [1, 1]} : vector<8x512xf32> to vector<8x128xf32>
    %114 = math.tanh %113 : vector<8x128xf32>
    %115 = vector.extract_strided_slice %96 {offsets = [0, 384], sizes = [8, 128], strides = [1, 1]} : vector<8x512xf32> to vector<8x128xf32>
    %cst_52 = arith.constant 5.000000e-01 : f32
    %116 = vector.broadcast %cst_52 : f32 to vector<8x128xf32>
    %117 = arith.mulf %116, %115 : vector<8x128xf32>
    %118 = math.tanh %117 : vector<8x128xf32>
    %cst_53 = arith.constant 5.000000e-01 : f32
    %119 = vector.broadcast %cst_53 : f32 to vector<8x128xf32>
    %120 = arith.mulf %119, %118 : vector<8x128xf32>
    %cst_54 = arith.constant 5.000000e-01 : f32
    %121 = vector.broadcast %cst_54 : f32 to vector<8x128xf32>
    %122 = arith.addf %120, %121 : vector<8x128xf32>
    %123 = arith.mulf %112, %86 : vector<8x128xf32>
    %124 = arith.mulf %104, %114 : vector<8x128xf32>
    %125 = arith.addf %123, %124 : vector<8x128xf32>
    %126 = math.tanh %125 : vector<8x128xf32>
    %127 = arith.mulf %122, %126 : vector<8x128xf32>
    %c3_i32 = arith.constant 3 : i32
    %c8_i32_55 = arith.constant 8 : i32
    %128 = arith.muli %c3_i32, %c8_i32_55 : i32
    %129 = tpu.assume_multiple %128, 8 : i32
    %130 = arith.index_cast %129 : i32 to index
    %c0_56 = arith.constant 0 : index
    %131 = vector.load %arg10[%130, %c0_56] : memref<64x512xf32, #tpu.memory_space<vmem>>, vector<8x512xf32>
    %c0_57 = arith.constant 0 : index
    %c0_58 = arith.constant 0 : index
    %c0_59 = arith.constant 0 : index
    %132 = vector.load %arg2[%c0_57, %c0_58, %c0_59] : memref<1x128x512xf32, #tpu.memory_space<vmem>>, vector<1x128x512xf32>
    %133 = vector.shape_cast %132 : vector<1x128x512xf32> to vector<128x512xf32>
    %cst_60 = arith.constant dense<0.000000e+00> : vector<8x512xf32>
    %134 = tpu.matmul %127, %133, %cst_60 {dimension_numbers = #tpu.dot_dimension_numbers<[1], [0], [0], [1], [0, 0, 1, 1], [], []>} : vector<8x128xf32>, vector<128x512xf32>, vector<8x512xf32> -> vector<8x512xf32>
    %135 = arith.addf %131, %134 : vector<8x512xf32>
    %136 = vector.extract_strided_slice %135 {offsets = [0, 0], sizes = [8, 128], strides = [1, 1]} : vector<8x512xf32> to vector<8x128xf32>
    %cst_61 = arith.constant 5.000000e-01 : f32
    %137 = vector.broadcast %cst_61 : f32 to vector<8x128xf32>
    %138 = arith.mulf %137, %136 : vector<8x128xf32>
    %139 = math.tanh %138 : vector<8x128xf32>
    %cst_62 = arith.constant 5.000000e-01 : f32
    %140 = vector.broadcast %cst_62 : f32 to vector<8x128xf32>
    %141 = arith.mulf %140, %139 : vector<8x128xf32>
    %cst_63 = arith.constant 5.000000e-01 : f32
    %142 = vector.broadcast %cst_63 : f32 to vector<8x128xf32>
    %143 = arith.addf %141, %142 : vector<8x128xf32>
    %144 = vector.extract_strided_slice %135 {offsets = [0, 128], sizes = [8, 128], strides = [1, 1]} : vector<8x512xf32> to vector<8x128xf32>
    %cst_64 = arith.constant 5.000000e-01 : f32
    %145 = vector.broadcast %cst_64 : f32 to vector<8x128xf32>
    %146 = arith.mulf %145, %144 : vector<8x128xf32>
    %147 = math.tanh %146 : vector<8x128xf32>
    %cst_65 = arith.constant 5.000000e-01 : f32
    %148 = vector.broadcast %cst_65 : f32 to vector<8x128xf32>
    %149 = arith.mulf %148, %147 : vector<8x128xf32>
    %cst_66 = arith.constant 5.000000e-01 : f32
    %150 = vector.broadcast %cst_66 : f32 to vector<8x128xf32>
    %151 = arith.addf %149, %150 : vector<8x128xf32>
    %152 = vector.extract_strided_slice %135 {offsets = [0, 256], sizes = [8, 128], strides = [1, 1]} : vector<8x512xf32> to vector<8x128xf32>
    %153 = math.tanh %152 : vector<8x128xf32>
    %154 = vector.extract_strided_slice %135 {offsets = [0, 384], sizes = [8, 128], strides = [1, 1]} : vector<8x512xf32> to vector<8x128xf32>
    %cst_67 = arith.constant 5.000000e-01 : f32
    %155 = vector.broadcast %cst_67 : f32 to vector<8x128xf32>
    %156 = arith.mulf %155, %154 : vector<8x128xf32>
    %157 = math.tanh %156 : vector<8x128xf32>
    %cst_68 = arith.constant 5.000000e-01 : f32
    %158 = vector.broadcast %cst_68 : f32 to vector<8x128xf32>
    %159 = arith.mulf %158, %157 : vector<8x128xf32>
    %cst_69 = arith.constant 5.000000e-01 : f32
    %160 = vector.broadcast %cst_69 : f32 to vector<8x128xf32>
    %161 = arith.addf %159, %160 : vector<8x128xf32>
    %162 = arith.mulf %151, %125 : vector<8x128xf32>
    %163 = arith.mulf %143, %153 : vector<8x128xf32>
    %164 = arith.addf %162, %163 : vector<8x128xf32>
    %165 = math.tanh %164 : vector<8x128xf32>
    %166 = arith.mulf %161, %165 : vector<8x128xf32>
    %c4_i32 = arith.constant 4 : i32
    %c8_i32_70 = arith.constant 8 : i32
    %167 = arith.muli %c4_i32, %c8_i32_70 : i32
    %168 = tpu.assume_multiple %167, 8 : i32
    %169 = arith.index_cast %168 : i32 to index
    %c0_71 = arith.constant 0 : index
    %170 = vector.load %arg10[%169, %c0_71] : memref<64x512xf32, #tpu.memory_space<vmem>>, vector<8x512xf32>
    %c0_72 = arith.constant 0 : index
    %c0_73 = arith.constant 0 : index
    %c0_74 = arith.constant 0 : index
    %171 = vector.load %arg2[%c0_72, %c0_73, %c0_74] : memref<1x128x512xf32, #tpu.memory_space<vmem>>, vector<1x128x512xf32>
    %172 = vector.shape_cast %171 : vector<1x128x512xf32> to vector<128x512xf32>
    %cst_75 = arith.constant dense<0.000000e+00> : vector<8x512xf32>
    %173 = tpu.matmul %166, %172, %cst_75 {dimension_numbers = #tpu.dot_dimension_numbers<[1], [0], [0], [1], [0, 0, 1, 1], [], []>} : vector<8x128xf32>, vector<128x512xf32>, vector<8x512xf32> -> vector<8x512xf32>
    %174 = arith.addf %170, %173 : vector<8x512xf32>
    %175 = vector.extract_strided_slice %174 {offsets = [0, 0], sizes = [8, 128], strides = [1, 1]} : vector<8x512xf32> to vector<8x128xf32>
    %cst_76 = arith.constant 5.000000e-01 : f32
    %176 = vector.broadcast %cst_76 : f32 to vector<8x128xf32>
    %177 = arith.mulf %176, %175 : vector<8x128xf32>
    %178 = math.tanh %177 : vector<8x128xf32>
    %cst_77 = arith.constant 5.000000e-01 : f32
    %179 = vector.broadcast %cst_77 : f32 to vector<8x128xf32>
    %180 = arith.mulf %179, %178 : vector<8x128xf32>
    %cst_78 = arith.constant 5.000000e-01 : f32
    %181 = vector.broadcast %cst_78 : f32 to vector<8x128xf32>
    %182 = arith.addf %180, %181 : vector<8x128xf32>
    %183 = vector.extract_strided_slice %174 {offsets = [0, 128], sizes = [8, 128], strides = [1, 1]} : vector<8x512xf32> to vector<8x128xf32>
    %cst_79 = arith.constant 5.000000e-01 : f32
    %184 = vector.broadcast %cst_79 : f32 to vector<8x128xf32>
    %185 = arith.mulf %184, %183 : vector<8x128xf32>
    %186 = math.tanh %185 : vector<8x128xf32>
    %cst_80 = arith.constant 5.000000e-01 : f32
    %187 = vector.broadcast %cst_80 : f32 to vector<8x128xf32>
    %188 = arith.mulf %187, %186 : vector<8x128xf32>
    %cst_81 = arith.constant 5.000000e-01 : f32
    %189 = vector.broadcast %cst_81 : f32 to vector<8x128xf32>
    %190 = arith.addf %188, %189 : vector<8x128xf32>
    %191 = vector.extract_strided_slice %174 {offsets = [0, 256], sizes = [8, 128], strides = [1, 1]} : vector<8x512xf32> to vector<8x128xf32>
    %192 = math.tanh %191 : vector<8x128xf32>
    %193 = vector.extract_strided_slice %174 {offsets = [0, 384], sizes = [8, 128], strides = [1, 1]} : vector<8x512xf32> to vector<8x128xf32>
    %cst_82 = arith.constant 5.000000e-01 : f32
    %194 = vector.broadcast %cst_82 : f32 to vector<8x128xf32>
    %195 = arith.mulf %194, %193 : vector<8x128xf32>
    %196 = math.tanh %195 : vector<8x128xf32>
    %cst_83 = arith.constant 5.000000e-01 : f32
    %197 = vector.broadcast %cst_83 : f32 to vector<8x128xf32>
    %198 = arith.mulf %197, %196 : vector<8x128xf32>
    %cst_84 = arith.constant 5.000000e-01 : f32
    %199 = vector.broadcast %cst_84 : f32 to vector<8x128xf32>
    %200 = arith.addf %198, %199 : vector<8x128xf32>
    %201 = arith.mulf %190, %164 : vector<8x128xf32>
    %202 = arith.mulf %182, %192 : vector<8x128xf32>
    %203 = arith.addf %201, %202 : vector<8x128xf32>
    %204 = math.tanh %203 : vector<8x128xf32>
    %205 = arith.mulf %200, %204 : vector<8x128xf32>
    %c5_i32 = arith.constant 5 : i32
    %c8_i32_85 = arith.constant 8 : i32
    %206 = arith.muli %c5_i32, %c8_i32_85 : i32
    %207 = tpu.assume_multiple %206, 8 : i32
    %208 = arith.index_cast %207 : i32 to index
    %c0_86 = arith.constant 0 : index
    %209 = vector.load %arg10[%208, %c0_86] : memref<64x512xf32, #tpu.memory_space<vmem>>, vector<8x512xf32>
    %c0_87 = arith.constant 0 : index
    %c0_88 = arith.constant 0 : index
    %c0_89 = arith.constant 0 : index
    %210 = vector.load %arg2[%c0_87, %c0_88, %c0_89] : memref<1x128x512xf32, #tpu.memory_space<vmem>>, vector<1x128x512xf32>
    %211 = vector.shape_cast %210 : vector<1x128x512xf32> to vector<128x512xf32>
    %cst_90 = arith.constant dense<0.000000e+00> : vector<8x512xf32>
    %212 = tpu.matmul %205, %211, %cst_90 {dimension_numbers = #tpu.dot_dimension_numbers<[1], [0], [0], [1], [0, 0, 1, 1], [], []>} : vector<8x128xf32>, vector<128x512xf32>, vector<8x512xf32> -> vector<8x512xf32>
    %213 = arith.addf %209, %212 : vector<8x512xf32>
    %214 = vector.extract_strided_slice %213 {offsets = [0, 0], sizes = [8, 128], strides = [1, 1]} : vector<8x512xf32> to vector<8x128xf32>
    %cst_91 = arith.constant 5.000000e-01 : f32
    %215 = vector.broadcast %cst_91 : f32 to vector<8x128xf32>
    %216 = arith.mulf %215, %214 : vector<8x128xf32>
    %217 = math.tanh %216 : vector<8x128xf32>
    %cst_92 = arith.constant 5.000000e-01 : f32
    %218 = vector.broadcast %cst_92 : f32 to vector<8x128xf32>
    %219 = arith.mulf %218, %217 : vector<8x128xf32>
    %cst_93 = arith.constant 5.000000e-01 : f32
    %220 = vector.broadcast %cst_93 : f32 to vector<8x128xf32>
    %221 = arith.addf %219, %220 : vector<8x128xf32>
    %222 = vector.extract_strided_slice %213 {offsets = [0, 128], sizes = [8, 128], strides = [1, 1]} : vector<8x512xf32> to vector<8x128xf32>
    %cst_94 = arith.constant 5.000000e-01 : f32
    %223 = vector.broadcast %cst_94 : f32 to vector<8x128xf32>
    %224 = arith.mulf %223, %222 : vector<8x128xf32>
    %225 = math.tanh %224 : vector<8x128xf32>
    %cst_95 = arith.constant 5.000000e-01 : f32
    %226 = vector.broadcast %cst_95 : f32 to vector<8x128xf32>
    %227 = arith.mulf %226, %225 : vector<8x128xf32>
    %cst_96 = arith.constant 5.000000e-01 : f32
    %228 = vector.broadcast %cst_96 : f32 to vector<8x128xf32>
    %229 = arith.addf %227, %228 : vector<8x128xf32>
    %230 = vector.extract_strided_slice %213 {offsets = [0, 256], sizes = [8, 128], strides = [1, 1]} : vector<8x512xf32> to vector<8x128xf32>
    %231 = math.tanh %230 : vector<8x128xf32>
    %232 = vector.extract_strided_slice %213 {offsets = [0, 384], sizes = [8, 128], strides = [1, 1]} : vector<8x512xf32> to vector<8x128xf32>
    %cst_97 = arith.constant 5.000000e-01 : f32
    %233 = vector.broadcast %cst_97 : f32 to vector<8x128xf32>
    %234 = arith.mulf %233, %232 : vector<8x128xf32>
    %235 = math.tanh %234 : vector<8x128xf32>
    %cst_98 = arith.constant 5.000000e-01 : f32
    %236 = vector.broadcast %cst_98 : f32 to vector<8x128xf32>
    %237 = arith.mulf %236, %235 : vector<8x128xf32>
    %cst_99 = arith.constant 5.000000e-01 : f32
    %238 = vector.broadcast %cst_99 : f32 to vector<8x128xf32>
    %239 = arith.addf %237, %238 : vector<8x128xf32>
    %240 = arith.mulf %229, %203 : vector<8x128xf32>
    %241 = arith.mulf %221, %231 : vector<8x128xf32>
    %242 = arith.addf %240, %241 : vector<8x128xf32>
    %243 = math.tanh %242 : vector<8x128xf32>
    %244 = arith.mulf %239, %243 : vector<8x128xf32>
    %c6_i32 = arith.constant 6 : i32
    %c8_i32_100 = arith.constant 8 : i32
    %245 = arith.muli %c6_i32, %c8_i32_100 : i32
    %246 = tpu.assume_multiple %245, 8 : i32
    %247 = arith.index_cast %246 : i32 to index
    %c0_101 = arith.constant 0 : index
    %248 = vector.load %arg10[%247, %c0_101] : memref<64x512xf32, #tpu.memory_space<vmem>>, vector<8x512xf32>
    %c0_102 = arith.constant 0 : index
    %c0_103 = arith.constant 0 : index
    %c0_104 = arith.constant 0 : index
    %249 = vector.load %arg2[%c0_102, %c0_103, %c0_104] : memref<1x128x512xf32, #tpu.memory_space<vmem>>, vector<1x128x512xf32>
    %250 = vector.shape_cast %249 : vector<1x128x512xf32> to vector<128x512xf32>
    %cst_105 = arith.constant dense<0.000000e+00> : vector<8x512xf32>
    %251 = tpu.matmul %244, %250, %cst_105 {dimension_numbers = #tpu.dot_dimension_numbers<[1], [0], [0], [1], [0, 0, 1, 1], [], []>} : vector<8x128xf32>, vector<128x512xf32>, vector<8x512xf32> -> vector<8x512xf32>
    %252 = arith.addf %248, %251 : vector<8x512xf32>
    %253 = vector.extract_strided_slice %252 {offsets = [0, 0], sizes = [8, 128], strides = [1, 1]} : vector<8x512xf32> to vector<8x128xf32>
    %cst_106 = arith.constant 5.000000e-01 : f32
    %254 = vector.broadcast %cst_106 : f32 to vector<8x128xf32>
    %255 = arith.mulf %254, %253 : vector<8x128xf32>
    %256 = math.tanh %255 : vector<8x128xf32>
    %cst_107 = arith.constant 5.000000e-01 : f32
    %257 = vector.broadcast %cst_107 : f32 to vector<8x128xf32>
    %258 = arith.mulf %257, %256 : vector<8x128xf32>
    %cst_108 = arith.constant 5.000000e-01 : f32
    %259 = vector.broadcast %cst_108 : f32 to vector<8x128xf32>
    %260 = arith.addf %258, %259 : vector<8x128xf32>
    %261 = vector.extract_strided_slice %252 {offsets = [0, 128], sizes = [8, 128], strides = [1, 1]} : vector<8x512xf32> to vector<8x128xf32>
    %cst_109 = arith.constant 5.000000e-01 : f32
    %262 = vector.broadcast %cst_109 : f32 to vector<8x128xf32>
    %263 = arith.mulf %262, %261 : vector<8x128xf32>
    %264 = math.tanh %263 : vector<8x128xf32>
    %cst_110 = arith.constant 5.000000e-01 : f32
    %265 = vector.broadcast %cst_110 : f32 to vector<8x128xf32>
    %266 = arith.mulf %265, %264 : vector<8x128xf32>
    %cst_111 = arith.constant 5.000000e-01 : f32
    %267 = vector.broadcast %cst_111 : f32 to vector<8x128xf32>
    %268 = arith.addf %266, %267 : vector<8x128xf32>
    %269 = vector.extract_strided_slice %252 {offsets = [0, 256], sizes = [8, 128], strides = [1, 1]} : vector<8x512xf32> to vector<8x128xf32>
    %270 = math.tanh %269 : vector<8x128xf32>
    %271 = vector.extract_strided_slice %252 {offsets = [0, 384], sizes = [8, 128], strides = [1, 1]} : vector<8x512xf32> to vector<8x128xf32>
    %cst_112 = arith.constant 5.000000e-01 : f32
    %272 = vector.broadcast %cst_112 : f32 to vector<8x128xf32>
    %273 = arith.mulf %272, %271 : vector<8x128xf32>
    %274 = math.tanh %273 : vector<8x128xf32>
    %cst_113 = arith.constant 5.000000e-01 : f32
    %275 = vector.broadcast %cst_113 : f32 to vector<8x128xf32>
    %276 = arith.mulf %275, %274 : vector<8x128xf32>
    %cst_114 = arith.constant 5.000000e-01 : f32
    %277 = vector.broadcast %cst_114 : f32 to vector<8x128xf32>
    %278 = arith.addf %276, %277 : vector<8x128xf32>
    %279 = arith.mulf %268, %242 : vector<8x128xf32>
    %280 = arith.mulf %260, %270 : vector<8x128xf32>
    %281 = arith.addf %279, %280 : vector<8x128xf32>
    %282 = math.tanh %281 : vector<8x128xf32>
    %283 = arith.mulf %278, %282 : vector<8x128xf32>
    %c7_i32 = arith.constant 7 : i32
    %c8_i32_115 = arith.constant 8 : i32
    %284 = arith.muli %c7_i32, %c8_i32_115 : i32
    %285 = tpu.assume_multiple %284, 8 : i32
    %286 = arith.index_cast %285 : i32 to index
    %c0_116 = arith.constant 0 : index
    %287 = vector.load %arg10[%286, %c0_116] : memref<64x512xf32, #tpu.memory_space<vmem>>, vector<8x512xf32>
    %c0_117 = arith.constant 0 : index
    %c0_118 = arith.constant 0 : index
    %c0_119 = arith.constant 0 : index
    %288 = vector.load %arg2[%c0_117, %c0_118, %c0_119] : memref<1x128x512xf32, #tpu.memory_space<vmem>>, vector<1x128x512xf32>
    %289 = vector.shape_cast %288 : vector<1x128x512xf32> to vector<128x512xf32>
    %cst_120 = arith.constant dense<0.000000e+00> : vector<8x512xf32>
    %290 = tpu.matmul %283, %289, %cst_120 {dimension_numbers = #tpu.dot_dimension_numbers<[1], [0], [0], [1], [0, 0, 1, 1], [], []>} : vector<8x128xf32>, vector<128x512xf32>, vector<8x512xf32> -> vector<8x512xf32>
    %291 = arith.addf %287, %290 : vector<8x512xf32>
    %292 = vector.extract_strided_slice %291 {offsets = [0, 0], sizes = [8, 128], strides = [1, 1]} : vector<8x512xf32> to vector<8x128xf32>
    %cst_121 = arith.constant 5.000000e-01 : f32
    %293 = vector.broadcast %cst_121 : f32 to vector<8x128xf32>
    %294 = arith.mulf %293, %292 : vector<8x128xf32>
    %295 = math.tanh %294 : vector<8x128xf32>
    %cst_122 = arith.constant 5.000000e-01 : f32
    %296 = vector.broadcast %cst_122 : f32 to vector<8x128xf32>
    %297 = arith.mulf %296, %295 : vector<8x128xf32>
    %cst_123 = arith.constant 5.000000e-01 : f32
    %298 = vector.broadcast %cst_123 : f32 to vector<8x128xf32>
    %299 = arith.addf %297, %298 : vector<8x128xf32>
    %300 = vector.extract_strided_slice %291 {offsets = [0, 128], sizes = [8, 128], strides = [1, 1]} : vector<8x512xf32> to vector<8x128xf32>
    %cst_124 = arith.constant 5.000000e-01 : f32
    %301 = vector.broadcast %cst_124 : f32 to vector<8x128xf32>
    %302 = arith.mulf %301, %300 : vector<8x128xf32>
    %303 = math.tanh %302 : vector<8x128xf32>
    %cst_125 = arith.constant 5.000000e-01 : f32
    %304 = vector.broadcast %cst_125 : f32 to vector<8x128xf32>
    %305 = arith.mulf %304, %303 : vector<8x128xf32>
    %cst_126 = arith.constant 5.000000e-01 : f32
    %306 = vector.broadcast %cst_126 : f32 to vector<8x128xf32>
    %307 = arith.addf %305, %306 : vector<8x128xf32>
    %308 = vector.extract_strided_slice %291 {offsets = [0, 256], sizes = [8, 128], strides = [1, 1]} : vector<8x512xf32> to vector<8x128xf32>
    %309 = math.tanh %308 : vector<8x128xf32>
    %310 = vector.extract_strided_slice %291 {offsets = [0, 384], sizes = [8, 128], strides = [1, 1]} : vector<8x512xf32> to vector<8x128xf32>
    %cst_127 = arith.constant 5.000000e-01 : f32
    %311 = vector.broadcast %cst_127 : f32 to vector<8x128xf32>
    %312 = arith.mulf %311, %310 : vector<8x128xf32>
    %313 = math.tanh %312 : vector<8x128xf32>
    %cst_128 = arith.constant 5.000000e-01 : f32
    %314 = vector.broadcast %cst_128 : f32 to vector<8x128xf32>
    %315 = arith.mulf %314, %313 : vector<8x128xf32>
    %cst_129 = arith.constant 5.000000e-01 : f32
    %316 = vector.broadcast %cst_129 : f32 to vector<8x128xf32>
    %317 = arith.addf %315, %316 : vector<8x128xf32>
    %318 = arith.mulf %307, %281 : vector<8x128xf32>
    %319 = arith.mulf %299, %309 : vector<8x128xf32>
    %320 = arith.addf %318, %319 : vector<8x128xf32>
    %321 = math.tanh %320 : vector<8x128xf32>
    %322 = arith.mulf %317, %321 : vector<8x128xf32>
    %c8_i32_130 = arith.constant 8 : i32
    %323 = tpu.concatenate %322, %322, %322, %322, %322, %322, %322, %322 in 0 : vector<8x128xf32>, vector<8x128xf32>, vector<8x128xf32>, vector<8x128xf32>, vector<8x128xf32>, vector<8x128xf32>, vector<8x128xf32>, vector<8x128xf32> -> vector<64x128xf32>
    %c0_131 = arith.constant 0 : index
    %c0_132 = arith.constant 0 : index
    %324 = vector.load %arg7[%c0_131, %c0_132] : memref<64x128xf32, #tpu.memory_space<vmem>>, vector<64x128xf32>
    tpu.vector_store %arg7[%c0_131, %c0_132], %323 {strides = array<i32>} : memref<64x128xf32, #tpu.memory_space<vmem>>, vector<64x128xf32>,
    %c0_133 = arith.constant 0 : index
    %c0_134 = arith.constant 0 : index
    %c0_135 = arith.constant 0 : index
    %325 = vector.load %arg4[%c0_133, %c0_134, %c0_135] : memref<1x128x512xf32, #tpu.memory_space<vmem>>, vector<1x128x512xf32>
    %326 = vector.shape_cast %325 : vector<1x128x512xf32> to vector<128x512xf32>
    %cst_136 = arith.constant dense<0.000000e+00> : vector<8x512xf32>
    %327 = tpu.matmul %322, %326, %cst_136 {dimension_numbers = #tpu.dot_dimension_numbers<[1], [0], [0], [1], [0, 0, 1, 1], [], []>} : vector<8x128xf32>, vector<128x512xf32>, vector<8x512xf32> -> vector<8x512xf32>
    %c0_137 = arith.constant 0 : index
    %c0_138 = arith.constant 0 : index
    %c0_139 = arith.constant 0 : index
    %328 = vector.load %arg6[%c0_137, %c0_138, %c0_139] : memref<1x1x512xf32, #tpu.memory_space<vmem>>, vector<1x1x512xf32>
    %329 = vector.shape_cast %328 : vector<1x1x512xf32> to vector<1x512xf32>
    %330 = vector.broadcast %329 : vector<1x512xf32> to vector<8x512xf32>
    %331 = arith.addf %327, %330 : vector<8x512xf32>
    %cst_140 = arith.constant 0.000000e+00 : f32
    %332 = vector.broadcast %cst_140 : f32 to vector<8x128xf32>
    %cst_141 = arith.constant 0.000000e+00 : f32
    %333 = vector.broadcast %cst_141 : f32 to vector<8x128xf32>
    %c0_i32_142 = arith.constant 0 : i32
    %c0_143 = arith.constant 0 : index
    %c0_144 = arith.constant 0 : index
    %c0_145 = arith.constant 0 : index
    %334 = vector.load %arg5[%c0_143, %c0_144, %c0_145] : memref<1x128x512xf32, #tpu.memory_space<vmem>>, vector<1x128x512xf32>
    %335 = vector.shape_cast %334 : vector<1x128x512xf32> to vector<128x512xf32>
    %cst_146 = arith.constant dense<0.000000e+00> : vector<8x512xf32>
    %336 = tpu.matmul %332, %335, %cst_146 {dimension_numbers = #tpu.dot_dimension_numbers<[1], [0], [0], [1], [0, 0, 1, 1], [], []>} : vector<8x128xf32>, vector<128x512xf32>, vector<8x512xf32> -> vector<8x512xf32>
    %337 = arith.addf %331, %336 : vector<8x512xf32>
    %338 = vector.extract_strided_slice %337 {offsets = [0, 0], sizes = [8, 128], strides = [1, 1]} : vector<8x512xf32> to vector<8x128xf32>
    %cst_147 = arith.constant 5.000000e-01 : f32
    %339 = vector.broadcast %cst_147 : f32 to vector<8x128xf32>
    %340 = arith.mulf %339, %338 : vector<8x128xf32>
    %341 = math.tanh %340 : vector<8x128xf32>
    %cst_148 = arith.constant 5.000000e-01 : f32
    %342 = vector.broadcast %cst_148 : f32 to vector<8x128xf32>
    %343 = arith.mulf %342, %341 : vector<8x128xf32>
    %cst_149 = arith.constant 5.000000e-01 : f32
    %344 = vector.broadcast %cst_149 : f32 to vector<8x128xf32>
    %345 = arith.addf %343, %344 : vector<8x128xf32>
    %346 = vector.extract_strided_slice %337 {offsets = [0, 128], sizes = [8, 128], strides = [1, 1]} : vector<8x512xf32> to vector<8x128xf32>
    %cst_150 = arith.constant 5.000000e-01 : f32
    %347 = vector.broadcast %cst_150 : f32 to vector<8x128xf32>
    %348 = arith.mulf %347, %346 : vector<8x128xf32>
    %349 = math.tanh %348 : vector<8x128xf32>
    %cst_151 = arith.constant 5.000000e-01 : f32
    %350 = vector.broadcast %cst_151 : f32 to vector<8x128xf32>
    %351 = arith.mulf %350, %349 : vector<8x128xf32>
    %cst_152 = arith.constant 5.000000e-01 : f32
    %352 = vector.broadcast %cst_152 : f32 to vector<8x128xf32>
    %353 = arith.addf %351, %352 : vector<8x128xf32>
    %354 = vector.extract_strided_slice %337 {offsets = [0, 256], sizes = [8, 128], strides = [1, 1]} : vector<8x512xf32> to vector<8x128xf32>
    %355 = math.tanh %354 : vector<8x128xf32>
    %356 = vector.extract_strided_slice %337 {offsets = [0, 384], sizes = [8, 128], strides = [1, 1]} : vector<8x512xf32> to vector<8x128xf32>
    %cst_153 = arith.constant 5.000000e-01 : f32
    %357 = vector.broadcast %cst_153 : f32 to vector<8x128xf32>
    %358 = arith.mulf %357, %356 : vector<8x128xf32>
    %359 = math.tanh %358 : vector<8x128xf32>
    %cst_154 = arith.constant 5.000000e-01 : f32
    %360 = vector.broadcast %cst_154 : f32 to vector<8x128xf32>
    %361 = arith.mulf %360, %359 : vector<8x128xf32>
    %cst_155 = arith.constant 5.000000e-01 : f32
    %362 = vector.broadcast %cst_155 : f32 to vector<8x128xf32>
    %363 = arith.addf %361, %362 : vector<8x128xf32>
    %364 = arith.mulf %353, %333 : vector<8x128xf32>
    %365 = arith.mulf %345, %355 : vector<8x128xf32>
    %366 = arith.addf %364, %365 : vector<8x128xf32>
    %367 = math.tanh %366 : vector<8x128xf32>
    %368 = arith.mulf %363, %367 : vector<8x128xf32>
    %c8_i32_156 = arith.constant 8 : i32
    %369 = arith.muli %c0_i32_142, %c8_i32_156 : i32
    %370 = tpu.assume_multiple %369, 8 : i32
    %371 = arith.index_cast %370 : i32 to index
    %c0_157 = arith.constant 0 : index
    %372 = vector.load %arg8[%371, %c0_157] : memref<64x128xf32, #tpu.memory_space<vmem>>, vector<8x128xf32>
    tpu.vector_store %arg8[%371, %c0_157], %368 {strides = array<i32>} : memref<64x128xf32, #tpu.memory_space<vmem>>, vector<8x128xf32>,
    %c1_i32_158 = arith.constant 1 : i32
    %c0_159 = arith.constant 0 : index
    %c0_160 = arith.constant 0 : index
    %c0_161 = arith.constant 0 : index
    %373 = vector.load %arg5[%c0_159, %c0_160, %c0_161] : memref<1x128x512xf32, #tpu.memory_space<vmem>>, vector<1x128x512xf32>
    %374 = vector.shape_cast %373 : vector<1x128x512xf32> to vector<128x512xf32>
    %cst_162 = arith.constant dense<0.000000e+00> : vector<8x512xf32>
    %375 = tpu.matmul %368, %374, %cst_162 {dimension_numbers = #tpu.dot_dimension_numbers<[1], [0], [0], [1], [0, 0, 1, 1], [], []>} : vector<8x128xf32>, vector<128x512xf32>, vector<8x512xf32> -> vector<8x512xf32>
    %376 = arith.addf %331, %375 : vector<8x512xf32>
    %377 = vector.extract_strided_slice %376 {offsets = [0, 0], sizes = [8, 128], strides = [1, 1]} : vector<8x512xf32> to vector<8x128xf32>
    %cst_163 = arith.constant 5.000000e-01 : f32
    %378 = vector.broadcast %cst_163 : f32 to vector<8x128xf32>
    %379 = arith.mulf %378, %377 : vector<8x128xf32>
    %380 = math.tanh %379 : vector<8x128xf32>
    %cst_164 = arith.constant 5.000000e-01 : f32
    %381 = vector.broadcast %cst_164 : f32 to vector<8x128xf32>
    %382 = arith.mulf %381, %380 : vector<8x128xf32>
    %cst_165 = arith.constant 5.000000e-01 : f32
    %383 = vector.broadcast %cst_165 : f32 to vector<8x128xf32>
    %384 = arith.addf %382, %383 : vector<8x128xf32>
    %385 = vector.extract_strided_slice %376 {offsets = [0, 128], sizes = [8, 128], strides = [1, 1]} : vector<8x512xf32> to vector<8x128xf32>
    %cst_166 = arith.constant 5.000000e-01 : f32
    %386 = vector.broadcast %cst_166 : f32 to vector<8x128xf32>
    %387 = arith.mulf %386, %385 : vector<8x128xf32>
    %388 = math.tanh %387 : vector<8x128xf32>
    %cst_167 = arith.constant 5.000000e-01 : f32
    %389 = vector.broadcast %cst_167 : f32 to vector<8x128xf32>
    %390 = arith.mulf %389, %388 : vector<8x128xf32>
    %cst_168 = arith.constant 5.000000e-01 : f32
    %391 = vector.broadcast %cst_168 : f32 to vector<8x128xf32>
    %392 = arith.addf %390, %391 : vector<8x128xf32>
    %393 = vector.extract_strided_slice %376 {offsets = [0, 256], sizes = [8, 128], strides = [1, 1]} : vector<8x512xf32> to vector<8x128xf32>
    %394 = math.tanh %393 : vector<8x128xf32>
    %395 = vector.extract_strided_slice %376 {offsets = [0, 384], sizes = [8, 128], strides = [1, 1]} : vector<8x512xf32> to vector<8x128xf32>
    %cst_169 = arith.constant 5.000000e-01 : f32
    %396 = vector.broadcast %cst_169 : f32 to vector<8x128xf32>
    %397 = arith.mulf %396, %395 : vector<8x128xf32>
    %398 = math.tanh %397 : vector<8x128xf32>
    %cst_170 = arith.constant 5.000000e-01 : f32
    %399 = vector.broadcast %cst_170 : f32 to vector<8x128xf32>
    %400 = arith.mulf %399, %398 : vector<8x128xf32>
    %cst_171 = arith.constant 5.000000e-01 : f32
    %401 = vector.broadcast %cst_171 : f32 to vector<8x128xf32>
    %402 = arith.addf %400, %401 : vector<8x128xf32>
    %403 = arith.mulf %392, %366 : vector<8x128xf32>
    %404 = arith.mulf %384, %394 : vector<8x128xf32>
    %405 = arith.addf %403, %404 : vector<8x128xf32>
    %406 = math.tanh %405 : vector<8x128xf32>
    %407 = arith.mulf %402, %406 : vector<8x128xf32>
    %c8_i32_172 = arith.constant 8 : i32
    %408 = arith.muli %c1_i32_158, %c8_i32_172 : i32
    %409 = tpu.assume_multiple %408, 8 : i32
    %410 = arith.index_cast %409 : i32 to index
    %c0_173 = arith.constant 0 : index
    %411 = vector.load %arg8[%410, %c0_173] : memref<64x128xf32, #tpu.memory_space<vmem>>, vector<8x128xf32>
    tpu.vector_store %arg8[%410, %c0_173], %407 {strides = array<i32>} : memref<64x128xf32, #tpu.memory_space<vmem>>, vector<8x128xf32>,
    %c2_i32_174 = arith.constant 2 : i32
    %c0_175 = arith.constant 0 : index
    %c0_176 = arith.constant 0 : index
    %c0_177 = arith.constant 0 : index
    %412 = vector.load %arg5[%c0_175, %c0_176, %c0_177] : memref<1x128x512xf32, #tpu.memory_space<vmem>>, vector<1x128x512xf32>
    %413 = vector.shape_cast %412 : vector<1x128x512xf32> to vector<128x512xf32>
    %cst_178 = arith.constant dense<0.000000e+00> : vector<8x512xf32>
    %414 = tpu.matmul %407, %413, %cst_178 {dimension_numbers = #tpu.dot_dimension_numbers<[1], [0], [0], [1], [0, 0, 1, 1], [], []>} : vector<8x128xf32>, vector<128x512xf32>, vector<8x512xf32> -> vector<8x512xf32>
    %415 = arith.addf %331, %414 : vector<8x512xf32>
    %416 = vector.extract_strided_slice %415 {offsets = [0, 0], sizes = [8, 128], strides = [1, 1]} : vector<8x512xf32> to vector<8x128xf32>
    %cst_179 = arith.constant 5.000000e-01 : f32
    %417 = vector.broadcast %cst_179 : f32 to vector<8x128xf32>
    %418 = arith.mulf %417, %416 : vector<8x128xf32>
    %419 = math.tanh %418 : vector<8x128xf32>
    %cst_180 = arith.constant 5.000000e-01 : f32
    %420 = vector.broadcast %cst_180 : f32 to vector<8x128xf32>
    %421 = arith.mulf %420, %419 : vector<8x128xf32>
    %cst_181 = arith.constant 5.000000e-01 : f32
    %422 = vector.broadcast %cst_181 : f32 to vector<8x128xf32>
    %423 = arith.addf %421, %422 : vector<8x128xf32>
    %424 = vector.extract_strided_slice %415 {offsets = [0, 128], sizes = [8, 128], strides = [1, 1]} : vector<8x512xf32> to vector<8x128xf32>
    %cst_182 = arith.constant 5.000000e-01 : f32
    %425 = vector.broadcast %cst_182 : f32 to vector<8x128xf32>
    %426 = arith.mulf %425, %424 : vector<8x128xf32>
    %427 = math.tanh %426 : vector<8x128xf32>
    %cst_183 = arith.constant 5.000000e-01 : f32
    %428 = vector.broadcast %cst_183 : f32 to vector<8x128xf32>
    %429 = arith.mulf %428, %427 : vector<8x128xf32>
    %cst_184 = arith.constant 5.000000e-01 : f32
    %430 = vector.broadcast %cst_184 : f32 to vector<8x128xf32>
    %431 = arith.addf %429, %430 : vector<8x128xf32>
    %432 = vector.extract_strided_slice %415 {offsets = [0, 256], sizes = [8, 128], strides = [1, 1]} : vector<8x512xf32> to vector<8x128xf32>
    %433 = math.tanh %432 : vector<8x128xf32>
    %434 = vector.extract_strided_slice %415 {offsets = [0, 384], sizes = [8, 128], strides = [1, 1]} : vector<8x512xf32> to vector<8x128xf32>
    %cst_185 = arith.constant 5.000000e-01 : f32
    %435 = vector.broadcast %cst_185 : f32 to vector<8x128xf32>
    %436 = arith.mulf %435, %434 : vector<8x128xf32>
    %437 = math.tanh %436 : vector<8x128xf32>
    %cst_186 = arith.constant 5.000000e-01 : f32
    %438 = vector.broadcast %cst_186 : f32 to vector<8x128xf32>
    %439 = arith.mulf %438, %437 : vector<8x128xf32>
    %cst_187 = arith.constant 5.000000e-01 : f32
    %440 = vector.broadcast %cst_187 : f32 to vector<8x128xf32>
    %441 = arith.addf %439, %440 : vector<8x128xf32>
    %442 = arith.mulf %431, %405 : vector<8x128xf32>
    %443 = arith.mulf %423, %433 : vector<8x128xf32>
    %444 = arith.addf %442, %443 : vector<8x128xf32>
    %445 = math.tanh %444 : vector<8x128xf32>
    %446 = arith.mulf %441, %445 : vector<8x128xf32>
    %c8_i32_188 = arith.constant 8 : i32
    %447 = arith.muli %c2_i32_174, %c8_i32_188 : i32
    %448 = tpu.assume_multiple %447, 8 : i32
    %449 = arith.index_cast %448 : i32 to index
    %c0_189 = arith.constant 0 : index
    %450 = vector.load %arg8[%449, %c0_189] : memref<64x128xf32, #tpu.memory_space<vmem>>, vector<8x128xf32>
    tpu.vector_store %arg8[%449, %c0_189], %446 {strides = array<i32>} : memref<64x128xf32, #tpu.memory_space<vmem>>, vector<8x128xf32>,
    %c3_i32_190 = arith.constant 3 : i32
    %c0_191 = arith.constant 0 : index
    %c0_192 = arith.constant 0 : index
    %c0_193 = arith.constant 0 : index
    %451 = vector.load %arg5[%c0_191, %c0_192, %c0_193] : memref<1x128x512xf32, #tpu.memory_space<vmem>>, vector<1x128x512xf32>
    %452 = vector.shape_cast %451 : vector<1x128x512xf32> to vector<128x512xf32>
    %cst_194 = arith.constant dense<0.000000e+00> : vector<8x512xf32>
    %453 = tpu.matmul %446, %452, %cst_194 {dimension_numbers = #tpu.dot_dimension_numbers<[1], [0], [0], [1], [0, 0, 1, 1], [], []>} : vector<8x128xf32>, vector<128x512xf32>, vector<8x512xf32> -> vector<8x512xf32>
    %454 = arith.addf %331, %453 : vector<8x512xf32>
    %455 = vector.extract_strided_slice %454 {offsets = [0, 0], sizes = [8, 128], strides = [1, 1]} : vector<8x512xf32> to vector<8x128xf32>
    %cst_195 = arith.constant 5.000000e-01 : f32
    %456 = vector.broadcast %cst_195 : f32 to vector<8x128xf32>
    %457 = arith.mulf %456, %455 : vector<8x128xf32>
    %458 = math.tanh %457 : vector<8x128xf32>
    %cst_196 = arith.constant 5.000000e-01 : f32
    %459 = vector.broadcast %cst_196 : f32 to vector<8x128xf32>
    %460 = arith.mulf %459, %458 : vector<8x128xf32>
    %cst_197 = arith.constant 5.000000e-01 : f32
    %461 = vector.broadcast %cst_197 : f32 to vector<8x128xf32>
    %462 = arith.addf %460, %461 : vector<8x128xf32>
    %463 = vector.extract_strided_slice %454 {offsets = [0, 128], sizes = [8, 128], strides = [1, 1]} : vector<8x512xf32> to vector<8x128xf32>
    %cst_198 = arith.constant 5.000000e-01 : f32
    %464 = vector.broadcast %cst_198 : f32 to vector<8x128xf32>
    %465 = arith.mulf %464, %463 : vector<8x128xf32>
    %466 = math.tanh %465 : vector<8x128xf32>
    %cst_199 = arith.constant 5.000000e-01 : f32
    %467 = vector.broadcast %cst_199 : f32 to vector<8x128xf32>
    %468 = arith.mulf %467, %466 : vector<8x128xf32>
    %cst_200 = arith.constant 5.000000e-01 : f32
    %469 = vector.broadcast %cst_200 : f32 to vector<8x128xf32>
    %470 = arith.addf %468, %469 : vector<8x128xf32>
    %471 = vector.extract_strided_slice %454 {offsets = [0, 256], sizes = [8, 128], strides = [1, 1]} : vector<8x512xf32> to vector<8x128xf32>
    %472 = math.tanh %471 : vector<8x128xf32>
    %473 = vector.extract_strided_slice %454 {offsets = [0, 384], sizes = [8, 128], strides = [1, 1]} : vector<8x512xf32> to vector<8x128xf32>
    %cst_201 = arith.constant 5.000000e-01 : f32
    %474 = vector.broadcast %cst_201 : f32 to vector<8x128xf32>
    %475 = arith.mulf %474, %473 : vector<8x128xf32>
    %476 = math.tanh %475 : vector<8x128xf32>
    %cst_202 = arith.constant 5.000000e-01 : f32
    %477 = vector.broadcast %cst_202 : f32 to vector<8x128xf32>
    %478 = arith.mulf %477, %476 : vector<8x128xf32>
    %cst_203 = arith.constant 5.000000e-01 : f32
    %479 = vector.broadcast %cst_203 : f32 to vector<8x128xf32>
    %480 = arith.addf %478, %479 : vector<8x128xf32>
    %481 = arith.mulf %470, %444 : vector<8x128xf32>
    %482 = arith.mulf %462, %472 : vector<8x128xf32>
    %483 = arith.addf %481, %482 : vector<8x128xf32>
    %484 = math.tanh %483 : vector<8x128xf32>
    %485 = arith.mulf %480, %484 : vector<8x128xf32>
    %c8_i32_204 = arith.constant 8 : i32
    %486 = arith.muli %c3_i32_190, %c8_i32_204 : i32
    %487 = tpu.assume_multiple %486, 8 : i32
    %488 = arith.index_cast %487 : i32 to index
    %c0_205 = arith.constant 0 : index
    %489 = vector.load %arg8[%488, %c0_205] : memref<64x128xf32, #tpu.memory_space<vmem>>, vector<8x128xf32>
    tpu.vector_store %arg8[%488, %c0_205], %485 {strides = array<i32>} : memref<64x128xf32, #tpu.memory_space<vmem>>, vector<8x128xf32>,
    %c4_i32_206 = arith.constant 4 : i32
    %c0_207 = arith.constant 0 : index
    %c0_208 = arith.constant 0 : index
    %c0_209 = arith.constant 0 : index
    %490 = vector.load %arg5[%c0_207, %c0_208, %c0_209] : memref<1x128x512xf32, #tpu.memory_space<vmem>>, vector<1x128x512xf32>
    %491 = vector.shape_cast %490 : vector<1x128x512xf32> to vector<128x512xf32>
    %cst_210 = arith.constant dense<0.000000e+00> : vector<8x512xf32>
    %492 = tpu.matmul %485, %491, %cst_210 {dimension_numbers = #tpu.dot_dimension_numbers<[1], [0], [0], [1], [0, 0, 1, 1], [], []>} : vector<8x128xf32>, vector<128x512xf32>, vector<8x512xf32> -> vector<8x512xf32>
    %493 = arith.addf %331, %492 : vector<8x512xf32>
    %494 = vector.extract_strided_slice %493 {offsets = [0, 0], sizes = [8, 128], strides = [1, 1]} : vector<8x512xf32> to vector<8x128xf32>
    %cst_211 = arith.constant 5.000000e-01 : f32
    %495 = vector.broadcast %cst_211 : f32 to vector<8x128xf32>
    %496 = arith.mulf %495, %494 : vector<8x128xf32>
    %497 = math.tanh %496 : vector<8x128xf32>
    %cst_212 = arith.constant 5.000000e-01 : f32
    %498 = vector.broadcast %cst_212 : f32 to vector<8x128xf32>
    %499 = arith.mulf %498, %497 : vector<8x128xf32>
    %cst_213 = arith.constant 5.000000e-01 : f32
    %500 = vector.broadcast %cst_213 : f32 to vector<8x128xf32>
    %501 = arith.addf %499, %500 : vector<8x128xf32>
    %502 = vector.extract_strided_slice %493 {offsets = [0, 128], sizes = [8, 128], strides = [1, 1]} : vector<8x512xf32> to vector<8x128xf32>
    %cst_214 = arith.constant 5.000000e-01 : f32
    %503 = vector.broadcast %cst_214 : f32 to vector<8x128xf32>
    %504 = arith.mulf %503, %502 : vector<8x128xf32>
    %505 = math.tanh %504 : vector<8x128xf32>
    %cst_215 = arith.constant 5.000000e-01 : f32
    %506 = vector.broadcast %cst_215 : f32 to vector<8x128xf32>
    %507 = arith.mulf %506, %505 : vector<8x128xf32>
    %cst_216 = arith.constant 5.000000e-01 : f32
    %508 = vector.broadcast %cst_216 : f32 to vector<8x128xf32>
    %509 = arith.addf %507, %508 : vector<8x128xf32>
    %510 = vector.extract_strided_slice %493 {offsets = [0, 256], sizes = [8, 128], strides = [1, 1]} : vector<8x512xf32> to vector<8x128xf32>
    %511 = math.tanh %510 : vector<8x128xf32>
    %512 = vector.extract_strided_slice %493 {offsets = [0, 384], sizes = [8, 128], strides = [1, 1]} : vector<8x512xf32> to vector<8x128xf32>
    %cst_217 = arith.constant 5.000000e-01 : f32
    %513 = vector.broadcast %cst_217 : f32 to vector<8x128xf32>
    %514 = arith.mulf %513, %512 : vector<8x128xf32>
    %515 = math.tanh %514 : vector<8x128xf32>
    %cst_218 = arith.constant 5.000000e-01 : f32
    %516 = vector.broadcast %cst_218 : f32 to vector<8x128xf32>
    %517 = arith.mulf %516, %515 : vector<8x128xf32>
    %cst_219 = arith.constant 5.000000e-01 : f32
    %518 = vector.broadcast %cst_219 : f32 to vector<8x128xf32>
    %519 = arith.addf %517, %518 : vector<8x128xf32>
    %520 = arith.mulf %509, %483 : vector<8x128xf32>
    %521 = arith.mulf %501, %511 : vector<8x128xf32>
    %522 = arith.addf %520, %521 : vector<8x128xf32>
    %523 = math.tanh %522 : vector<8x128xf32>
    %524 = arith.mulf %519, %523 : vector<8x128xf32>
    %c8_i32_220 = arith.constant 8 : i32
    %525 = arith.muli %c4_i32_206, %c8_i32_220 : i32
    %526 = tpu.assume_multiple %525, 8 : i32
    %527 = arith.index_cast %526 : i32 to index
    %c0_221 = arith.constant 0 : index
    %528 = vector.load %arg8[%527, %c0_221] : memref<64x128xf32, #tpu.memory_space<vmem>>, vector<8x128xf32>
    tpu.vector_store %arg8[%527, %c0_221], %524 {strides = array<i32>} : memref<64x128xf32, #tpu.memory_space<vmem>>, vector<8x128xf32>,
    %c5_i32_222 = arith.constant 5 : i32
    %c0_223 = arith.constant 0 : index
    %c0_224 = arith.constant 0 : index
    %c0_225 = arith.constant 0 : index
    %529 = vector.load %arg5[%c0_223, %c0_224, %c0_225] : memref<1x128x512xf32, #tpu.memory_space<vmem>>, vector<1x128x512xf32>
    %530 = vector.shape_cast %529 : vector<1x128x512xf32> to vector<128x512xf32>
    %cst_226 = arith.constant dense<0.000000e+00> : vector<8x512xf32>
    %531 = tpu.matmul %524, %530, %cst_226 {dimension_numbers = #tpu.dot_dimension_numbers<[1], [0], [0], [1], [0, 0, 1, 1], [], []>} : vector<8x128xf32>, vector<128x512xf32>, vector<8x512xf32> -> vector<8x512xf32>
    %532 = arith.addf %331, %531 : vector<8x512xf32>
    %533 = vector.extract_strided_slice %532 {offsets = [0, 0], sizes = [8, 128], strides = [1, 1]} : vector<8x512xf32> to vector<8x128xf32>
    %cst_227 = arith.constant 5.000000e-01 : f32
    %534 = vector.broadcast %cst_227 : f32 to vector<8x128xf32>
    %535 = arith.mulf %534, %533 : vector<8x128xf32>
    %536 = math.tanh %535 : vector<8x128xf32>
    %cst_228 = arith.constant 5.000000e-01 : f32
    %537 = vector.broadcast %cst_228 : f32 to vector<8x128xf32>
    %538 = arith.mulf %537, %536 : vector<8x128xf32>
    %cst_229 = arith.constant 5.000000e-01 : f32
    %539 = vector.broadcast %cst_229 : f32 to vector<8x128xf32>
    %540 = arith.addf %538, %539 : vector<8x128xf32>
    %541 = vector.extract_strided_slice %532 {offsets = [0, 128], sizes = [8, 128], strides = [1, 1]} : vector<8x512xf32> to vector<8x128xf32>
    %cst_230 = arith.constant 5.000000e-01 : f32
    %542 = vector.broadcast %cst_230 : f32 to vector<8x128xf32>
    %543 = arith.mulf %542, %541 : vector<8x128xf32>
    %544 = math.tanh %543 : vector<8x128xf32>
    %cst_231 = arith.constant 5.000000e-01 : f32
    %545 = vector.broadcast %cst_231 : f32 to vector<8x128xf32>
    %546 = arith.mulf %545, %544 : vector<8x128xf32>
    %cst_232 = arith.constant 5.000000e-01 : f32
    %547 = vector.broadcast %cst_232 : f32 to vector<8x128xf32>
    %548 = arith.addf %546, %547 : vector<8x128xf32>
    %549 = vector.extract_strided_slice %532 {offsets = [0, 256], sizes = [8, 128], strides = [1, 1]} : vector<8x512xf32> to vector<8x128xf32>
    %550 = math.tanh %549 : vector<8x128xf32>
    %551 = vector.extract_strided_slice %532 {offsets = [0, 384], sizes = [8, 128], strides = [1, 1]} : vector<8x512xf32> to vector<8x128xf32>
    %cst_233 = arith.constant 5.000000e-01 : f32
    %552 = vector.broadcast %cst_233 : f32 to vector<8x128xf32>
    %553 = arith.mulf %552, %551 : vector<8x128xf32>
    %554 = math.tanh %553 : vector<8x128xf32>
    %cst_234 = arith.constant 5.000000e-01 : f32
    %555 = vector.broadcast %cst_234 : f32 to vector<8x128xf32>
    %556 = arith.mulf %555, %554 : vector<8x128xf32>
    %cst_235 = arith.constant 5.000000e-01 : f32
    %557 = vector.broadcast %cst_235 : f32 to vector<8x128xf32>
    %558 = arith.addf %556, %557 : vector<8x128xf32>
    %559 = arith.mulf %548, %522 : vector<8x128xf32>
    %560 = arith.mulf %540, %550 : vector<8x128xf32>
    %561 = arith.addf %559, %560 : vector<8x128xf32>
    %562 = math.tanh %561 : vector<8x128xf32>
    %563 = arith.mulf %558, %562 : vector<8x128xf32>
    %c8_i32_236 = arith.constant 8 : i32
    %564 = arith.muli %c5_i32_222, %c8_i32_236 : i32
    %565 = tpu.assume_multiple %564, 8 : i32
    %566 = arith.index_cast %565 : i32 to index
    %c0_237 = arith.constant 0 : index
    %567 = vector.load %arg8[%566, %c0_237] : memref<64x128xf32, #tpu.memory_space<vmem>>, vector<8x128xf32>
    tpu.vector_store %arg8[%566, %c0_237], %563 {strides = array<i32>} : memref<64x128xf32, #tpu.memory_space<vmem>>, vector<8x128xf32>,
    %c6_i32_238 = arith.constant 6 : i32
    %c0_239 = arith.constant 0 : index
    %c0_240 = arith.constant 0 : index
    %c0_241 = arith.constant 0 : index
    %568 = vector.load %arg5[%c0_239, %c0_240, %c0_241] : memref<1x128x512xf32, #tpu.memory_space<vmem>>, vector<1x128x512xf32>
    %569 = vector.shape_cast %568 : vector<1x128x512xf32> to vector<128x512xf32>
    %cst_242 = arith.constant dense<0.000000e+00> : vector<8x512xf32>
    %570 = tpu.matmul %563, %569, %cst_242 {dimension_numbers = #tpu.dot_dimension_numbers<[1], [0], [0], [1], [0, 0, 1, 1], [], []>} : vector<8x128xf32>, vector<128x512xf32>, vector<8x512xf32> -> vector<8x512xf32>
    %571 = arith.addf %331, %570 : vector<8x512xf32>
    %572 = vector.extract_strided_slice %571 {offsets = [0, 0], sizes = [8, 128], strides = [1, 1]} : vector<8x512xf32> to vector<8x128xf32>
    %cst_243 = arith.constant 5.000000e-01 : f32
    %573 = vector.broadcast %cst_243 : f32 to vector<8x128xf32>
    %574 = arith.mulf %573, %572 : vector<8x128xf32>
    %575 = math.tanh %574 : vector<8x128xf32>
    %cst_244 = arith.constant 5.000000e-01 : f32
    %576 = vector.broadcast %cst_244 : f32 to vector<8x128xf32>
    %577 = arith.mulf %576, %575 : vector<8x128xf32>
    %cst_245 = arith.constant 5.000000e-01 : f32
    %578 = vector.broadcast %cst_245 : f32 to vector<8x128xf32>
    %579 = arith.addf %577, %578 : vector<8x128xf32>
    %580 = vector.extract_strided_slice %571 {offsets = [0, 128], sizes = [8, 128], strides = [1, 1]} : vector<8x512xf32> to vector<8x128xf32>
    %cst_246 = arith.constant 5.000000e-01 : f32
    %581 = vector.broadcast %cst_246 : f32 to vector<8x128xf32>
    %582 = arith.mulf %581, %580 : vector<8x128xf32>
    %583 = math.tanh %582 : vector<8x128xf32>
    %cst_247 = arith.constant 5.000000e-01 : f32
    %584 = vector.broadcast %cst_247 : f32 to vector<8x128xf32>
    %585 = arith.mulf %584, %583 : vector<8x128xf32>
    %cst_248 = arith.constant 5.000000e-01 : f32
    %586 = vector.broadcast %cst_248 : f32 to vector<8x128xf32>
    %587 = arith.addf %585, %586 : vector<8x128xf32>
    %588 = vector.extract_strided_slice %571 {offsets = [0, 256], sizes = [8, 128], strides = [1, 1]} : vector<8x512xf32> to vector<8x128xf32>
    %589 = math.tanh %588 : vector<8x128xf32>
    %590 = vector.extract_strided_slice %571 {offsets = [0, 384], sizes = [8, 128], strides = [1, 1]} : vector<8x512xf32> to vector<8x128xf32>
    %cst_249 = arith.constant 5.000000e-01 : f32
    %591 = vector.broadcast %cst_249 : f32 to vector<8x128xf32>
    %592 = arith.mulf %591, %590 : vector<8x128xf32>
    %593 = math.tanh %592 : vector<8x128xf32>
    %cst_250 = arith.constant 5.000000e-01 : f32
    %594 = vector.broadcast %cst_250 : f32 to vector<8x128xf32>
    %595 = arith.mulf %594, %593 : vector<8x128xf32>
    %cst_251 = arith.constant 5.000000e-01 : f32
    %596 = vector.broadcast %cst_251 : f32 to vector<8x128xf32>
    %597 = arith.addf %595, %596 : vector<8x128xf32>
    %598 = arith.mulf %587, %561 : vector<8x128xf32>
    %599 = arith.mulf %579, %589 : vector<8x128xf32>
    %600 = arith.addf %598, %599 : vector<8x128xf32>
    %601 = math.tanh %600 : vector<8x128xf32>
    %602 = arith.mulf %597, %601 : vector<8x128xf32>
    %c8_i32_252 = arith.constant 8 : i32
    %603 = arith.muli %c6_i32_238, %c8_i32_252 : i32
    %604 = tpu.assume_multiple %603, 8 : i32
    %605 = arith.index_cast %604 : i32 to index
    %c0_253 = arith.constant 0 : index
    %606 = vector.load %arg8[%605, %c0_253] : memref<64x128xf32, #tpu.memory_space<vmem>>, vector<8x128xf32>
    tpu.vector_store %arg8[%605, %c0_253], %602 {strides = array<i32>} : memref<64x128xf32, #tpu.memory_space<vmem>>, vector<8x128xf32>,
    %c7_i32_254 = arith.constant 7 : i32
    %c0_255 = arith.constant 0 : index
    %c0_256 = arith.constant 0 : index
    %c0_257 = arith.constant 0 : index
    %607 = vector.load %arg5[%c0_255, %c0_256, %c0_257] : memref<1x128x512xf32, #tpu.memory_space<vmem>>, vector<1x128x512xf32>
    %608 = vector.shape_cast %607 : vector<1x128x512xf32> to vector<128x512xf32>
    %cst_258 = arith.constant dense<0.000000e+00> : vector<8x512xf32>
    %609 = tpu.matmul %602, %608, %cst_258 {dimension_numbers = #tpu.dot_dimension_numbers<[1], [0], [0], [1], [0, 0, 1, 1], [], []>} : vector<8x128xf32>, vector<128x512xf32>, vector<8x512xf32> -> vector<8x512xf32>
    %610 = arith.addf %331, %609 : vector<8x512xf32>
    %611 = vector.extract_strided_slice %610 {offsets = [0, 0], sizes = [8, 128], strides = [1, 1]} : vector<8x512xf32> to vector<8x128xf32>
    %cst_259 = arith.constant 5.000000e-01 : f32
    %612 = vector.broadcast %cst_259 : f32 to vector<8x128xf32>
    %613 = arith.mulf %612, %611 : vector<8x128xf32>
    %614 = math.tanh %613 : vector<8x128xf32>
    %cst_260 = arith.constant 5.000000e-01 : f32
    %615 = vector.broadcast %cst_260 : f32 to vector<8x128xf32>
    %616 = arith.mulf %615, %614 : vector<8x128xf32>
    %cst_261 = arith.constant 5.000000e-01 : f32
    %617 = vector.broadcast %cst_261 : f32 to vector<8x128xf32>
    %618 = arith.addf %616, %617 : vector<8x128xf32>
    %619 = vector.extract_strided_slice %610 {offsets = [0, 128], sizes = [8, 128], strides = [1, 1]} : vector<8x512xf32> to vector<8x128xf32>
    %cst_262 = arith.constant 5.000000e-01 : f32
    %620 = vector.broadcast %cst_262 : f32 to vector<8x128xf32>
    %621 = arith.mulf %620, %619 : vector<8x128xf32>
    %622 = math.tanh %621 : vector<8x128xf32>
    %cst_263 = arith.constant 5.000000e-01 : f32
    %623 = vector.broadcast %cst_263 : f32 to vector<8x128xf32>
    %624 = arith.mulf %623, %622 : vector<8x128xf32>
    %cst_264 = arith.constant 5.000000e-01 : f32
    %625 = vector.broadcast %cst_264 : f32 to vector<8x128xf32>
    %626 = arith.addf %624, %625 : vector<8x128xf32>
    %627 = vector.extract_strided_slice %610 {offsets = [0, 256], sizes = [8, 128], strides = [1, 1]} : vector<8x512xf32> to vector<8x128xf32>
    %628 = math.tanh %627 : vector<8x128xf32>
    %629 = vector.extract_strided_slice %610 {offsets = [0, 384], sizes = [8, 128], strides = [1, 1]} : vector<8x512xf32> to vector<8x128xf32>
    %cst_265 = arith.constant 5.000000e-01 : f32
    %630 = vector.broadcast %cst_265 : f32 to vector<8x128xf32>
    %631 = arith.mulf %630, %629 : vector<8x128xf32>
    %632 = math.tanh %631 : vector<8x128xf32>
    %cst_266 = arith.constant 5.000000e-01 : f32
    %633 = vector.broadcast %cst_266 : f32 to vector<8x128xf32>
    %634 = arith.mulf %633, %632 : vector<8x128xf32>
    %cst_267 = arith.constant 5.000000e-01 : f32
    %635 = vector.broadcast %cst_267 : f32 to vector<8x128xf32>
    %636 = arith.addf %634, %635 : vector<8x128xf32>
    %637 = arith.mulf %626, %600 : vector<8x128xf32>
    %638 = arith.mulf %618, %628 : vector<8x128xf32>
    %639 = arith.addf %637, %638 : vector<8x128xf32>
    %640 = math.tanh %639 : vector<8x128xf32>
    %641 = arith.mulf %636, %640 : vector<8x128xf32>
    %c8_i32_268 = arith.constant 8 : i32
    %642 = arith.muli %c7_i32_254, %c8_i32_268 : i32
    %643 = tpu.assume_multiple %642, 8 : i32
    %644 = arith.index_cast %643 : i32 to index
    %c0_269 = arith.constant 0 : index
    %645 = vector.load %arg8[%644, %c0_269] : memref<64x128xf32, #tpu.memory_space<vmem>>, vector<8x128xf32>
    tpu.vector_store %arg8[%644, %c0_269], %641 {strides = array<i32>} : memref<64x128xf32, #tpu.memory_space<vmem>>, vector<8x128xf32>,
    %c8_i32_270 = arith.constant 8 : i32
    return
  }
}

</mosaic_0001>

<bundles_post_ra>
// kernel: lstm_ae_forward.1
= control target key start
LH: loop header
LB: loop body
LE: loop exit
PB: predicated region body
PF: predicated region fallthrough
CT: control target
= control target key end

     0   :  { %14 = vsyncpa [#allocation5], 0  ;;  %s6258_s0 = inlined_call_operand.vmem [shape: f32[64,128], index: 0, kind: input, shape index: {}]   ;;  %s6259_s1 = inlined_call_operand.hbm [shape: f32[1,128,512], index: 1, kind: input, shape index: {}]   ;;  %s6260_s2 = inlined_call_operand.hbm [shape: f32[1,128,512], index: 2, kind: input, shape index: {}]   ;;  %s6261_s3 = inlined_call_operand.vmem [shape: f32[1,1,512], index: 3, kind: input, shape index: {}]   ;;  %s6262_s4 = inlined_call_operand.hbm [shape: f32[1,128,512], index: 4, kind: input, shape index: {}]   ;;  %s6263_s5 = inlined_call_operand.hbm [shape: f32[1,128,512], index: 5, kind: input, shape index: {}]   ;;  %s6264_s6 = inlined_call_operand.vmem [shape: f32[1,1,512], index: 6, kind: input, shape index: {}]   ;;  %s6265_s7 = inlined_call_operand.vmem [shape: f32[64,128], index: 7, kind: output, shape index: {0}]   ;;  %s6266_s8 = inlined_call_operand.vmem [shape: f32[64,128], index: 8, kind: output, shape index: {1}]  }
   0x1   :  { %15 = vsyncpa [#allocation7], 0 }
   0x2   :  { %16 = vsyncpa [#allocation10], 0  ;;  %s4284_s27 = smov [#allocation6]   ;;  %s4285_s29 = smov [#allocation4]  }
   0x3   :  { %s36_s28 = sshll.u32 %s4284_s27, 4  ;;  %s24_s30 = sshll.u32 %s4285_s29, 4  ;;  %s37_s28 = int_to_ptr.vmem [resolvable:$true] %s36_s28  ;;  %s25_s30 = int_to_ptr.vmem [resolvable:$true] %s24_s30 }
   0x4   :  { %s4206_s9 = scalar_lea.vmem %s37_s28, 8192  ;;  %p4211_p1 = scmp.lt.s32.totalorder %s37_s28, %s37_s28 }
   0x5   :  { %p4207_p0 = scmp.ne.s32.totalorder %s37_s28, %s4206_s9  ;;  %p4212_p2 = scmp.lt.s32.totalorder %s4206_s9, %s4206_s9 }
   0x7   :  { %p4213_p3 = por %p4212_p2, %p4211_p1 }
   0x9   :  { %p4214_p4 = pnand %p4213_p3, %p4207_p0 }
   0xb   :  { %4217 = shalt.err (!%p4214_p4)
}
   0xc   :  { %s4286_s10 = smov 512   ;;  %s4287_s11 = smov 32  }
   0xd   :  { %42 = dma.hbm_to_vmem [thread:$0]  %s6260_s2, 8192, %s37_s28, [#allocation7], %s4286_s10, %s4286_s10, %s4287_s11  }
   0xe   :  { %s4226_s14 = scalar_lea.vmem %s25_s30, 8192  ;;  %p4231_p6 = scmp.lt.s32.totalorder %s25_s30, %s25_s30 }
   0xf   :  { %p4227_p5 = scmp.ne.s32.totalorder %s25_s30, %s4226_s14  ;;  %p4232_p7 = scmp.lt.s32.totalorder %s4226_s14, %s4226_s14 }
  0x11   :  { %p4233_p8 = por %p4232_p7, %p4231_p6 }
  0x13   :  { %p4234_p9 = pnand %p4233_p8, %p4227_p5 }
  0x15   :  { %4237 = shalt.err (!%p4234_p9)
}
  0x16   :  { %30 = dma.hbm_to_vmem [thread:$0]  %s6259_s1, 8192, %s25_s30, [#allocation5], %s4286_s10, %s4286_s10, %s4287_s11  }
  0x17   :  { %s4288_s17 = smov [#allocation8]   ;;  %s4289_s19 = smov [#allocation9]  }
  0x18   :  { %s50_s18 = sshll.u32 %s4288_s17, 4  ;;  %s62_s20 = sshll.u32 %s4289_s19, 4  ;;  %s51_s18 = int_to_ptr.vmem [resolvable:$true] %s50_s18  ;;  %s63_s20 = int_to_ptr.vmem [resolvable:$true] %s62_s20 }
  0x19   :  { %s4246_s2 = scalar_lea.vmem %s51_s18, 8192  ;;  %p4251_p11 = scmp.lt.s32.totalorder %s51_s18, %s51_s18 }
  0x1a   :  { %p4247_p10 = scmp.ne.s32.totalorder %s51_s18, %s4246_s2  ;;  %p4252_p12 = scmp.lt.s32.totalorder %s4246_s2, %s4246_s2 }
  0x1c   :  { %p4253_p13 = por %p4252_p12, %p4251_p11 }
  0x1e   :  { %p4254_p0 = pnand %p4253_p13, %p4247_p10 }
  0x20   :  { %4257 = shalt.err (!%p4254_p0)
}
  0x21   :  { %56 = dma.hbm_to_vmem [thread:$0]  %s6262_s4, 8192, %s51_s18, [#allocation7], %s4286_s10, %s4286_s10, %s4287_s11  }
  0x22   :  { %s4266_s1 = scalar_lea.vmem %s63_s20, 8192  ;;  %p4271_p2 = scmp.lt.s32.totalorder %s63_s20, %s63_s20 }
  0x23   :  { %p4267_p1 = scmp.ne.s32.totalorder %s63_s20, %s4266_s1  ;;  %p4272_p3 = scmp.lt.s32.totalorder %s4266_s1, %s4266_s1 }
  0x25   :  { %p4273_p4 = por %p4272_p3, %p4271_p2 }
  0x27   :  { %p4274_p5 = pnand %p4273_p4, %p4267_p1 }
  0x29   :  { %4277 = shalt.err (!%p4274_p5)
}
  0x2a   :  { %68 = dma.hbm_to_vmem [thread:$0]  %s6263_s5, 8192, %s63_s20, [#allocation10], %s4286_s10, %s4286_s10, %s4287_s11  }
  0x2b   :  { %4278 = dma.done.wait [#allocation5], 8192  }
  0x2c   :  { %4279 = vsyncadd [#allocation5], 4294959104 }
  0x2d   :  { %4280 = dma.done.wait [#allocation7], 16384  }
  0x2e   :  { %4281 = vsyncadd [#allocation7], 4294950912 }
  0x2f   :  { %4282 = dma.done.wait [#allocation10], 8192  }
  0x30   :  { %4283 = vsyncadd [#allocation10], 4294959104  ;;  %v6267_v0 = vmov 0.0   ;;  %v152_v1 = vld [vmem:[#allocation4 + $0x1e8] sm:$0xff]  ;;  %v154_v2 = vld [vmem:[#allocation4 + $0x1f8] sm:$0xff] }
  0x31   :  { %241 = vmatprep.mubr.f32.mxu0 %v6267_v0  ;;  %354 = vmatprep.mubr.f32.mxu1 %v6267_v0  ;;  %v151_v3 = vld [vmem:[#allocation4 + $0x1e0] sm:$0xff]  ;;  %v153_v4 = vld [vmem:[#allocation4 + $0x1f0] sm:$0xff]  ;;  %v148_v5 = vld [vmem:[#allocation4 + $0x1c8] sm:$0xff] }
  0x32   :  { %177 = vmatprep.subr.mxu0 %v152_v1  ;;  %290 = vmatprep.subr.mxu1 %v154_v2  ;;  %v150_v6 = vld [vmem:[#allocation4 + $0x1d8] sm:$0xff]  ;;  %v147_v7 = vld [vmem:[#allocation4 + $0x1c0] sm:$0xff]  ;;  %v149_v8 = vld [vmem:[#allocation4 + $0x1d0] sm:$0xff] }
  0x33   :  { %178 = vmatpush1.msra.mxu0 %v151_v3  ;;  %291 = vmatpush1.msra.mxu1 %v153_v4  ;;  %v144_v9 = vld [vmem:[#allocation4 + $0x1a8] sm:$0xff]  ;;  %v146_v10 = vld [vmem:[#allocation4 + $0x1b8] sm:$0xff]  ;;  %v143_v11 = vld [vmem:[#allocation4 + $0x1a0] sm:$0xff] }
  0x34   :  { %179 = vmatprep.subr.mxu0 %v148_v5  ;;  %292 = vmatprep.subr.mxu1 %v150_v6  ;;  %v145_v12 = vld [vmem:[#allocation4 + $0x1b0] sm:$0xff]  ;;  %v140_v13 = vld [vmem:[#allocation4 + $0x188] sm:$0xff]  ;;  %v142_v14 = vld [vmem:[#allocation4 + $0x198] sm:$0xff] }
  0x35   :  { %180 = vmatpush1.msra.mxu0 %v147_v7  ;;  %293 = vmatpush1.msra.mxu1 %v149_v8  ;;  %v139_v15 = vld [vmem:[#allocation4 + $0x180] sm:$0xff]  ;;  %v141_v16 = vld [vmem:[#allocation4 + $0x190] sm:$0xff]  ;;  %v136_v17 = vld [vmem:[#allocation4 + $0x168] sm:$0xff] }
  0x36   :  { %181 = vmatprep.subr.mxu0 %v144_v9  ;;  %294 = vmatprep.subr.mxu1 %v146_v10  ;;  %v138_v18 = vld [vmem:[#allocation4 + $0x178] sm:$0xff]  ;;  %v135_v19 = vld [vmem:[#allocation4 + $0x160] sm:$0xff]  ;;  %v137_v20 = vld [vmem:[#allocation4 + $0x170] sm:$0xff] }
  0x37   :  { %182 = vmatpush1.msra.mxu0 %v143_v11  ;;  %295 = vmatpush1.msra.mxu1 %v145_v12  ;;  %v132_v21 = vld [vmem:[#allocation4 + $0x148] sm:$0xff]  ;;  %v134_v22 = vld [vmem:[#allocation4 + $0x158] sm:$0xff]  ;;  %v131_v23 = vld [vmem:[#allocation4 + $0x140] sm:$0xff] }
  0x38   :  { %183 = vmatprep.subr.mxu0 %v140_v13  ;;  %296 = vmatprep.subr.mxu1 %v142_v14  ;;  %v133_v24 = vld [vmem:[#allocation4 + $0x150] sm:$0xff]  ;;  %v128_v25 = vld [vmem:[#allocation4 + $0x128] sm:$0xff]  ;;  %v130_v26 = vld [vmem:[#allocation4 + $0x138] sm:$0xff] }
  0x39   :  { %184 = vmatpush1.msra.mxu0 %v139_v15  ;;  %297 = vmatpush1.msra.mxu1 %v141_v16  ;;  %v127_v27 = vld [vmem:[#allocation4 + $0x120] sm:$0xff]  ;;  %v129_v28 = vld [vmem:[#allocation4 + $0x130] sm:$0xff]  ;;  %v124_v29 = vld [vmem:[#allocation4 + $0x108] sm:$0xff] }
  0x3a   :  { %185 = vmatprep.subr.mxu0 %v136_v17  ;;  %298 = vmatprep.subr.mxu1 %v138_v18  ;;  %v126_v30 = vld [vmem:[#allocation4 + $0x118] sm:$0xff]  ;;  %v123_v31 = vld [vmem:[#allocation4 + $0x100] sm:$0xff]  ;;  %v125_v32 = vld [vmem:[#allocation4 + $0x110] sm:$0xff] }
  0x3b   :  { %186 = vmatpush1.msra.mxu0 %v135_v19  ;;  %299 = vmatpush1.msra.mxu1 %v137_v20  ;;  %v120_v33 = vld [vmem:[#allocation4 + $0xe8] sm:$0xff]  ;;  %v122_v34 = vld [vmem:[#allocation4 + $0xf8] sm:$0xff]  ;;  %v119_v35 = vld [vmem:[#allocation4 + $0xe0] sm:$0xff] }
  0x3c   :  { %187 = vmatprep.subr.mxu0 %v132_v21  ;;  %300 = vmatprep.subr.mxu1 %v134_v22  ;;  %v121_v36 = vld [vmem:[#allocation4 + $0xf0] sm:$0xff]  ;;  %v116_v37 = vld [vmem:[#allocation4 + $0xc8] sm:$0xff]  ;;  %v118_v38 = vld [vmem:[#allocation4 + $0xd8] sm:$0xff] }
  0x3d   :  { %188 = vmatpush1.msra.mxu0 %v131_v23  ;;  %301 = vmatpush1.msra.mxu1 %v133_v24  ;;  %v115_v39 = vld [vmem:[#allocation4 + $0xc0] sm:$0xff]  ;;  %v117_v40 = vld [vmem:[#allocation4 + $0xd0] sm:$0xff]  ;;  %v112_v41 = vld [vmem:[#allocation4 + $0xa8] sm:$0xff] }
  0x3e   :  { %189 = vmatprep.subr.mxu0 %v128_v25  ;;  %302 = vmatprep.subr.mxu1 %v130_v26  ;;  %v114_v42 = vld [vmem:[#allocation4 + $0xb8] sm:$0xff]  ;;  %v111_v43 = vld [vmem:[#allocation4 + $0xa0] sm:$0xff]  ;;  %v113_v44 = vld [vmem:[#allocation4 + $0xb0] sm:$0xff] }
  0x3f   :  { %190 = vmatpush1.msra.mxu0 %v127_v27  ;;  %303 = vmatpush1.msra.mxu1 %v129_v28  ;;  %v108_v45 = vld [vmem:[#allocation4 + $0x88] sm:$0xff]  ;;  %v110_v46 = vld [vmem:[#allocation4 + $0x98] sm:$0xff]  ;;  %v107_v47 = vld [vmem:[#allocation4 + $0x80] sm:$0xff] }
  0x40   :  { %191 = vmatprep.subr.mxu0 %v124_v29  ;;  %304 = vmatprep.subr.mxu1 %v126_v30  ;;  %v109_v48 = vld [vmem:[#allocation4 + $0x90] sm:$0xff]  ;;  %v104_v49 = vld [vmem:[#allocation4 + $0x68] sm:$0xff]  ;;  %v106_v50 = vld [vmem:[#allocation4 + $0x78] sm:$0xff] }
  0x41   :  { %192 = vmatpush1.msra.mxu0 %v123_v31  ;;  %305 = vmatpush1.msra.mxu1 %v125_v32  ;;  %v103_v51 = vld [vmem:[#allocation4 + $0x60] sm:$0xff]  ;;  %v105_v52 = vld [vmem:[#allocation4 + $0x70] sm:$0xff]  ;;  %v100_v53 = vld [vmem:[#allocation4 + $0x48] sm:$0xff] }
  0x42   :  { %193 = vmatprep.subr.mxu0 %v120_v33  ;;  %306 = vmatprep.subr.mxu1 %v122_v34  ;;  %v102_v54 = vld [vmem:[#allocation4 + $0x58] sm:$0xff]  ;;  %v99_v55 = vld [vmem:[#allocation4 + $0x40] sm:$0xff]  ;;  %v101_v56 = vld [vmem:[#allocation4 + $0x50] sm:$0xff] }
  0x43   :  { %194 = vmatpush1.msra.mxu0 %v119_v35  ;;  %307 = vmatpush1.msra.mxu1 %v121_v36  ;;  %v96_v57 = vld [vmem:[#allocation4 + $0x28] sm:$0xff]  ;;  %v98_v58 = vld [vmem:[#allocation4 + $0x38] sm:$0xff]  ;;  %v95_v59 = vld [vmem:[#allocation4 + $0x20] sm:$0xff] }
  0x44   :  { %195 = vmatprep.subr.mxu0 %v116_v37  ;;  %308 = vmatprep.subr.mxu1 %v118_v38  ;;  %v97_v60 = vld [vmem:[#allocation4 + $0x30] sm:$0xff]  ;;  %v92_v61 = vld [vmem:[#allocation4 + $0x8] sm:$0xff]  ;;  %v94_v62 = vld [vmem:[#allocation4 + $0x18] sm:$0xff] }
  0x45   :  { %196 = vmatpush1.msra.mxu0 %v115_v39  ;;  %309 = vmatpush1.msra.mxu1 %v117_v40  ;;  %v91_v63 = vld [vmem:[#allocation4] sm:$0xff]  ;;  %v93_v1 = vld [vmem:[#allocation4 + $0x10] sm:$0xff]  ;;  %v4365_v3 = vld [vmem:[#allocation6 + $0x1e8] sm:$0xff] }
  0x46   :  { %197 = vmatprep.subr.mxu0 %v112_v41  ;;  %310 = vmatprep.subr.mxu1 %v114_v42  ;;  %v83_v2 = vld [vmem:[%s6258_s0] sm:$0xff]  ;;  %6455 = vst [vmem:[#allocation14_spill] sm:$0xff] %v4365_v3  ;;  %v4367_v4 = vld [vmem:[#allocation6 + $0x1f8] sm:$0xff]  ;;  %v4371_v6 = vld [vmem:[#allocation6 + $0x1f0] sm:$0xff] }
  0x47   :  { %198 = vmatpush1.msra.mxu0 %v111_v43  ;;  %311 = vmatpush1.msra.mxu1 %v113_v44  ;;  %6456 = vst [vmem:[#allocation15_spill] sm:$0xff] %v4367_v4  ;;  %v4369_v5 = vld [vmem:[#allocation6 + $0x1e0] sm:$0xff]  ;;  %v4373_v7 = vld [vmem:[#allocation6 + $0x1c8] sm:$0xff]  ;;  %v4375_v8 = vld [vmem:[#allocation6 + $0x1d8] sm:$0xff] }
  0x48   :  { %199 = vmatprep.subr.mxu0 %v108_v45  ;;  %312 = vmatprep.subr.mxu1 %v110_v46  ;;  %v4381_v9 = vld [vmem:[#allocation6 + $0x1c0] sm:$0xff]  ;;  %v4383_v10 = vld [vmem:[#allocation6 + $0x1d0] sm:$0xff]  ;;  %v84_v11 = vld [vmem:[%s6258_s0 + $0x8] sm:$0xff] }
  0x49   :  { %200 = vmatpush1.msra.mxu0 %v107_v47  ;;  %313 = vmatpush1.msra.mxu1 %v109_v48  ;;  %v4392_v12 = vld [vmem:[#allocation6 + $0x1a8] sm:$0xff]  ;;  %v4394_v13 = vld [vmem:[#allocation6 + $0x1b8] sm:$0xff]  ;;  %v4398_v14 = vld [vmem:[#allocation6 + $0x1a0] sm:$0xff] }
  0x4a   :  { %201 = vmatprep.subr.mxu0 %v104_v49  ;;  %314 = vmatprep.subr.mxu1 %v106_v50  ;;  %v4400_v15 = vld [vmem:[#allocation6 + $0x1b0] sm:$0xff]  ;;  %v4402_v16 = vld [vmem:[#allocation6 + $0x188] sm:$0xff]  ;;  %v4404_v17 = vld [vmem:[#allocation6 + $0x198] sm:$0xff] }
  0x4b   :  { %202 = vmatpush1.msra.mxu0 %v103_v51  ;;  %315 = vmatpush1.msra.mxu1 %v105_v52  ;;  %v4410_v18 = vld [vmem:[#allocation6 + $0x180] sm:$0xff]  ;;  %v4412_v19 = vld [vmem:[#allocation6 + $0x190] sm:$0xff]  ;;  %v4421_v21 = vld [vmem:[#allocation6 + $0x168] sm:$0xff] }
  0x4c   :  { %203 = vmatprep.subr.mxu0 %v100_v53  ;;  %316 = vmatprep.subr.mxu1 %v102_v54  ;;  %v85_v20 = vld [vmem:[%s6258_s0 + $0x10] sm:$0xff]  ;;  %v4423_v22 = vld [vmem:[#allocation6 + $0x178] sm:$0xff]  ;;  %v4427_v23 = vld [vmem:[#allocation6 + $0x160] sm:$0xff] }
  0x4d   :  { %204 = vmatpush1.msra.mxu0 %v99_v55  ;;  %317 = vmatpush1.msra.mxu1 %v101_v56  ;;  %v4429_v24 = vld [vmem:[#allocation6 + $0x170] sm:$0xff]  ;;  %v4431_v25 = vld [vmem:[#allocation6 + $0x148] sm:$0xff]  ;;  %v4433_v26 = vld [vmem:[#allocation6 + $0x158] sm:$0xff] }
  0x4e   :  { %205 = vmatprep.subr.mxu0 %v96_v57  ;;  %318 = vmatprep.subr.mxu1 %v98_v58  ;;  %v4439_v27 = vld [vmem:[#allocation6 + $0x140] sm:$0xff]  ;;  %v4441_v28 = vld [vmem:[#allocation6 + $0x150] sm:$0xff]  ;;  %v86_v29 = vld [vmem:[%s6258_s0 + $0x18] sm:$0xff] }
  0x4f   :  { %206 = vmatpush1.msra.mxu0 %v95_v59  ;;  %319 = vmatpush1.msra.mxu1 %v97_v60  ;;  %v4450_v30 = vld [vmem:[#allocation6 + $0x128] sm:$0xff]  ;;  %v4452_v31 = vld [vmem:[#allocation6 + $0x138] sm:$0xff]  ;;  %v4456_v32 = vld [vmem:[#allocation6 + $0x120] sm:$0xff] }
  0x50   :  { %207 = vmatprep.subr.mxu0 %v92_v61  ;;  %320 = vmatprep.subr.mxu1 %v94_v62  ;;  %v4458_v33 = vld [vmem:[#allocation6 + $0x130] sm:$0xff]  ;;  %v4460_v34 = vld [vmem:[#allocation6 + $0x108] sm:$0xff]  ;;  %v4462_v35 = vld [vmem:[#allocation6 + $0x118] sm:$0xff] }
  0x51   :  { %208 = vmatpush1.msra.mxu0 %v91_v63  ;;  %321 = vmatpush1.msra.mxu1 %v93_v1  ;;  %v4468_v36 = vld [vmem:[#allocation6 + $0x100] sm:$0xff]  ;;  %v4470_v37 = vld [vmem:[#allocation6 + $0x110] sm:$0xff]  ;;  %v4479_v39 = vld [vmem:[#allocation6 + $0xe8] sm:$0xff] }
  0x52   :  { %242 = vmatmul.mubr.f32.vlgmr.msra.gmra.mxu0 %v83_v2  ;;  %355 = vmatmul.mubr.f32.vlgmr.msra.gmra.mxu1 %v83_v2  ;;  %v87_v38 = vld [vmem:[%s6258_s0 + $0x20] sm:$0xff]  ;;  %v4481_v40 = vld [vmem:[#allocation6 + $0xf8] sm:$0xff]  ;;  %v4487_v42 = vld [vmem:[#allocation6 + $0xf0] sm:$0xff] }
  0x53   :  { %506 = vmatprep.subr.mxu0 %v4365_v3  ;;  %577 = vmatprep.subr.mxu1 %v4367_v4  ;;  %v4485_v41 = vld [vmem:[#allocation6 + $0xe0] sm:$0xff]  ;;  %v4489_v43 = vld [vmem:[#allocation6 + $0xc8] sm:$0xff]  ;;  %v4491_v44 = vld [vmem:[#allocation6 + $0xd8] sm:$0xff] }
  0x54   :  { %507 = vmatpush1.msra.mxu0 %v4369_v5  ;;  %578 = vmatpush1.msra.mxu1 %v4371_v6  ;;  %v4497_v45 = vld [vmem:[#allocation6 + $0xc0] sm:$0xff]  ;;  %v4499_v46 = vld [vmem:[#allocation6 + $0xd0] sm:$0xff]  ;;  %v88_v47 = vld [vmem:[%s6258_s0 + $0x28] sm:$0xff] }
  0x55   :  { %508 = vmatprep.subr.mxu0 %v4373_v7  ;;  %579 = vmatprep.subr.mxu1 %v4375_v8  ;;  %v4508_v48 = vld [vmem:[#allocation6 + $0xa8] sm:$0xff]  ;;  %v4510_v49 = vld [vmem:[#allocation6 + $0xb8] sm:$0xff]  ;;  %v4514_v50 = vld [vmem:[#allocation6 + $0xa0] sm:$0xff] }
  0x56   :  { %247 = vmatprep.mubr.f32.mxu0 %v6267_v0  ;;  %360 = vmatprep.mubr.f32.mxu1 %v6267_v0  ;;  %v4516_v51 = vld [vmem:[#allocation6 + $0xb0] sm:$0xff]  ;;  %v4518_v52 = vld [vmem:[#allocation6 + $0x88] sm:$0xff]  ;;  %v4520_v53 = vld [vmem:[#allocation6 + $0x98] sm:$0xff] }
  0x57   :  { %509 = vmatpush1.msra.mxu0 %v4381_v9  ;;  %580 = vmatpush1.msra.mxu1 %v4383_v10  ;;  %6457 = vst [vmem:[#allocation16_spill] sm:$0xff] %v4516_v51  ;;  %6458 = vst [vmem:[#allocation17_spill] sm:$0xff] %v4518_v52  ;;  %v4526_v54 = vld [vmem:[#allocation6 + $0x80] sm:$0xff]  ;;  %v4528_v55 = vld [vmem:[#allocation6 + $0x90] sm:$0xff] }
  0x58   :  { %248 = vmatmul.mubr.f32.gmra.mxu0 %v84_v11  ;;  %361 = vmatmul.mubr.f32.gmra.mxu1 %v84_v11  ;;  %6459 = vst [vmem:[#allocation18_spill] sm:$0xff] %v4520_v53  ;;  %6460 = vst [vmem:[#allocation19_spill] sm:$0xff] %v4526_v54  ;;  %v89_v56 = vld [vmem:[%s6258_s0 + $0x30] sm:$0xff]  ;;  %v4537_v57 = vld [vmem:[#allocation6 + $0x68] sm:$0xff] }
  0x59   :  { %510 = vmatprep.subr.mxu0 %v4392_v12  ;;  %581 = vmatprep.subr.mxu1 %v4394_v13  ;;  %6461 = vst [vmem:[#allocation20_spill] sm:$0xff] %v4528_v55  ;;  %6462 = vst [vmem:[#allocation21_spill] sm:$0xff] %v4537_v57  ;;  %v4539_v58 = vld [vmem:[#allocation6 + $0x78] sm:$0xff]  ;;  %v4543_v59 = vld [vmem:[#allocation6 + $0x60] sm:$0xff] }
  0x5a   :  { %511 = vmatpush1.msra.mxu0 %v4398_v14  ;;  %582 = vmatpush1.msra.mxu1 %v4400_v15  ;;  %6463 = vst [vmem:[#allocation22_spill] sm:$0xff] %v4539_v58  ;;  %6464 = vst [vmem:[#allocation23_spill] sm:$0xff] %v4543_v59  ;;  %v4545_v60 = vld [vmem:[#allocation6 + $0x70] sm:$0xff]  ;;  %v4547_v61 = vld [vmem:[#allocation6 + $0x48] sm:$0xff] }
  0x5b   :  { %512 = vmatprep.subr.mxu0 %v4402_v16  ;;  %583 = vmatprep.subr.mxu1 %v4404_v17  ;;  %6465 = vst [vmem:[#allocation24_spill] sm:$0xff] %v4545_v60  ;;  %6466 = vst [vmem:[#allocation25_spill] sm:$0xff] %v4547_v61  ;;  %v4549_v62 = vld [vmem:[#allocation6 + $0x58] sm:$0xff]  ;;  %v4555_v63 = vld [vmem:[#allocation6 + $0x40] sm:$0xff] }
  0x5c   :  { %253 = vmatprep.mubr.f32.mxu0 %v6267_v0  ;;  %366 = vmatprep.mubr.f32.mxu1 %v6267_v0  ;;  %6467 = vst [vmem:[#allocation26_spill] sm:$0xff] %v4549_v62  ;;  %6468 = vst [vmem:[#allocation27_spill] sm:$0xff] %v4555_v63  ;;  %v4557_v1 = vld [vmem:[#allocation6 + $0x50] sm:$0xff]  ;;  %v90_v2 = vld [vmem:[%s6258_s0 + $0x38] sm:$0xff] }
  0x5d   :  { %513 = vmatpush1.msra.mxu0 %v4410_v18  ;;  %584 = vmatpush1.msra.mxu1 %v4412_v19  ;;  %6469 = vst [vmem:[#allocation28_spill] sm:$0xff] %v4557_v1  ;;  %v4566_v11 = vld [vmem:[#allocation6 + $0x28] sm:$0xff] }
  0x5e   :  { %254 = vmatmul.mubr.f32.gmra.mxu0 %v85_v20  ;;  %367 = vmatmul.mubr.f32.gmra.mxu1 %v85_v20  ;;  %6470 = vst [vmem:[#allocation29_spill] sm:$0xff] %v4566_v11  ;;  %v4568_v20 = vld [vmem:[#allocation6 + $0x38] sm:$0xff] }
  0x5f   :  { %514 = vmatprep.subr.mxu0 %v4421_v21  ;;  %585 = vmatprep.subr.mxu1 %v4423_v22  ;;  %6471 = vst [vmem:[#allocation30_spill] sm:$0xff] %v4568_v20 }
  0x60   :  { %515 = vmatpush1.msra.mxu0 %v4427_v23  ;;  %586 = vmatpush1.msra.mxu1 %v4429_v24 }
  0x61   :  { %516 = vmatprep.subr.mxu0 %v4431_v25  ;;  %587 = vmatprep.subr.mxu1 %v4433_v26 }
  0x62   :  { %259 = vmatprep.mubr.f32.mxu0 %v6267_v0  ;;  %372 = vmatprep.mubr.f32.mxu1 %v6267_v0 }
  0x63   :  { %517 = vmatpush1.msra.mxu0 %v4439_v27  ;;  %588 = vmatpush1.msra.mxu1 %v4441_v28 }
  0x64   :  { %260 = vmatmul.mubr.f32.gmra.mxu0 %v86_v29  ;;  %373 = vmatmul.mubr.f32.gmra.mxu1 %v86_v29  ;;  %v4572_v29 = vld [vmem:[#allocation6 + $0x20] sm:$0xff] }
  0x65   :  { %518 = vmatprep.subr.mxu0 %v4450_v30  ;;  %589 = vmatprep.subr.mxu1 %v4452_v31  ;;  %6472 = vst [vmem:[#allocation31_spill] sm:$0xff] %v4572_v29 }
  0x66   :  { %519 = vmatpush1.msra.mxu0 %v4456_v32  ;;  %590 = vmatpush1.msra.mxu1 %v4458_v33 }
  0x67   :  { %520 = vmatprep.subr.mxu0 %v4460_v34  ;;  %591 = vmatprep.subr.mxu1 %v4462_v35 }
  0x68   :  { %265 = vmatprep.mubr.f32.mxu0 %v6267_v0  ;;  %378 = vmatprep.mubr.f32.mxu1 %v6267_v0 }
  0x69   :  { %521 = vmatpush1.msra.mxu0 %v4468_v36  ;;  %592 = vmatpush1.msra.mxu1 %v4470_v37 }
  0x6a   :  { %266 = vmatmul.mubr.f32.gmra.mxu0 %v87_v38  ;;  %379 = vmatmul.mubr.f32.gmra.mxu1 %v87_v38  ;;  %v4574_v38 = vld [vmem:[#allocation6 + $0x30] sm:$0xff] }
  0x6b   :  { %522 = vmatprep.subr.mxu0 %v4479_v39  ;;  %593 = vmatprep.subr.mxu1 %v4481_v40  ;;  %6473 = vst [vmem:[#allocation32_spill] sm:$0xff] %v4574_v38 }
  0x6c   :  { %523 = vmatpush1.msra.mxu0 %v4485_v41  ;;  %594 = vmatpush1.msra.mxu1 %v4487_v42 }
  0x6d   :  { %524 = vmatprep.subr.mxu0 %v4489_v43  ;;  %595 = vmatprep.subr.mxu1 %v4491_v44 }
  0x6e   :  { %271 = vmatprep.mubr.f32.mxu0 %v6267_v0  ;;  %384 = vmatprep.mubr.f32.mxu1 %v6267_v0 }
  0x6f   :  { %525 = vmatpush1.msra.mxu0 %v4497_v45  ;;  %596 = vmatpush1.msra.mxu1 %v4499_v46 }
  0x70   :  { %272 = vmatmul.mubr.f32.gmra.mxu0 %v88_v47  ;;  %385 = vmatmul.mubr.f32.gmra.mxu1 %v88_v47  ;;  %v4576_v47 = vld [vmem:[#allocation6 + $0x8] sm:$0xff] }
  0x71   :  { %526 = vmatprep.subr.mxu0 %v4508_v48  ;;  %597 = vmatprep.subr.mxu1 %v4510_v49  ;;  %6474 = vst [vmem:[#allocation33_spill] sm:$0xff] %v4576_v47 }
  0x72   :  { %527 = vmatpush1.msra.mxu0 %v4514_v50  ;;  %598 = vmatpush1.msra.mxu1 %v4516_v51 }
  0x73   :  { %528 = vmatprep.subr.mxu0 %v4518_v52  ;;  %599 = vmatprep.subr.mxu1 %v4520_v53 }
  0x74   :  { %277 = vmatprep.mubr.f32.mxu0 %v6267_v0  ;;  %390 = vmatprep.mubr.f32.mxu1 %v6267_v0 }
  0x75   :  { %529 = vmatpush1.msra.mxu0 %v4526_v54  ;;  %600 = vmatpush1.msra.mxu1 %v4528_v55 }
  0x76   :  { %278 = vmatmul.mubr.f32.gmra.mxu0 %v89_v56  ;;  %391 = vmatmul.mubr.f32.gmra.mxu1 %v89_v56  ;;  %v4578_v56 = vld [vmem:[#allocation6 + $0x18] sm:$0xff] }
  0x77   :  { %530 = vmatprep.subr.mxu0 %v4537_v57  ;;  %601 = vmatprep.subr.mxu1 %v4539_v58  ;;  %6475 = vst [vmem:[#allocation34_spill] sm:$0xff] %v4578_v56 }
  0x78   :  { %531 = vmatpush1.msra.mxu0 %v4543_v59  ;;  %602 = vmatpush1.msra.mxu1 %v4545_v60 }
  0x79   :  { %532 = vmatprep.subr.mxu0 %v4547_v61  ;;  %603 = vmatprep.subr.mxu1 %v4549_v62 }
  0x7a   :  { %283 = vmatprep.mubr.f32.mxu0 %v6267_v0  ;;  %396 = vmatprep.mubr.f32.mxu1 %v6267_v0  ;;  %v4582_v0 = vld [vmem:[#allocation6] sm:$0xff] }
  0x7b   :  { %533 = vmatpush1.msra.mxu0 %v4555_v63  ;;  %604 = vmatpush1.msra.mxu1 %v4557_v1  ;;  %6476 = vst [vmem:[#allocation35_spill] sm:$0xff] %v4582_v0  ;;  %v4586_v1 = vld [vmem:[#allocation6 + $0x10] sm:$0xff] }
  0x7c   :  { %284 = vmatmul.mubr.f32.gmra.mxu0 %v90_v2  ;;  %397 = vmatmul.mubr.f32.gmra.mxu1 %v90_v2  ;;  %6477 = vst [vmem:[#allocation36_spill] sm:$0xff] %v4586_v1  ;;  %v6478_v2 = vmov 0.0  }
  0x7d   :  { %534 = vmatprep.subr.mxu0 %v4566_v11  ;;  %605 = vmatprep.subr.mxu1 %v4568_v20 }
  0x7e   :  { %535 = vmatpush1.msra.mxu0 %v4572_v29  ;;  %606 = vmatpush1.msra.mxu1 %v4574_v38 }
  0x7f   :  { %536 = vmatprep.subr.mxu0 %v4576_v47  ;;  %607 = vmatprep.subr.mxu1 %v4578_v56 }
  0x80   :  { %537 = vmatpush1.msra.mxu0 %v4582_v0  ;;  %570 = vmatprep.mubr.f32.mxu0 %v6478_v2 }
  0x81   :  { %608 = vmatpush1.msra.mxu1 %v4586_v1  ;;  %641 = vmatprep.mubr.f32.mxu1 %v6478_v2 }
  0x82   :  { %571 = vmatmul.mubr.f32.vlgmr.msra.gmra.mxu0 %v6478_v2  ;;  %642 = vmatmul.mubr.f32.vlgmr.msra.gmra.mxu1 %v6478_v2 }
  0x83   :  { %677 = vmatprep.subr.mxu0 %v4365_v3  ;;  %748 = vmatprep.subr.mxu1 %v4367_v4 }
  0x84   :  { %678 = vmatpush1.msra.mxu0 %v4369_v5  ;;  %749 = vmatpush1.msra.mxu1 %v4371_v6 }
  0x85   :  { %679 = vmatprep.subr.mxu0 %v4373_v7  ;;  %750 = vmatprep.subr.mxu1 %v4375_v8 }
  0x86   :  { %680 = vmatpush1.msra.mxu0 %v4381_v9  ;;  %751 = vmatpush1.msra.mxu1 %v4383_v10 }
  0x87   :  { %681 = vmatprep.subr.mxu0 %v4392_v12  ;;  %752 = vmatprep.subr.mxu1 %v4394_v13 }
  0x88   :  { %682 = vmatpush1.msra.mxu0 %v4398_v14  ;;  %753 = vmatpush1.msra.mxu1 %v4400_v15 }
  0x89   :  { %683 = vmatprep.subr.mxu0 %v4402_v16  ;;  %754 = vmatprep.subr.mxu1 %v4404_v17 }
  0x8a   :  { %684 = vmatpush1.msra.mxu0 %v4410_v18  ;;  %755 = vmatpush1.msra.mxu1 %v4412_v19 }
  0x8b   :  { %685 = vmatprep.subr.mxu0 %v4421_v21  ;;  %756 = vmatprep.subr.mxu1 %v4423_v22 }
  0x8c   :  { %686 = vmatpush1.msra.mxu0 %v4427_v23  ;;  %757 = vmatpush1.msra.mxu1 %v4429_v24 }
  0x8d   :  { %687 = vmatprep.subr.mxu0 %v4431_v25  ;;  %758 = vmatprep.subr.mxu1 %v4433_v26 }
  0x8e   :  { %688 = vmatpush1.msra.mxu0 %v4439_v27  ;;  %759 = vmatpush1.msra.mxu1 %v4441_v28 }
  0x8f   :  { %689 = vmatprep.subr.mxu0 %v4450_v30  ;;  %760 = vmatprep.subr.mxu1 %v4452_v31 }
  0x90   :  { %690 = vmatpush1.msra.mxu0 %v4456_v32  ;;  %761 = vmatpush1.msra.mxu1 %v4458_v33 }
  0x91   :  { %691 = vmatprep.subr.mxu0 %v4460_v34  ;;  %762 = vmatprep.subr.mxu1 %v4462_v35 }
  0x92   :  { %692 = vmatpush1.msra.mxu0 %v4468_v36  ;;  %763 = vmatpush1.msra.mxu1 %v4470_v37 }
  0x93   :  { %693 = vmatprep.subr.mxu0 %v4479_v39  ;;  %764 = vmatprep.subr.mxu1 %v4481_v40 }
  0x94   :  { %694 = vmatpush1.msra.mxu0 %v4485_v41  ;;  %765 = vmatpush1.msra.mxu1 %v4487_v42 }
  0x95   :  { %695 = vmatprep.subr.mxu0 %v4489_v43  ;;  %766 = vmatprep.subr.mxu1 %v4491_v44 }
  0x96   :  { %696 = vmatpush1.msra.mxu0 %v4497_v45  ;;  %767 = vmatpush1.msra.mxu1 %v4499_v46 }
  0x97   :  { %697 = vmatprep.subr.mxu0 %v4508_v48  ;;  %768 = vmatprep.subr.mxu1 %v4510_v49 }
  0x98   :  { %698 = vmatpush1.msra.mxu0 %v4514_v50  ;;  %769 = vmatpush1.msra.mxu1 %v4516_v51 }
  0x99   :  { %699 = vmatprep.subr.mxu0 %v4518_v52  ;;  %770 = vmatprep.subr.mxu1 %v4520_v53  ;;  %v6479_v52 = vld [vmem:[#allocation28_spill] sm:$0xff] }
  0x9a   :  { %700 = vmatpush1.msra.mxu0 %v4526_v54  ;;  %771 = vmatpush1.msra.mxu1 %v4528_v55 }
  0x9b   :  { %701 = vmatprep.subr.mxu0 %v4537_v57  ;;  %772 = vmatprep.subr.mxu1 %v4539_v58 }
  0x9c   :  { %702 = vmatpush1.msra.mxu0 %v4543_v59  ;;  %773 = vmatpush1.msra.mxu1 %v4545_v60 }
  0x9d   :  { %703 = vmatprep.subr.mxu0 %v4547_v61  ;;  %774 = vmatprep.subr.mxu1 %v4549_v62 }
  0x9e   :  { %704 = vmatpush1.msra.mxu0 %v4555_v63  ;;  %775 = vmatpush1.msra.mxu1 %v6479_v52 }
  0x9f   :  { %705 = vmatprep.subr.mxu0 %v4566_v11  ;;  %776 = vmatprep.subr.mxu1 %v4568_v20  ;;  %v157_v20 = vlaneseq }
  0xa0   :  { %706 = vmatpush1.msra.mxu0 %v4572_v29  ;;  %777 = vmatpush1.msra.mxu1 %v4574_v38 }
  0xa1   :  { %707 = vmatprep.subr.mxu0 %v4576_v47  ;;  %778 = vmatprep.subr.mxu1 %v4578_v56  ;;  %v4664_v29 = vshrl.u32 %v157_v20, 7 }
  0xa2   :  { %708 = vmatpush1.msra.mxu0 %v4582_v0  ;;  %741 = vmatprep.mubr.f32.mxu0 %v6478_v2 }
  0xa3   :  { %779 = vmatpush1.msra.mxu1 %v4586_v1  ;;  %812 = vmatprep.mubr.f32.mxu1 %v6478_v2  ;;  %6480 = vst [vmem:[#allocation37_spill] sm:$0xff] %v4664_v29  ;;  %v6308_v56 = vsub.s32 0, %v4664_v29  ;;  %v6311_v0 = vsub.s32 2, %v4664_v29  ;;  %v155_v1 = vld [vmem:[%s6261_s3] sm:$0xf]  ;;  %v6319_v20 = vsub.s32 3, %v4664_v29 }
  0xa4   :  { %848 = vmatprep.subr.mxu0 %v4365_v3  ;;  %919 = vmatprep.subr.mxu1 %v4367_v4  ;;  %v6318_v4 = vsub.s32 1, %v4664_v29 }
  0xa5   :  { %v160_v11 = vrot.slane %v155_v1, %v6308_v56  ;;  %v4685_v52 = vrot.slane %v155_v1, %v6311_v0  ;;  %v4691_v60 = vrot.slane %v155_v1, %v6319_v20 }
  0xa6   :  { %v164_v61 = vrot.slane %v155_v1, %v6318_v4 }
 0x112   :  { %v4666_v38 = vpop.f32.mrf.mxu0  ;;  %v4668_v47 = vpop.f32.mrf.mxu1 }
 0x114   :  { %v4675_v2 = vpop.f32.mrf.mxu0  ;;  %v4677_v3 = vpop.f32.mrf.mxu1 }
 0x118   :  { %v249_v63 = vpop.f32.mrf.mxu0  ;;  %v362_v62 = vpop.f32.mrf.mxu1 }
 0x119   :  { %v4693_v59 = vadd.f32 %v249_v63, %v160_v11  ;;  %v4696_v58 = vadd.f32 %v362_v62, %v4685_v52 }
 0x11a   :  { %v251_v57 = vpop.f32.mrf.mxu0  ;;  %v364_v56 = vpop.f32.mrf.mxu1 }
 0x11b   :  { %6481 = vst [vmem:[#allocation38_spill] sm:$0xff] %v4696_v58  ;;  %v4698_v55 = vadd.f32 %v251_v57, %v164_v61  ;;  %v4701_v0 = vadd.f32 %v364_v56, %v4691_v60 }
 0x11d   :  { %6482 = vst [vmem:[#allocation39_spill] sm:$0xff] %v4698_v55  ;;  %6483 = vst [vmem:[#allocation40_spill] sm:$0xff] %v4701_v0 }
 0x11e   :  { %v255_v54 = vpop.f32.mrf.mxu0  ;;  %v368_v53 = vpop.f32.mrf.mxu1 }
 0x11f   :  { %v4703_v51 = vadd.f32 %v255_v54, %v160_v11  ;;  %v4706_v4 = vadd.f32 %v368_v53, %v4685_v52 }
 0x120   :  { %v257_v1 = vpop.f32.mrf.mxu0  ;;  %v370_v63 = vpop.f32.mrf.mxu1 }
 0x121   :  { %6484 = vst [vmem:[#allocation41_spill] sm:$0xff] %v4703_v51  ;;  %6485 = vst [vmem:[#allocation42_spill] sm:$0xff] %v4706_v4  ;;  %v4708_v20 = vadd.f32 %v257_v1, %v164_v61  ;;  %v4711_v62 = vadd.f32 %v370_v63, %v4691_v60 }
 0x123   :  { %6486 = vst [vmem:[#allocation43_spill] sm:$0xff] %v4708_v20  ;;  %6487 = vst [vmem:[#allocation44_spill] sm:$0xff] %v4711_v62 }
 0x124   :  { %v261_v29 = vpop.f32.mrf.mxu0  ;;  %v374_v57 = vpop.f32.mrf.mxu1 }
 0x125   :  { %v4713_v58 = vadd.f32 %v261_v29, %v160_v11  ;;  %v4716_v56 = vadd.f32 %v374_v57, %v4685_v52 }
 0x126   :  { %v263_v0 = vpop.f32.mrf.mxu0  ;;  %v376_v54 = vpop.f32.mrf.mxu1 }
 0x127   :  { %6488 = vst [vmem:[#allocation45_spill] sm:$0xff] %v4713_v58  ;;  %6489 = vst [vmem:[#allocation46_spill] sm:$0xff] %v4716_v56  ;;  %v4718_v51 = vadd.f32 %v263_v0, %v164_v61  ;;  %v4721_v53 = vadd.f32 %v376_v54, %v4691_v60 }
 0x129   :  { %6490 = vst [vmem:[#allocation47_spill] sm:$0xff] %v4718_v51  ;;  %6491 = vst [vmem:[#allocation48_spill] sm:$0xff] %v4721_v53 }
 0x12a   :  { %v267_v4 = vpop.f32.mrf.mxu0  ;;  %v380_v1 = vpop.f32.mrf.mxu1 }
 0x12b   :  { %v4723_v20 = vadd.f32 %v267_v4, %v160_v11  ;;  %v4726_v63 = vadd.f32 %v380_v1, %v4685_v52 }
 0x12c   :  { %v269_v62 = vpop.f32.mrf.mxu0  ;;  %v382_v29 = vpop.f32.mrf.mxu1 }
 0x12d   :  { %6492 = vst [vmem:[#allocation49_spill] sm:$0xff] %v4723_v20  ;;  %6493 = vst [vmem:[#allocation50_spill] sm:$0xff] %v4726_v63  ;;  %v4728_v58 = vadd.f32 %v269_v62, %v164_v61  ;;  %v4731_v57 = vadd.f32 %v382_v29, %v4691_v60 }
 0x12f   :  { %6494 = vst [vmem:[#allocation51_spill] sm:$0xff] %v4728_v58  ;;  %6495 = vst [vmem:[#allocation52_spill] sm:$0xff] %v4731_v57 }
 0x130   :  { %v273_v56 = vpop.f32.mrf.mxu0  ;;  %v386_v0 = vpop.f32.mrf.mxu1 }
 0x131   :  { %v4733_v51 = vadd.f32 %v273_v56, %v160_v11  ;;  %v4736_v54 = vadd.f32 %v386_v0, %v4685_v52 }
 0x132   :  { %v275_v53 = vpop.f32.mrf.mxu0  ;;  %v388_v4 = vpop.f32.mrf.mxu1 }
 0x133   :  { %6496 = vst [vmem:[#allocation53_spill] sm:$0xff] %v4733_v51  ;;  %6497 = vst [vmem:[#allocation54_spill] sm:$0xff] %v4736_v54  ;;  %v4738_v20 = vadd.f32 %v275_v53, %v164_v61  ;;  %v4741_v1 = vadd.f32 %v388_v4, %v4691_v60 }
 0x135   :  { %6498 = vst [vmem:[#allocation55_spill] sm:$0xff] %v4738_v20  ;;  %6499 = vst [vmem:[#allocation56_spill] sm:$0xff] %v4741_v1 }
 0x136   :  { %v279_v63 = vpop.f32.mrf.mxu0  ;;  %v392_v62 = vpop.f32.mrf.mxu1 }
 0x137   :  { %v4743_v58 = vadd.f32 %v279_v63, %v160_v11  ;;  %v4746_v29 = vadd.f32 %v392_v62, %v4685_v52 }
 0x138   :  { %v281_v57 = vpop.f32.mrf.mxu0  ;;  %v394_v56 = vpop.f32.mrf.mxu1 }
 0x139   :  { %6500 = vst [vmem:[#allocation57_spill] sm:$0xff] %v4743_v58  ;;  %6501 = vst [vmem:[#allocation58_spill] sm:$0xff] %v4746_v29  ;;  %v4748_v51 = vadd.f32 %v281_v57, %v164_v61  ;;  %v4751_v0 = vadd.f32 %v394_v56, %v4691_v60  ;;  %v244_v57 = vadd.f32 %v4666_v38, %v160_v11 }
 0x13a   :  { %v246_v56 = vadd.f32 %v4675_v2, %v164_v61 }
 0x13b   :  { %6502 = vst [vmem:[#allocation59_spill] sm:$0xff] %v4748_v51  ;;  %6503 = vst [vmem:[#allocation60_spill] sm:$0xff] %v4751_v0 }
 0x13c   :  { %v285_v54 = vpop.f32.mrf.mxu0  ;;  %v398_v53 = vpop.f32.mrf.mxu1 }
 0x13d   :  { %v4753_v20 = vadd.f32 %v285_v54, %v160_v11  ;;  %v4756_v4 = vadd.f32 %v398_v53, %v4685_v52  ;;  %v357_v53 = vadd.f32 %v4668_v47, %v4685_v52 }
 0x13e   :  { %v287_v1 = vpop.f32.mrf.mxu0  ;;  %v400_v63 = vpop.f32.mrf.mxu1 }
 0x13f   :  { %6504 = vst [vmem:[#allocation61_spill] sm:$0xff] %v4753_v20  ;;  %6505 = vst [vmem:[#allocation62_spill] sm:$0xff] %v4756_v4  ;;  %v4758_v58 = vadd.f32 %v287_v1, %v164_v61  ;;  %v4761_v62 = vadd.f32 %v400_v63, %v4691_v60  ;;  %v359_v63 = vadd.f32 %v4677_v3, %v4691_v60 }
 0x141   :  { %6506 = vst [vmem:[#allocation63_spill] sm:$0xff] %v4758_v58  ;;  %6507 = vst [vmem:[#allocation64_spill] sm:$0xff] %v4761_v62  ;;  %v6528_v62 = vmov 0.0  }
 0x142   :  { %v572_v29 = vpop.f32.mrf.mxu0  ;;  %v643_v20 = vpop.f32.mrf.mxu1 }
 0x143   :  { %v648_v0 = vadd.f32 %v572_v29, %v244_v57  ;;  %v650_v1 = vadd.f32 %v643_v20, %v357_v53  ;;  %v6509_v53 = vld [vmem:[#allocation17_spill] sm:$0xff] }
 0x144   :  { %v574_v51 = vpop.f32.mrf.mxu0  ;;  %v645_v58 = vpop.f32.mrf.mxu1 }
 0x145   :  { %v652_v55 = vmul.f32 0.5, %v648_v0  ;;  %v649_v54 = vadd.f32 %v574_v51, %v246_v56  ;;  %v651_v11 = vadd.f32 %v645_v58, %v359_v63  ;;  %v6511_v63 = vld [vmem:[#allocation19_spill] sm:$0xff] }
 0x147   :  { %3974 = vtanh.f32 %v652_v55  ;;  %v656_v4 = vmul.f32 0.5, %v649_v54  ;;  %v661_v38 = vmul.f32 0.5, %v651_v11  ;;  %v6508_v54 = vld [vmem:[#allocation16_spill] sm:$0xff] }
 0x148   :  { %v6512_v11 = vld [vmem:[#allocation20_spill] sm:$0xff] }
 0x149   :  { %3976 = vtanh.f32 %v656_v4 }
 0x14a   :  { %3978 = vtanh.f32 %v650_v1  ;;  %v6510_v1 = vld [vmem:[#allocation18_spill] sm:$0xff] }
 0x14b   :  { %3980 = vtanh.f32 %v661_v38  ;;  %v6513_v38 = vld [vmem:[#allocation21_spill] sm:$0xff] }
 0x154   :  { %v3975_v61 = vpop.eup %3974 }
 0x155   :  { %v654_v2 = vmul.f32 0.5, %v3975_v61  ;;  %v6514_v61 = vld [vmem:[#allocation22_spill] sm:$0xff] }
 0x156   :  { %v3977_v29 = vpop.eup %3976 }
 0x157   :  { %v655_v0 = vadd.f32 0.5, %v654_v2  ;;  %v658_v51 = vmul.f32 0.5, %v3977_v29  ;;  %v3979_v56 = vpop.eup %3978  ;;  %v6515_v2 = vld [vmem:[#allocation23_spill] sm:$0xff]  ;;  %v6516_v29 = vld [vmem:[#allocation24_spill] sm:$0xff] }
 0x158   :  { %v3981_v20 = vpop.eup %3980 }
 0x159   :  { %v659_v57 = vadd.f32 0.5, %v658_v51  ;;  %v666_v55 = vmul.f32 %v3979_v56, %v655_v0  ;;  %v663_v4 = vmul.f32 0.5, %v3981_v20  ;;  %v6517_v0 = vld [vmem:[#allocation25_spill] sm:$0xff]  ;;  %v6518_v51 = vld [vmem:[#allocation26_spill] sm:$0xff]  ;;  %v6520_v56 = vld [vmem:[#allocation28_spill] sm:$0xff] }
 0x15a   :  { %v6523_v20 = vld [vmem:[#allocation31_spill] sm:$0xff] }
 0x15b   :  { %v665_v52 = vmul.f32 0.0, %v659_v57  ;;  %v664_v3 = vadd.f32 0.5, %v663_v4  ;;  %v6519_v57 = vld [vmem:[#allocation27_spill] sm:$0xff]  ;;  %v6524_v4 = vld [vmem:[#allocation32_spill] sm:$0xff] }
 0x15d   :  { %v4769_v47 = vadd.f32 %v666_v55, %v665_v52  ;;  %v6521_v52 = vld [vmem:[#allocation29_spill] sm:$0xff]  ;;  %v6522_v55 = vld [vmem:[#allocation30_spill] sm:$0xff] }
 0x15f   :  { %3982 = vtanh.f32 %v4769_v47 }
 0x16c   :  { %v3983_v60 = vpop.eup %3982 }
 0x16d   :  { %v669_v58 = vmul.f32 %v3983_v60, %v664_v3  ;;  %v6525_v3 = vld [vmem:[#allocation33_spill] sm:$0xff]  ;;  %v6526_v60 = vld [vmem:[#allocation34_spill] sm:$0xff] }
 0x16f   :  { %742 = vmatmul.mubr.f32.vlgmr.msra.gmra.mxu0 %v669_v58  ;;  %813 = vmatmul.mubr.f32.vlgmr.msra.gmra.mxu1 %v669_v58  ;;  %v6527_v58 = vld [vmem:[#allocation35_spill] sm:$0xff] }
 0x170   :  { %849 = vmatpush1.msra.mxu0 %v4369_v5  ;;  %920 = vmatpush1.msra.mxu1 %v4371_v6 }
 0x171   :  { %850 = vmatprep.subr.mxu0 %v4373_v7  ;;  %921 = vmatprep.subr.mxu1 %v4375_v8 }
 0x172   :  { %851 = vmatpush1.msra.mxu0 %v4381_v9  ;;  %922 = vmatpush1.msra.mxu1 %v4383_v10 }
 0x173   :  { %852 = vmatprep.subr.mxu0 %v4392_v12  ;;  %923 = vmatprep.subr.mxu1 %v4394_v13 }
 0x174   :  { %853 = vmatpush1.msra.mxu0 %v4398_v14  ;;  %924 = vmatpush1.msra.mxu1 %v4400_v15 }
 0x175   :  { %854 = vmatprep.subr.mxu0 %v4402_v16  ;;  %925 = vmatprep.subr.mxu1 %v4404_v17 }
 0x176   :  { %855 = vmatpush1.msra.mxu0 %v4410_v18  ;;  %926 = vmatpush1.msra.mxu1 %v4412_v19 }
 0x177   :  { %856 = vmatprep.subr.mxu0 %v4421_v21  ;;  %927 = vmatprep.subr.mxu1 %v4423_v22 }
 0x178   :  { %857 = vmatpush1.msra.mxu0 %v4427_v23  ;;  %928 = vmatpush1.msra.mxu1 %v4429_v24 }
 0x179   :  { %858 = vmatprep.subr.mxu0 %v4431_v25  ;;  %929 = vmatprep.subr.mxu1 %v4433_v26 }
 0x17a   :  { %859 = vmatpush1.msra.mxu0 %v4439_v27  ;;  %930 = vmatpush1.msra.mxu1 %v4441_v28 }
 0x17b   :  { %860 = vmatprep.subr.mxu0 %v4450_v30  ;;  %931 = vmatprep.subr.mxu1 %v4452_v31 }
 0x17c   :  { %861 = vmatpush1.msra.mxu0 %v4456_v32  ;;  %932 = vmatpush1.msra.mxu1 %v4458_v33 }
 0x17d   :  { %862 = vmatprep.subr.mxu0 %v4460_v34  ;;  %933 = vmatprep.subr.mxu1 %v4462_v35 }
 0x17e   :  { %863 = vmatpush1.msra.mxu0 %v4468_v36  ;;  %934 = vmatpush1.msra.mxu1 %v4470_v37 }
 0x17f   :  { %864 = vmatprep.subr.mxu0 %v4479_v39  ;;  %935 = vmatprep.subr.mxu1 %v4481_v40 }
 0x180   :  { %865 = vmatpush1.msra.mxu0 %v4485_v41  ;;  %936 = vmatpush1.msra.mxu1 %v4487_v42 }
 0x181   :  { %866 = vmatprep.subr.mxu0 %v4489_v43  ;;  %937 = vmatprep.subr.mxu1 %v4491_v44 }
 0x182   :  { %867 = vmatpush1.msra.mxu0 %v4497_v45  ;;  %938 = vmatpush1.msra.mxu1 %v4499_v46 }
 0x183   :  { %868 = vmatprep.subr.mxu0 %v4508_v48  ;;  %939 = vmatprep.subr.mxu1 %v4510_v49 }
 0x184   :  { %869 = vmatpush1.msra.mxu0 %v4514_v50  ;;  %940 = vmatpush1.msra.mxu1 %v6508_v54 }
 0x185   :  { %870 = vmatprep.subr.mxu0 %v6509_v53  ;;  %941 = vmatprep.subr.mxu1 %v6510_v1 }
 0x186   :  { %871 = vmatpush1.msra.mxu0 %v6511_v63  ;;  %942 = vmatpush1.msra.mxu1 %v6512_v11 }
 0x187   :  { %872 = vmatprep.subr.mxu0 %v6513_v38  ;;  %943 = vmatprep.subr.mxu1 %v6514_v61 }
 0x188   :  { %873 = vmatpush1.msra.mxu0 %v6515_v2  ;;  %944 = vmatpush1.msra.mxu1 %v6516_v29 }
 0x189   :  { %874 = vmatprep.subr.mxu0 %v6517_v0  ;;  %945 = vmatprep.subr.mxu1 %v6518_v51  ;;  %v6529_v51 = vld [vmem:[#allocation36_spill] sm:$0xff]  ;;  %v6532_v0 = vld [vmem:[#allocation39_spill] sm:$0xff] }
 0x18a   :  { %875 = vmatpush1.msra.mxu0 %v6519_v57  ;;  %946 = vmatpush1.msra.mxu1 %v6520_v56  ;;  %v6530_v56 = vld [vmem:[#allocation14_spill] sm:$0xff] }
 0x18b   :  { %876 = vmatprep.subr.mxu0 %v6521_v52  ;;  %947 = vmatprep.subr.mxu1 %v6522_v55  ;;  %v6531_v52 = vld [vmem:[#allocation15_spill] sm:$0xff] }
 0x18c   :  { %877 = vmatpush1.msra.mxu0 %v6523_v20  ;;  %948 = vmatpush1.msra.mxu1 %v6524_v4 }
 0x18d   :  { %878 = vmatprep.subr.mxu0 %v6525_v3  ;;  %949 = vmatprep.subr.mxu1 %v6526_v60 }
 0x18e   :  { %879 = vmatpush1.msra.mxu0 %v6527_v58  ;;  %912 = vmatprep.mubr.f32.mxu0 %v6528_v62  ;;  %v6533_v58 = vld [vmem:[#allocation38_spill] sm:$0xff] }
 0x18f   :  { %950 = vmatpush1.msra.mxu1 %v6529_v51  ;;  %983 = vmatprep.mubr.f32.mxu1 %v6528_v62  ;;  %v6534_v62 = vld [vmem:[#allocation40_spill] sm:$0xff] }
 0x190   :  { %1019 = vmatprep.subr.mxu0 %v6530_v56  ;;  %1090 = vmatprep.subr.mxu1 %v6531_v52 }
 0x22f   :  { %v743_v55 = vpop.f32.mrf.mxu0  ;;  %v814_v4 = vpop.f32.mrf.mxu1 }
 0x230   :  { %v819_v20 = vadd.f32 %v743_v55, %v4693_v59  ;;  %v821_v29 = vadd.f32 %v814_v4, %v6533_v58  ;;  %v6559_v58 = vld [vmem:[#allocation42_spill] sm:$0xff] }
 0x231   :  { %v745_v57 = vpop.f32.mrf.mxu0  ;;  %v816_v51 = vpop.f32.mrf.mxu1 }
 0x232   :  { %v823_v3 = vmul.f32 0.5, %v819_v20  ;;  %v820_v60 = vadd.f32 %v745_v57, %v6532_v0  ;;  %v822_v61 = vadd.f32 %v816_v51, %v6534_v62 }
 0x234   :  { %3984 = vtanh.f32 %v823_v3  ;;  %v827_v2 = vmul.f32 0.5, %v820_v60  ;;  %v832_v56 = vmul.f32 0.5, %v822_v61  ;;  %v6558_v3 = vld [vmem:[#allocation43_spill] sm:$0xff] }
 0x236   :  { %3986 = vtanh.f32 %v827_v2 }
 0x237   :  { %3988 = vtanh.f32 %v821_v29 }
 0x238   :  { %3990 = vtanh.f32 %v832_v56 }
 0x241   :  { %v3985_v38 = vpop.eup %3984 }
 0x242   :  { %v825_v52 = vmul.f32 0.5, %v3985_v38 }
 0x243   :  { %v3987_v11 = vpop.eup %3986 }
 0x244   :  { %v826_v63 = vadd.f32 0.5, %v825_v52  ;;  %v829_v59 = vmul.f32 0.5, %v3987_v11  ;;  %v3989_v55 = vpop.eup %3988  ;;  %v6557_v11 = vld [vmem:[#allocation41_spill] sm:$0xff] }
 0x245   :  { %v3991_v2 = vpop.eup %3990 }
 0x246   :  { %v830_v20 = vadd.f32 0.5, %v829_v59  ;;  %v837_v1 = vmul.f32 %v3989_v55, %v826_v63  ;;  %v834_v29 = vmul.f32 0.5, %v3991_v2 }
 0x248   :  { %v836_v0 = vmul.f32 %v830_v20, %v4769_v47  ;;  %v835_v4 = vadd.f32 0.5, %v834_v29  ;;  %v6555_v47 = vld [vmem:[#allocation14_spill] sm:$0xff] }
 0x24a   :  { %v4843_v57 = vadd.f32 %v837_v1, %v836_v0  ;;  %v6556_v1 = vld [vmem:[#allocation15_spill] sm:$0xff]  ;;  %v6560_v0 = vld [vmem:[#allocation44_spill] sm:$0xff] }
 0x24c   :  { %3992 = vtanh.f32 %v4843_v57 }
 0x259   :  { %v3993_v62 = vpop.eup %3992 }
 0x25a   :  { %v840_v61 = vmul.f32 %v3993_v62, %v835_v4 }
 0x25c   :  { %913 = vmatmul.mubr.f32.vlgmr.msra.gmra.mxu0 %v840_v61  ;;  %984 = vmatmul.mubr.f32.vlgmr.msra.gmra.mxu1 %v840_v61 }
 0x25d   :  { %1020 = vmatpush1.msra.mxu0 %v4369_v5  ;;  %1091 = vmatpush1.msra.mxu1 %v4371_v6  ;;  %v6535_v5 = vld [vmem:[#allocation18_spill] sm:$0xff]  ;;  %v6536_v6 = vld [vmem:[#allocation19_spill] sm:$0xff] }
 0x25e   :  { %1021 = vmatprep.subr.mxu0 %v4373_v7  ;;  %1092 = vmatprep.subr.mxu1 %v4375_v8  ;;  %v6537_v7 = vld [vmem:[#allocation20_spill] sm:$0xff]  ;;  %v6538_v8 = vld [vmem:[#allocation21_spill] sm:$0xff] }
 0x25f   :  { %1022 = vmatpush1.msra.mxu0 %v4381_v9  ;;  %1093 = vmatpush1.msra.mxu1 %v4383_v10  ;;  %v6539_v9 = vld [vmem:[#allocation22_spill] sm:$0xff]  ;;  %v6540_v10 = vld [vmem:[#allocation23_spill] sm:$0xff] }
 0x260   :  { %1023 = vmatprep.subr.mxu0 %v4392_v12  ;;  %1094 = vmatprep.subr.mxu1 %v4394_v13  ;;  %v6541_v12 = vld [vmem:[#allocation24_spill] sm:$0xff]  ;;  %v6542_v13 = vld [vmem:[#allocation25_spill] sm:$0xff] }
 0x261   :  { %1024 = vmatpush1.msra.mxu0 %v4398_v14  ;;  %1095 = vmatpush1.msra.mxu1 %v4400_v15  ;;  %v6543_v14 = vld [vmem:[#allocation26_spill] sm:$0xff]  ;;  %v6544_v15 = vld [vmem:[#allocation27_spill] sm:$0xff] }
 0x262   :  { %1025 = vmatprep.subr.mxu0 %v4402_v16  ;;  %1096 = vmatprep.subr.mxu1 %v4404_v17  ;;  %v6545_v16 = vld [vmem:[#allocation28_spill] sm:$0xff]  ;;  %v6546_v17 = vld [vmem:[#allocation29_spill] sm:$0xff] }
 0x263   :  { %1026 = vmatpush1.msra.mxu0 %v4410_v18  ;;  %1097 = vmatpush1.msra.mxu1 %v4412_v19  ;;  %v6547_v18 = vld [vmem:[#allocation30_spill] sm:$0xff]  ;;  %v6548_v19 = vld [vmem:[#allocation31_spill] sm:$0xff] }
 0x264   :  { %1027 = vmatprep.subr.mxu0 %v4421_v21  ;;  %1098 = vmatprep.subr.mxu1 %v4423_v22  ;;  %v6549_v21 = vld [vmem:[#allocation32_spill] sm:$0xff]  ;;  %v6550_v22 = vld [vmem:[#allocation33_spill] sm:$0xff] }
 0x265   :  { %1028 = vmatpush1.msra.mxu0 %v4427_v23  ;;  %1099 = vmatpush1.msra.mxu1 %v4429_v24  ;;  %v6551_v23 = vld [vmem:[#allocation34_spill] sm:$0xff]  ;;  %v6552_v24 = vld [vmem:[#allocation35_spill] sm:$0xff] }
 0x266   :  { %1029 = vmatprep.subr.mxu0 %v4431_v25  ;;  %1100 = vmatprep.subr.mxu1 %v4433_v26  ;;  %v6553_v25 = vmov 0.0   ;;  %v6554_v26 = vld [vmem:[#allocation36_spill] sm:$0xff] }
 0x267   :  { %1030 = vmatpush1.msra.mxu0 %v4439_v27  ;;  %1101 = vmatpush1.msra.mxu1 %v4441_v28 }
 0x268   :  { %1031 = vmatprep.subr.mxu0 %v4450_v30  ;;  %1102 = vmatprep.subr.mxu1 %v4452_v31 }
 0x269   :  { %1032 = vmatpush1.msra.mxu0 %v4456_v32  ;;  %1103 = vmatpush1.msra.mxu1 %v4458_v33 }
 0x26a   :  { %1033 = vmatprep.subr.mxu0 %v4460_v34  ;;  %1104 = vmatprep.subr.mxu1 %v4462_v35 }
 0x26b   :  { %1034 = vmatpush1.msra.mxu0 %v4468_v36  ;;  %1105 = vmatpush1.msra.mxu1 %v4470_v37 }
 0x26c   :  { %1035 = vmatprep.subr.mxu0 %v4479_v39  ;;  %1106 = vmatprep.subr.mxu1 %v4481_v40 }
 0x26d   :  { %1036 = vmatpush1.msra.mxu0 %v4485_v41  ;;  %1107 = vmatpush1.msra.mxu1 %v4487_v42 }
 0x26e   :  { %1037 = vmatprep.subr.mxu0 %v4489_v43  ;;  %1108 = vmatprep.subr.mxu1 %v4491_v44 }
 0x26f   :  { %1038 = vmatpush1.msra.mxu0 %v4497_v45  ;;  %1109 = vmatpush1.msra.mxu1 %v4499_v46 }
 0x270   :  { %1039 = vmatprep.subr.mxu0 %v4508_v48  ;;  %1110 = vmatprep.subr.mxu1 %v4510_v49 }
 0x271   :  { %1040 = vmatpush1.msra.mxu0 %v4514_v50  ;;  %1111 = vmatpush1.msra.mxu1 %v6508_v54 }
 0x272   :  { %1041 = vmatprep.subr.mxu0 %v6509_v53  ;;  %1112 = vmatprep.subr.mxu1 %v6535_v5 }
 0x273   :  { %1042 = vmatpush1.msra.mxu0 %v6536_v6  ;;  %1113 = vmatpush1.msra.mxu1 %v6537_v7 }
 0x274   :  { %1043 = vmatprep.subr.mxu0 %v6538_v8  ;;  %1114 = vmatprep.subr.mxu1 %v6539_v9 }
 0x275   :  { %1044 = vmatpush1.msra.mxu0 %v6540_v10  ;;  %1115 = vmatpush1.msra.mxu1 %v6541_v12 }
 0x276   :  { %1045 = vmatprep.subr.mxu0 %v6542_v13  ;;  %1116 = vmatprep.subr.mxu1 %v6543_v14 }
 0x277   :  { %1046 = vmatpush1.msra.mxu0 %v6544_v15  ;;  %1117 = vmatpush1.msra.mxu1 %v6545_v16 }
 0x278   :  { %1047 = vmatprep.subr.mxu0 %v6546_v17  ;;  %1118 = vmatprep.subr.mxu1 %v6547_v18 }
 0x279   :  { %1048 = vmatpush1.msra.mxu0 %v6548_v19  ;;  %1119 = vmatpush1.msra.mxu1 %v6549_v21 }
 0x27a   :  { %1049 = vmatprep.subr.mxu0 %v6550_v22  ;;  %1120 = vmatprep.subr.mxu1 %v6551_v23 }
 0x27b   :  { %1050 = vmatpush1.msra.mxu0 %v6552_v24  ;;  %1083 = vmatprep.mubr.f32.mxu0 %v6553_v25 }
 0x27c   :  { %1121 = vmatpush1.msra.mxu1 %v6554_v26  ;;  %1154 = vmatprep.mubr.f32.mxu1 %v6553_v25 }
 0x27d   :  { %1190 = vmatprep.subr.mxu0 %v6555_v47  ;;  %1261 = vmatprep.subr.mxu1 %v6556_v1 }
 0x31c   :  { %v914_v63 = vpop.f32.mrf.mxu0  ;;  %v985_v51 = vpop.f32.mrf.mxu1 }
 0x31d   :  { %v990_v38 = vadd.f32 %v914_v63, %v6557_v11  ;;  %v992_v59 = vadd.f32 %v985_v51, %v6559_v58 }
 0x31e   :  { %v916_v56 = vpop.f32.mrf.mxu0  ;;  %v987_v20 = vpop.f32.mrf.mxu1 }
 0x31f   :  { %v994_v52 = vmul.f32 0.5, %v990_v38  ;;  %v991_v60 = vadd.f32 %v916_v56, %v6558_v3  ;;  %v993_v2 = vadd.f32 %v987_v20, %v6560_v0  ;;  %v4923_v20 = vld [vmem:[#allocation6 + $0x1f0] sm:$0xff]  ;;  %v4929_v0 = vld [vmem:[#allocation6 + $0x1d8] sm:$0xff] }
 0x321   :  { %3994 = vtanh.f32 %v994_v52  ;;  %v998_v55 = vmul.f32 0.5, %v991_v60  ;;  %v1003_v29 = vmul.f32 0.5, %v993_v2  ;;  %v4932_v2 = vld [vmem:[#allocation6 + $0x1c0] sm:$0xff] }
 0x323   :  { %3996 = vtanh.f32 %v998_v55  ;;  %v4920_v55 = vld [vmem:[#allocation6 + $0x1e0] sm:$0xff] }
 0x324   :  { %3998 = vtanh.f32 %v992_v59 }
 0x325   :  { %4000 = vtanh.f32 %v1003_v29  ;;  %v4935_v29 = vld [vmem:[#allocation6 + $0x1d0] sm:$0xff] }
 0x32e   :  { %v3995_v4 = vpop.eup %3994 }
 0x32f   :  { %v996_v62 = vmul.f32 0.5, %v3995_v4  ;;  %v4938_v4 = vld [vmem:[#allocation6 + $0x1a8] sm:$0xff] }
 0x330   :  { %v3997_v61 = vpop.eup %3996 }
 0x331   :  { %v997_v47 = vadd.f32 0.5, %v996_v62  ;;  %v1000_v1 = vmul.f32 0.5, %v3997_v61  ;;  %v3999_v63 = vpop.eup %3998  ;;  %v4941_v62 = vld [vmem:[#allocation6 + $0x1b8] sm:$0xff]  ;;  %v4944_v61 = vld [vmem:[#allocation6 + $0x1a0] sm:$0xff] }
 0x332   :  { %v4001_v51 = vpop.eup %4000 }
 0x333   :  { %v1001_v11 = vadd.f32 0.5, %v1000_v1  ;;  %v1008_v38 = vmul.f32 %v3999_v63, %v997_v47  ;;  %v1005_v3 = vmul.f32 0.5, %v4001_v51  ;;  %v4947_v47 = vld [vmem:[#allocation6 + $0x1b0] sm:$0xff]  ;;  %v4950_v1 = vld [vmem:[#allocation6 + $0x188] sm:$0xff]  ;;  %v4953_v63 = vld [vmem:[#allocation6 + $0x198] sm:$0xff] }
 0x334   :  { %v4965_v51 = vld [vmem:[#allocation6 + $0x178] sm:$0xff] }
 0x335   :  { %v1007_v56 = vmul.f32 %v1001_v11, %v4843_v57  ;;  %v1006_v60 = vadd.f32 0.5, %v1005_v3  ;;  %v4926_v57 = vld [vmem:[#allocation6 + $0x1c8] sm:$0xff]  ;;  %v4956_v11 = vld [vmem:[#allocation6 + $0x180] sm:$0xff] }
 0x336   :  { %v4968_v3 = vld [vmem:[#allocation6 + $0x160] sm:$0xff] }
 0x337   :  { %v4917_v52 = vadd.f32 %v1008_v38, %v1007_v56  ;;  %v4959_v38 = vld [vmem:[#allocation6 + $0x190] sm:$0xff]  ;;  %v4962_v56 = vld [vmem:[#allocation6 + $0x168] sm:$0xff] }
 0x339   :  { %4002 = vtanh.f32 %v4917_v52 }
 0x346   :  { %v4003_v58 = vpop.eup %4002 }
 0x347   :  { %v1011_v59 = vmul.f32 %v4003_v58, %v1006_v60  ;;  %v4971_v60 = vld [vmem:[#allocation6 + $0x170] sm:$0xff]  ;;  %v4974_v58 = vld [vmem:[#allocation6 + $0x148] sm:$0xff] }
 0x349   :  { %1084 = vmatmul.mubr.f32.vlgmr.msra.gmra.mxu0 %v1011_v59  ;;  %1155 = vmatmul.mubr.f32.vlgmr.msra.gmra.mxu1 %v1011_v59  ;;  %v4977_v59 = vld [vmem:[#allocation6 + $0x158] sm:$0xff] }
 0x34a   :  { %1191 = vmatpush1.msra.mxu0 %v4920_v55  ;;  %1262 = vmatpush1.msra.mxu1 %v4923_v20 }
 0x34b   :  { %1192 = vmatprep.subr.mxu0 %v4926_v57  ;;  %1263 = vmatprep.subr.mxu1 %v4929_v0 }
 0x34c   :  { %1193 = vmatpush1.msra.mxu0 %v4932_v2  ;;  %1264 = vmatpush1.msra.mxu1 %v4935_v29 }
 0x34d   :  { %1194 = vmatprep.subr.mxu0 %v4938_v4  ;;  %1265 = vmatprep.subr.mxu1 %v4941_v62 }
 0x34e   :  { %1195 = vmatpush1.msra.mxu0 %v4944_v61  ;;  %1266 = vmatpush1.msra.mxu1 %v4947_v47 }
 0x34f   :  { %1196 = vmatprep.subr.mxu0 %v4950_v1  ;;  %1267 = vmatprep.subr.mxu1 %v4953_v63 }
 0x350   :  { %1197 = vmatpush1.msra.mxu0 %v4956_v11  ;;  %1268 = vmatpush1.msra.mxu1 %v4959_v38 }
 0x351   :  { %1198 = vmatprep.subr.mxu0 %v4962_v56  ;;  %1269 = vmatprep.subr.mxu1 %v4965_v51 }
 0x352   :  { %1199 = vmatpush1.msra.mxu0 %v4968_v3  ;;  %1270 = vmatpush1.msra.mxu1 %v4971_v60 }
 0x353   :  { %1200 = vmatprep.subr.mxu0 %v4974_v58  ;;  %1271 = vmatprep.subr.mxu1 %v4977_v59 }
 0x354   :  { %1201 = vmatpush1.msra.mxu0 %v4439_v27  ;;  %1272 = vmatpush1.msra.mxu1 %v4441_v28  ;;  %v5024_v27 = vld [vmem:[#allocation6 + $0x1e8] sm:$0xff]  ;;  %v5027_v28 = vld [vmem:[#allocation6 + $0x1f8] sm:$0xff] }
 0x355   :  { %1202 = vmatprep.subr.mxu0 %v4450_v30  ;;  %1273 = vmatprep.subr.mxu1 %v4452_v31  ;;  %6561 = vst [vmem:[#allocation16_spill] sm:$0xff] %v5024_v27  ;;  %6562 = vst [vmem:[#allocation17_spill] sm:$0xff] %v5027_v28  ;;  %v6563_v31 = vld [vmem:[#allocation45_spill] sm:$0xff] }
 0x356   :  { %1203 = vmatpush1.msra.mxu0 %v4456_v32  ;;  %1274 = vmatpush1.msra.mxu1 %v4458_v33 }
 0x357   :  { %1204 = vmatprep.subr.mxu0 %v4460_v34  ;;  %1275 = vmatprep.subr.mxu1 %v4462_v35 }
 0x358   :  { %1205 = vmatpush1.msra.mxu0 %v4468_v36  ;;  %1276 = vmatpush1.msra.mxu1 %v4470_v37  ;;  %v6564_v36 = vld [vmem:[#allocation47_spill] sm:$0xff] }
 0x359   :  { %1206 = vmatprep.subr.mxu0 %v4479_v39  ;;  %1277 = vmatprep.subr.mxu1 %v4481_v40  ;;  %v6565_v39 = vld [vmem:[#allocation46_spill] sm:$0xff] }
 0x35a   :  { %1207 = vmatpush1.msra.mxu0 %v4485_v41  ;;  %1278 = vmatpush1.msra.mxu1 %v4487_v42 }
 0x35b   :  { %1208 = vmatprep.subr.mxu0 %v4489_v43  ;;  %1279 = vmatprep.subr.mxu1 %v4491_v44  ;;  %v6566_v43 = vld [vmem:[#allocation48_spill] sm:$0xff] }
 0x35c   :  { %1209 = vmatpush1.msra.mxu0 %v4497_v45  ;;  %1280 = vmatpush1.msra.mxu1 %v4499_v46 }
 0x35d   :  { %1210 = vmatprep.subr.mxu0 %v4508_v48  ;;  %1281 = vmatprep.subr.mxu1 %v4510_v49 }
 0x35e   :  { %1211 = vmatpush1.msra.mxu0 %v4514_v50  ;;  %1282 = vmatpush1.msra.mxu1 %v6508_v54 }
 0x35f   :  { %1212 = vmatprep.subr.mxu0 %v6509_v53  ;;  %1283 = vmatprep.subr.mxu1 %v6535_v5 }
 0x360   :  { %1213 = vmatpush1.msra.mxu0 %v6536_v6  ;;  %1284 = vmatpush1.msra.mxu1 %v6537_v7 }
 0x361   :  { %1214 = vmatprep.subr.mxu0 %v6538_v8  ;;  %1285 = vmatprep.subr.mxu1 %v6539_v9 }
 0x362   :  { %1215 = vmatpush1.msra.mxu0 %v6540_v10  ;;  %1286 = vmatpush1.msra.mxu1 %v6541_v12 }
 0x363   :  { %1216 = vmatprep.subr.mxu0 %v6542_v13  ;;  %1287 = vmatprep.subr.mxu1 %v6543_v14 }
 0x364   :  { %1217 = vmatpush1.msra.mxu0 %v6544_v15  ;;  %1288 = vmatpush1.msra.mxu1 %v6545_v16  ;;  %v5058_v15 = vld [vmem:[#allocation6 + $0x140] sm:$0xff]  ;;  %v5061_v16 = vld [vmem:[#allocation6 + $0x150] sm:$0xff] }
 0x365   :  { %1218 = vmatprep.subr.mxu0 %v6546_v17  ;;  %1289 = vmatprep.subr.mxu1 %v6547_v18  ;;  %v5064_v17 = vld [vmem:[#allocation6 + $0x128] sm:$0xff]  ;;  %v5067_v18 = vld [vmem:[#allocation6 + $0x138] sm:$0xff] }
 0x366   :  { %1219 = vmatpush1.msra.mxu0 %v6548_v19  ;;  %1290 = vmatpush1.msra.mxu1 %v6549_v21  ;;  %v5070_v19 = vld [vmem:[#allocation6 + $0x120] sm:$0xff]  ;;  %v5073_v21 = vld [vmem:[#allocation6 + $0x130] sm:$0xff] }
 0x367   :  { %1220 = vmatprep.subr.mxu0 %v6550_v22  ;;  %1291 = vmatprep.subr.mxu1 %v6551_v23  ;;  %v5076_v22 = vld [vmem:[#allocation6 + $0x108] sm:$0xff]  ;;  %v5079_v23 = vld [vmem:[#allocation6 + $0x118] sm:$0xff] }
 0x368   :  { %1221 = vmatpush1.msra.mxu0 %v6552_v24  ;;  %1254 = vmatprep.mubr.f32.mxu0 %v6553_v25  ;;  %v5082_v24 = vld [vmem:[#allocation6 + $0x100] sm:$0xff] }
 0x369   :  { %1292 = vmatpush1.msra.mxu1 %v6554_v26  ;;  %1325 = vmatprep.mubr.f32.mxu1 %v6553_v25  ;;  %v5085_v26 = vld [vmem:[#allocation6 + $0x110] sm:$0xff] }
 0x36a   :  { %1361 = vmatprep.subr.mxu0 %v5024_v27  ;;  %1432 = vmatprep.subr.mxu1 %v5027_v28 }
 0x409   :  { %v1085_v30 = vpop.f32.mrf.mxu0  ;;  %v1156_v33 = vpop.f32.mrf.mxu1 }
 0x40a   :  { %v1161_v32 = vadd.f32 %v1085_v30, %v6563_v31  ;;  %v1163_v40 = vadd.f32 %v1156_v33, %v6565_v39  ;;  %v5091_v30 = vld [vmem:[#allocation6 + $0xf8] sm:$0xff]  ;;  %v5094_v31 = vld [vmem:[#allocation6 + $0xe0] sm:$0xff]  ;;  %v5100_v33 = vld [vmem:[#allocation6 + $0xc8] sm:$0xff] }
 0x40b   :  { %v1087_v34 = vpop.f32.mrf.mxu0  ;;  %v1158_v42 = vpop.f32.mrf.mxu1  ;;  %v5115_v39 = vld [vmem:[#allocation6 + $0xb8] sm:$0xff] }
 0x40c   :  { %v1165_v35 = vmul.f32 0.5, %v1161_v32  ;;  %v1162_v37 = vadd.f32 %v1087_v34, %v6564_v36  ;;  %v1164_v44 = vadd.f32 %v1158_v42, %v6566_v43  ;;  %v5097_v32 = vld [vmem:[#allocation6 + $0xf0] sm:$0xff]  ;;  %v5103_v34 = vld [vmem:[#allocation6 + $0xd8] sm:$0xff]  ;;  %v5124_v42 = vld [vmem:[#allocation6 + $0x88] sm:$0xff] }
 0x40d   :  { %v5109_v36 = vld [vmem:[#allocation6 + $0xd0] sm:$0xff]  ;;  %v5127_v43 = vld [vmem:[#allocation6 + $0x98] sm:$0xff] }
 0x40e   :  { %4004 = vtanh.f32 %v1165_v35  ;;  %v1169_v41 = vmul.f32 0.5, %v1162_v37  ;;  %v1174_v45 = vmul.f32 0.5, %v1164_v44  ;;  %v5106_v35 = vld [vmem:[#allocation6 + $0xc0] sm:$0xff]  ;;  %v5112_v37 = vld [vmem:[#allocation6 + $0xa8] sm:$0xff]  ;;  %6567 = vst [vmem:[#allocation39_spill] sm:$0xff] %v5127_v43 }
 0x40f   :  { %v5130_v44 = vld [vmem:[#allocation6 + $0x80] sm:$0xff] }
 0x410   :  { %4006 = vtanh.f32 %v1169_v41  ;;  %v5121_v41 = vld [vmem:[#allocation6 + $0xb0] sm:$0xff]  ;;  %6568 = vst [vmem:[#allocation38_spill] sm:$0xff] %v5130_v44 }
 0x411   :  { %4008 = vtanh.f32 %v1163_v40  ;;  %v5118_v40 = vld [vmem:[#allocation6 + $0xa0] sm:$0xff] }
 0x412   :  { %4010 = vtanh.f32 %v1174_v45  ;;  %v5133_v45 = vld [vmem:[#allocation6 + $0x90] sm:$0xff] }
 0x413   :  { %6569 = vst [vmem:[#allocation40_spill] sm:$0xff] %v5133_v45 }
 0x41b   :  { %v4005_v46 = vpop.eup %4004 }
 0x41c   :  { %v1167_v48 = vmul.f32 0.5, %v4005_v46  ;;  %v5136_v46 = vld [vmem:[#allocation6 + $0x68] sm:$0xff] }
 0x41d   :  { %v4007_v49 = vpop.eup %4006  ;;  %6570 = vst [vmem:[#allocation18_spill] sm:$0xff] %v5136_v46 }
 0x41e   :  { %v1168_v50 = vadd.f32 0.5, %v1167_v48  ;;  %v1171_v54 = vmul.f32 0.5, %v4007_v49  ;;  %v4009_v53 = vpop.eup %4008  ;;  %v5139_v48 = vld [vmem:[#allocation6 + $0x78] sm:$0xff]  ;;  %v5142_v49 = vld [vmem:[#allocation6 + $0x60] sm:$0xff] }
 0x41f   :  { %v4011_v9 = vpop.eup %4010  ;;  %6571 = vst [vmem:[#allocation19_spill] sm:$0xff] %v5139_v48  ;;  %6572 = vst [vmem:[#allocation20_spill] sm:$0xff] %v5142_v49 }
 0x420   :  { %v1172_v5 = vadd.f32 0.5, %v1171_v54  ;;  %v1179_v6 = vmul.f32 %v4009_v53, %v1168_v50  ;;  %v1176_v10 = vmul.f32 0.5, %v4011_v9  ;;  %v5145_v50 = vld [vmem:[#allocation6 + $0x70] sm:$0xff]  ;;  %v5148_v54 = vld [vmem:[#allocation6 + $0x48] sm:$0xff]  ;;  %v5151_v53 = vld [vmem:[#allocation6 + $0x58] sm:$0xff] }
 0x421   :  { %6573 = vst [vmem:[#allocation21_spill] sm:$0xff] %v5145_v50  ;;  %6574 = vst [vmem:[#allocation22_spill] sm:$0xff] %v5148_v54  ;;  %v5163_v9 = vld [vmem:[#allocation6 + $0x38] sm:$0xff] }
 0x422   :  { %v1178_v7 = vmul.f32 %v1172_v5, %v4917_v52  ;;  %v1177_v12 = vadd.f32 0.5, %v1176_v10  ;;  %v5088_v52 = vld [vmem:[#allocation6 + $0xe8] sm:$0xff]  ;;  %6575 = vst [vmem:[#allocation23_spill] sm:$0xff] %v5151_v53  ;;  %v5154_v5 = vld [vmem:[#allocation6 + $0x40] sm:$0xff]  ;;  %6579 = vst [vmem:[#allocation27_spill] sm:$0xff] %v5163_v9 }
 0x423   :  { %6576 = vst [vmem:[#allocation24_spill] sm:$0xff] %v5154_v5  ;;  %v5166_v10 = vld [vmem:[#allocation6 + $0x20] sm:$0xff] }
 0x424   :  { %v5035_v8 = vadd.f32 %v1179_v6, %v1178_v7  ;;  %v5157_v6 = vld [vmem:[#allocation6 + $0x50] sm:$0xff]  ;;  %v5160_v7 = vld [vmem:[#allocation6 + $0x28] sm:$0xff]  ;;  %6580 = vst [vmem:[#allocation28_spill] sm:$0xff] %v5166_v10 }
 0x425   :  { %6577 = vst [vmem:[#allocation25_spill] sm:$0xff] %v5157_v6  ;;  %6578 = vst [vmem:[#allocation26_spill] sm:$0xff] %v5160_v7 }
 0x426   :  { %4012 = vtanh.f32 %v5035_v8 }
 0x433   :  { %v4013_v13 = vpop.eup %4012 }
 0x434   :  { %v1182_v14 = vmul.f32 %v4013_v13, %v1177_v12  ;;  %v5169_v12 = vld [vmem:[#allocation6 + $0x30] sm:$0xff]  ;;  %v5172_v13 = vld [vmem:[#allocation6 + $0x8] sm:$0xff] }
 0x435   :  { %6581 = vst [vmem:[#allocation29_spill] sm:$0xff] %v5169_v12  ;;  %6582 = vst [vmem:[#allocation30_spill] sm:$0xff] %v5172_v13 }
 0x436   :  { %1255 = vmatmul.mubr.f32.vlgmr.msra.gmra.mxu0 %v1182_v14  ;;  %1326 = vmatmul.mubr.f32.vlgmr.msra.gmra.mxu1 %v1182_v14  ;;  %v5175_v14 = vld [vmem:[#allocation6 + $0x18] sm:$0xff] }
 0x437   :  { %1362 = vmatpush1.msra.mxu0 %v4920_v55  ;;  %1433 = vmatpush1.msra.mxu1 %v4923_v20  ;;  %6583 = vst [vmem:[#allocation31_spill] sm:$0xff] %v5175_v14 }
 0x438   :  { %1363 = vmatprep.subr.mxu0 %v4926_v57  ;;  %1434 = vmatprep.subr.mxu1 %v4929_v0 }
 0x439   :  { %1364 = vmatpush1.msra.mxu0 %v4932_v2  ;;  %1435 = vmatpush1.msra.mxu1 %v4935_v29 }
 0x43a   :  { %1365 = vmatprep.subr.mxu0 %v4938_v4  ;;  %1436 = vmatprep.subr.mxu1 %v4941_v62 }
 0x43b   :  { %1366 = vmatpush1.msra.mxu0 %v4944_v61  ;;  %1437 = vmatpush1.msra.mxu1 %v4947_v47 }
 0x43c   :  { %1367 = vmatprep.subr.mxu0 %v4950_v1  ;;  %1438 = vmatprep.subr.mxu1 %v4953_v63 }
 0x43d   :  { %1368 = vmatpush1.msra.mxu0 %v4956_v11  ;;  %1439 = vmatpush1.msra.mxu1 %v4959_v38 }
 0x43e   :  { %1369 = vmatprep.subr.mxu0 %v4962_v56  ;;  %1440 = vmatprep.subr.mxu1 %v4965_v51 }
 0x43f   :  { %1370 = vmatpush1.msra.mxu0 %v4968_v3  ;;  %1441 = vmatpush1.msra.mxu1 %v4971_v60 }
 0x440   :  { %1371 = vmatprep.subr.mxu0 %v4974_v58  ;;  %1442 = vmatprep.subr.mxu1 %v4977_v59 }
 0x441   :  { %1372 = vmatpush1.msra.mxu0 %v5058_v15  ;;  %1443 = vmatpush1.msra.mxu1 %v5061_v16 }
 0x442   :  { %1373 = vmatprep.subr.mxu0 %v5064_v17  ;;  %1444 = vmatprep.subr.mxu1 %v5067_v18 }
 0x443   :  { %1374 = vmatpush1.msra.mxu0 %v5070_v19  ;;  %1445 = vmatpush1.msra.mxu1 %v5073_v21 }
 0x444   :  { %1375 = vmatprep.subr.mxu0 %v5076_v22  ;;  %1446 = vmatprep.subr.mxu1 %v5079_v23 }
 0x445   :  { %1376 = vmatpush1.msra.mxu0 %v5082_v24  ;;  %1447 = vmatpush1.msra.mxu1 %v5085_v26 }
 0x446   :  { %1377 = vmatprep.subr.mxu0 %v5088_v52  ;;  %1448 = vmatprep.subr.mxu1 %v5091_v30 }
 0x447   :  { %1378 = vmatpush1.msra.mxu0 %v5094_v31  ;;  %1449 = vmatpush1.msra.mxu1 %v5097_v32 }
 0x448   :  { %1379 = vmatprep.subr.mxu0 %v5100_v33  ;;  %1450 = vmatprep.subr.mxu1 %v5103_v34 }
 0x449   :  { %1380 = vmatpush1.msra.mxu0 %v5106_v35  ;;  %1451 = vmatpush1.msra.mxu1 %v5109_v36 }
 0x44a   :  { %1381 = vmatprep.subr.mxu0 %v5112_v37  ;;  %1452 = vmatprep.subr.mxu1 %v5115_v39 }
 0x44b   :  { %1382 = vmatpush1.msra.mxu0 %v5118_v40  ;;  %1453 = vmatpush1.msra.mxu1 %v5121_v41 }
 0x44c   :  { %1383 = vmatprep.subr.mxu0 %v5124_v42  ;;  %1454 = vmatprep.subr.mxu1 %v5127_v43 }
 0x44d   :  { %1384 = vmatpush1.msra.mxu0 %v5130_v44  ;;  %1455 = vmatpush1.msra.mxu1 %v5133_v45 }
 0x44e   :  { %1385 = vmatprep.subr.mxu0 %v5136_v46  ;;  %1456 = vmatprep.subr.mxu1 %v5139_v48 }
 0x44f   :  { %1386 = vmatpush1.msra.mxu0 %v5142_v49  ;;  %1457 = vmatpush1.msra.mxu1 %v5145_v50 }
 0x450   :  { %1387 = vmatprep.subr.mxu0 %v5148_v54  ;;  %1458 = vmatprep.subr.mxu1 %v5151_v53  ;;  %v6587_v53 = vld [vmem:[#allocation51_spill] sm:$0xff]  ;;  %v6588_v54 = vld [vmem:[#allocation50_spill] sm:$0xff] }
 0x451   :  { %1388 = vmatpush1.msra.mxu0 %v5154_v5  ;;  %1459 = vmatpush1.msra.mxu1 %v5157_v6 }
 0x452   :  { %1389 = vmatprep.subr.mxu0 %v5160_v7  ;;  %1460 = vmatprep.subr.mxu1 %v5163_v9  ;;  %v5178_v7 = vld [vmem:[#allocation6] sm:$0xff]  ;;  %v5182_v9 = vld [vmem:[#allocation6 + $0x10] sm:$0xff] }
 0x453   :  { %1390 = vmatpush1.msra.mxu0 %v5166_v10  ;;  %1461 = vmatpush1.msra.mxu1 %v5169_v12  ;;  %6584 = vst [vmem:[#allocation32_spill] sm:$0xff] %v5178_v7  ;;  %6585 = vst [vmem:[#allocation33_spill] sm:$0xff] %v5182_v9  ;;  %v6586_v12 = vld [vmem:[#allocation49_spill] sm:$0xff] }
 0x454   :  { %1391 = vmatprep.subr.mxu0 %v5172_v13  ;;  %1462 = vmatprep.subr.mxu1 %v5175_v14 }
 0x455   :  { %1392 = vmatpush1.msra.mxu0 %v5178_v7  ;;  %1425 = vmatprep.mubr.f32.mxu0 %v6553_v25 }
 0x456   :  { %1463 = vmatpush1.msra.mxu1 %v5182_v9  ;;  %1496 = vmatprep.mubr.f32.mxu1 %v6553_v25  ;;  %v6589_v25 = vld [vmem:[#allocation52_spill] sm:$0xff] }
 0x457   :  { %1532 = vmatprep.subr.mxu0 %v5024_v27  ;;  %1603 = vmatprep.subr.mxu1 %v5027_v28 }
 0x4f6   :  { %v1256_v13 = vpop.f32.mrf.mxu0  ;;  %v1327_v14 = vpop.f32.mrf.mxu1 }
 0x4f7   :  { %v1332_v10 = vadd.f32 %v1256_v13, %v6586_v12  ;;  %v1334_v50 = vadd.f32 %v1327_v14, %v6588_v54  ;;  %v6600_v14 = vld [vmem:[#allocation25_spill] sm:$0xff] }
 0x4f8   :  { %v1258_v6 = vpop.f32.mrf.mxu0  ;;  %v1329_v9 = vpop.f32.mrf.mxu1 }
 0x4f9   :  { %v1336_v5 = vmul.f32 0.5, %v1332_v10  ;;  %v1333_v7 = vadd.f32 %v1258_v6, %v6587_v53  ;;  %v1335_v48 = vadd.f32 %v1329_v9, %v6589_v25  ;;  %v6597_v6 = vld [vmem:[#allocation22_spill] sm:$0xff]  ;;  %v6599_v9 = vld [vmem:[#allocation24_spill] sm:$0xff] }
 0x4fb   :  { %4014 = vtanh.f32 %v1336_v5  ;;  %v1340_v49 = vmul.f32 0.5, %v1333_v7  ;;  %v1345_v27 = vmul.f32 0.5, %v1335_v48  ;;  %v6598_v7 = vld [vmem:[#allocation23_spill] sm:$0xff] }
 0x4fd   :  { %4016 = vtanh.f32 %v1340_v49 }
 0x4fe   :  { %4018 = vtanh.f32 %v1334_v50 }
 0x4ff   :  { %4020 = vtanh.f32 %v1345_v27  ;;  %v6590_v27 = vld [vmem:[#allocation39_spill] sm:$0xff] }
 0x508   :  { %v4015_v46 = vpop.eup %4014 }
 0x509   :  { %v1338_v28 = vmul.f32 0.5, %v4015_v46  ;;  %v6596_v46 = vld [vmem:[#allocation21_spill] sm:$0xff] }
 0x50a   :  { %v4017_v45 = vpop.eup %4016 }
 0x50b   :  { %v1339_v44 = vadd.f32 0.5, %v1338_v28  ;;  %v1342_v12 = vmul.f32 0.5, %v4017_v45  ;;  %v4019_v13 = vpop.eup %4018  ;;  %v6591_v28 = vld [vmem:[#allocation38_spill] sm:$0xff]  ;;  %v6595_v45 = vld [vmem:[#allocation20_spill] sm:$0xff] }
 0x50c   :  { %v4021_v49 = vpop.eup %4020 }
 0x50d   :  { %v1343_v10 = vadd.f32 0.5, %v1342_v12  ;;  %v1350_v43 = vmul.f32 %v4019_v13, %v1339_v44  ;;  %v1347_v50 = vmul.f32 0.5, %v4021_v49  ;;  %v6594_v44 = vld [vmem:[#allocation19_spill] sm:$0xff]  ;;  %v6601_v12 = vld [vmem:[#allocation26_spill] sm:$0xff] }
 0x50e   :  { %v6602_v13 = vld [vmem:[#allocation27_spill] sm:$0xff]  ;;  %v6605_v49 = vld [vmem:[#allocation30_spill] sm:$0xff] }
 0x50f   :  { %v1349_v53 = vmul.f32 %v1343_v10, %v5035_v8  ;;  %v1348_v54 = vadd.f32 0.5, %v1347_v50  ;;  %v6592_v8 = vld [vmem:[#allocation40_spill] sm:$0xff]  ;;  %v6606_v50 = vld [vmem:[#allocation31_spill] sm:$0xff] }
 0x510   :  { %v6603_v10 = vld [vmem:[#allocation28_spill] sm:$0xff] }
 0x511   :  { %v5193_v5 = vadd.f32 %v1350_v43, %v1349_v53  ;;  %v6593_v43 = vld [vmem:[#allocation18_spill] sm:$0xff]  ;;  %v6604_v53 = vld [vmem:[#allocation29_spill] sm:$0xff] }
 0x513   :  { %4022 = vtanh.f32 %v5193_v5 }
 0x520   :  { %v4023_v25 = vpop.eup %4022 }
 0x521   :  { %v1353_v48 = vmul.f32 %v4023_v25, %v1348_v54  ;;  %v6607_v54 = vld [vmem:[#allocation32_spill] sm:$0xff]  ;;  %v6608_v25 = vmov 0.0  }
 0x523   :  { %1426 = vmatmul.mubr.f32.vlgmr.msra.gmra.mxu0 %v1353_v48  ;;  %1497 = vmatmul.mubr.f32.vlgmr.msra.gmra.mxu1 %v1353_v48  ;;  %v6609_v48 = vld [vmem:[#allocation33_spill] sm:$0xff] }
 0x524   :  { %1533 = vmatpush1.msra.mxu0 %v4920_v55  ;;  %1604 = vmatpush1.msra.mxu1 %v4923_v20 }
 0x525   :  { %1534 = vmatprep.subr.mxu0 %v4926_v57  ;;  %1605 = vmatprep.subr.mxu1 %v4929_v0 }
 0x526   :  { %1535 = vmatpush1.msra.mxu0 %v4932_v2  ;;  %1606 = vmatpush1.msra.mxu1 %v4935_v29 }
 0x527   :  { %1536 = vmatprep.subr.mxu0 %v4938_v4  ;;  %1607 = vmatprep.subr.mxu1 %v4941_v62 }
 0x528   :  { %1537 = vmatpush1.msra.mxu0 %v4944_v61  ;;  %1608 = vmatpush1.msra.mxu1 %v4947_v47 }
 0x529   :  { %1538 = vmatprep.subr.mxu0 %v4950_v1  ;;  %1609 = vmatprep.subr.mxu1 %v4953_v63 }
 0x52a   :  { %1539 = vmatpush1.msra.mxu0 %v4956_v11  ;;  %1610 = vmatpush1.msra.mxu1 %v4959_v38 }
 0x52b   :  { %1540 = vmatprep.subr.mxu0 %v4962_v56  ;;  %1611 = vmatprep.subr.mxu1 %v4965_v51 }
 0x52c   :  { %1541 = vmatpush1.msra.mxu0 %v4968_v3  ;;  %1612 = vmatpush1.msra.mxu1 %v4971_v60 }
 0x52d   :  { %1542 = vmatprep.subr.mxu0 %v4974_v58  ;;  %1613 = vmatprep.subr.mxu1 %v4977_v59 }
 0x52e   :  { %1543 = vmatpush1.msra.mxu0 %v5058_v15  ;;  %1614 = vmatpush1.msra.mxu1 %v5061_v16 }
 0x52f   :  { %1544 = vmatprep.subr.mxu0 %v5064_v17  ;;  %1615 = vmatprep.subr.mxu1 %v5067_v18 }
 0x530   :  { %1545 = vmatpush1.msra.mxu0 %v5070_v19  ;;  %1616 = vmatpush1.msra.mxu1 %v5073_v21 }
 0x531   :  { %1546 = vmatprep.subr.mxu0 %v5076_v22  ;;  %1617 = vmatprep.subr.mxu1 %v5079_v23 }
 0x532   :  { %1547 = vmatpush1.msra.mxu0 %v5082_v24  ;;  %1618 = vmatpush1.msra.mxu1 %v5085_v26 }
 0x533   :  { %1548 = vmatprep.subr.mxu0 %v5088_v52  ;;  %1619 = vmatprep.subr.mxu1 %v5091_v30 }
 0x534   :  { %1549 = vmatpush1.msra.mxu0 %v5094_v31  ;;  %1620 = vmatpush1.msra.mxu1 %v5097_v32 }
 0x535   :  { %1550 = vmatprep.subr.mxu0 %v5100_v33  ;;  %1621 = vmatprep.subr.mxu1 %v5103_v34 }
 0x536   :  { %1551 = vmatpush1.msra.mxu0 %v5106_v35  ;;  %1622 = vmatpush1.msra.mxu1 %v5109_v36 }
 0x537   :  { %1552 = vmatprep.subr.mxu0 %v5112_v37  ;;  %1623 = vmatprep.subr.mxu1 %v5115_v39 }
 0x538   :  { %1553 = vmatpush1.msra.mxu0 %v5118_v40  ;;  %1624 = vmatpush1.msra.mxu1 %v5121_v41 }
 0x539   :  { %1554 = vmatprep.subr.mxu0 %v5124_v42  ;;  %1625 = vmatprep.subr.mxu1 %v6590_v27 }
 0x53a   :  { %1555 = vmatpush1.msra.mxu0 %v6591_v28  ;;  %1626 = vmatpush1.msra.mxu1 %v6592_v8 }
 0x53b   :  { %1556 = vmatprep.subr.mxu0 %v6593_v43  ;;  %1627 = vmatprep.subr.mxu1 %v6594_v44 }
 0x53c   :  { %1557 = vmatpush1.msra.mxu0 %v6595_v45  ;;  %1628 = vmatpush1.msra.mxu1 %v6596_v46 }
 0x53d   :  { %1558 = vmatprep.subr.mxu0 %v6597_v6  ;;  %1629 = vmatprep.subr.mxu1 %v6598_v7  ;;  %v6613_v6 = vld [vmem:[#allocation55_spill] sm:$0xff] }
 0x53e   :  { %1559 = vmatpush1.msra.mxu0 %v6599_v9  ;;  %1630 = vmatpush1.msra.mxu1 %v6600_v14  ;;  %v6610_v14 = vld [vmem:[#allocation16_spill] sm:$0xff] }
 0x53f   :  { %1560 = vmatprep.subr.mxu0 %v6601_v12  ;;  %1631 = vmatprep.subr.mxu1 %v6602_v13  ;;  %v6611_v12 = vld [vmem:[#allocation17_spill] sm:$0xff] }
 0x540   :  { %1561 = vmatpush1.msra.mxu0 %v6603_v10  ;;  %1632 = vmatpush1.msra.mxu1 %v6604_v53  ;;  %v6612_v10 = vld [vmem:[#allocation53_spill] sm:$0xff] }
 0x541   :  { %1562 = vmatprep.subr.mxu0 %v6605_v49  ;;  %1633 = vmatprep.subr.mxu1 %v6606_v50 }
 0x542   :  { %1563 = vmatpush1.msra.mxu0 %v6607_v54  ;;  %1596 = vmatprep.mubr.f32.mxu0 %v6608_v25  ;;  %v6614_v54 = vld [vmem:[#allocation54_spill] sm:$0xff] }
 0x543   :  { %1634 = vmatpush1.msra.mxu1 %v6609_v48  ;;  %1667 = vmatprep.mubr.f32.mxu1 %v6608_v25  ;;  %v6615_v25 = vld [vmem:[#allocation56_spill] sm:$0xff] }
 0x544   :  { %1703 = vmatprep.subr.mxu0 %v6610_v14  ;;  %1774 = vmatprep.subr.mxu1 %v6611_v12 }
 0x5e3   :  { %v1427_v13 = vpop.f32.mrf.mxu0  ;;  %v1498_v53 = vpop.f32.mrf.mxu1 }
 0x5e4   :  { %v1503_v9 = vadd.f32 %v1427_v13, %v6612_v10  ;;  %v1505_v46 = vadd.f32 %v1498_v53, %v6614_v54 }
 0x5e5   :  { %v1429_v7 = vpop.f32.mrf.mxu0  ;;  %v1500_v48 = vpop.f32.mrf.mxu1 }
 0x5e6   :  { %v1507_v49 = vmul.f32 0.5, %v1503_v9  ;;  %v1504_v50 = vadd.f32 %v1429_v7, %v6613_v6  ;;  %v1506_v44 = vadd.f32 %v1500_v48, %v6615_v25  ;;  %v1936_v25 = vld [vmem:[#allocation8 + $0x1e8] sm:$0xff]  ;;  %v1938_v48 = vld [vmem:[#allocation8 + $0x1f8] sm:$0xff] }
 0x5e8   :  { %4024 = vtanh.f32 %v1507_v49  ;;  %v1511_v45 = vmul.f32 0.5, %v1504_v50  ;;  %v1516_v14 = vmul.f32 0.5, %v1506_v44 }
 0x5ea   :  { %4026 = vtanh.f32 %v1511_v45 }
 0x5eb   :  { %4028 = vtanh.f32 %v1505_v46 }
 0x5ec   :  { %4030 = vtanh.f32 %v1516_v14  ;;  %v1935_v14 = vld [vmem:[#allocation8 + $0x1e0] sm:$0xff] }
 0x5f5   :  { %v4025_v43 = vpop.eup %4024 }
 0x5f6   :  { %v1509_v12 = vmul.f32 0.5, %v4025_v43 }
 0x5f7   :  { %v4027_v8 = vpop.eup %4026 }
 0x5f8   :  { %v1510_v28 = vadd.f32 0.5, %v1509_v12  ;;  %v1513_v13 = vmul.f32 0.5, %v4027_v8  ;;  %v4029_v10 = vpop.eup %4028  ;;  %v1937_v12 = vld [vmem:[#allocation8 + $0x1f0] sm:$0xff] }
 0x5f9   :  { %v4031_v45 = vpop.eup %4030 }
 0x5fa   :  { %v1514_v9 = vadd.f32 0.5, %v1513_v13  ;;  %v1521_v27 = vmul.f32 %v4029_v10, %v1510_v28  ;;  %v1518_v46 = vmul.f32 0.5, %v4031_v45  ;;  %v1932_v13 = vld [vmem:[#allocation8 + $0x1c8] sm:$0xff]  ;;  %v1934_v10 = vld [vmem:[#allocation8 + $0x1d8] sm:$0xff] }
 0x5fb   :  { %v1930_v45 = vld [vmem:[#allocation8 + $0x1b8] sm:$0xff] }
 0x5fc   :  { %v1520_v6 = vmul.f32 %v1514_v9, %v5193_v5  ;;  %v1519_v53 = vadd.f32 0.5, %v1518_v46  ;;  %v1931_v9 = vld [vmem:[#allocation8 + $0x1c0] sm:$0xff] }
 0x5fd   :  { %v1927_v46 = vld [vmem:[#allocation8 + $0x1a0] sm:$0xff] }
 0x5fe   :  { %v5267_v7 = vadd.f32 %v1521_v27, %v1520_v6  ;;  %v1933_v6 = vld [vmem:[#allocation8 + $0x1d0] sm:$0xff] }
 0x600   :  { %4032 = vtanh.f32 %v5267_v7 }
 0x60d   :  { %v4033_v49 = vpop.eup %4032 }
 0x60e   :  { %v1524_v44 = vmul.f32 %v4033_v49, %v1519_v53  ;;  %v1929_v53 = vld [vmem:[#allocation8 + $0x1b0] sm:$0xff]  ;;  %v1924_v49 = vld [vmem:[#allocation8 + $0x188] sm:$0xff] }
 0x610   :  { %1597 = vmatmul.mubr.f32.vlgmr.msra.gmra.mxu0 %v1524_v44  ;;  %1668 = vmatmul.mubr.f32.vlgmr.msra.gmra.mxu1 %v1524_v44  ;;  %v1926_v44 = vld [vmem:[#allocation8 + $0x198] sm:$0xff] }
 0x611   :  { %1704 = vmatpush1.msra.mxu0 %v4920_v55  ;;  %1775 = vmatpush1.msra.mxu1 %v4923_v20  ;;  %v6616_v55 = vld [vmem:[#allocation39_spill] sm:$0xff]  ;;  %v6617_v20 = vld [vmem:[#allocation38_spill] sm:$0xff] }
 0x612   :  { %1705 = vmatprep.subr.mxu0 %v4926_v57  ;;  %1776 = vmatprep.subr.mxu1 %v4929_v0  ;;  %v6618_v57 = vld [vmem:[#allocation40_spill] sm:$0xff]  ;;  %v6619_v0 = vld [vmem:[#allocation18_spill] sm:$0xff] }
 0x613   :  { %1706 = vmatpush1.msra.mxu0 %v4932_v2  ;;  %1777 = vmatpush1.msra.mxu1 %v4935_v29  ;;  %v6620_v2 = vld [vmem:[#allocation19_spill] sm:$0xff]  ;;  %v6621_v29 = vld [vmem:[#allocation20_spill] sm:$0xff] }
 0x614   :  { %1707 = vmatprep.subr.mxu0 %v4938_v4  ;;  %1778 = vmatprep.subr.mxu1 %v4941_v62  ;;  %v6622_v4 = vld [vmem:[#allocation21_spill] sm:$0xff]  ;;  %v6623_v62 = vld [vmem:[#allocation22_spill] sm:$0xff] }
 0x615   :  { %1708 = vmatpush1.msra.mxu0 %v4944_v61  ;;  %1779 = vmatpush1.msra.mxu1 %v4947_v47  ;;  %v6624_v61 = vld [vmem:[#allocation23_spill] sm:$0xff]  ;;  %v6625_v47 = vld [vmem:[#allocation24_spill] sm:$0xff] }
 0x616   :  { %1709 = vmatprep.subr.mxu0 %v4950_v1  ;;  %1780 = vmatprep.subr.mxu1 %v4953_v63  ;;  %v6626_v1 = vld [vmem:[#allocation25_spill] sm:$0xff]  ;;  %v6627_v63 = vld [vmem:[#allocation26_spill] sm:$0xff] }
 0x617   :  { %1710 = vmatpush1.msra.mxu0 %v4956_v11  ;;  %1781 = vmatpush1.msra.mxu1 %v4959_v38  ;;  %v6628_v11 = vld [vmem:[#allocation27_spill] sm:$0xff]  ;;  %v6629_v38 = vld [vmem:[#allocation28_spill] sm:$0xff] }
 0x618   :  { %1711 = vmatprep.subr.mxu0 %v4962_v56  ;;  %1782 = vmatprep.subr.mxu1 %v4965_v51  ;;  %v6630_v56 = vld [vmem:[#allocation29_spill] sm:$0xff]  ;;  %v6631_v51 = vld [vmem:[#allocation30_spill] sm:$0xff] }
 0x619   :  { %1712 = vmatpush1.msra.mxu0 %v4968_v3  ;;  %1783 = vmatpush1.msra.mxu1 %v4971_v60  ;;  %v6632_v3 = vld [vmem:[#allocation31_spill] sm:$0xff]  ;;  %v6633_v60 = vld [vmem:[#allocation32_spill] sm:$0xff] }
 0x61a   :  { %1713 = vmatprep.subr.mxu0 %v4974_v58  ;;  %1784 = vmatprep.subr.mxu1 %v4977_v59  ;;  %v6634_v58 = vmov 0.0   ;;  %v6635_v59 = vld [vmem:[#allocation33_spill] sm:$0xff] }
 0x61b   :  { %1714 = vmatpush1.msra.mxu0 %v5058_v15  ;;  %1785 = vmatpush1.msra.mxu1 %v5061_v16  ;;  %v6636_v16 = vld [vmem:[#allocation57_spill] sm:$0xff] }
 0x61c   :  { %1715 = vmatprep.subr.mxu0 %v5064_v17  ;;  %1786 = vmatprep.subr.mxu1 %v5067_v18 }
 0x61d   :  { %1716 = vmatpush1.msra.mxu0 %v5070_v19  ;;  %1787 = vmatpush1.msra.mxu1 %v5073_v21 }
 0x61e   :  { %1717 = vmatprep.subr.mxu0 %v5076_v22  ;;  %1788 = vmatprep.subr.mxu1 %v5079_v23  ;;  %v6637_v22 = vld [vmem:[#allocation59_spill] sm:$0xff] }
 0x61f   :  { %1718 = vmatpush1.msra.mxu0 %v5082_v24  ;;  %1789 = vmatpush1.msra.mxu1 %v5085_v26  ;;  %v6638_v24 = vld [vmem:[#allocation58_spill] sm:$0xff] }
 0x620   :  { %1719 = vmatprep.subr.mxu0 %v5088_v52  ;;  %1790 = vmatprep.subr.mxu1 %v5091_v30 }
 0x621   :  { %1720 = vmatpush1.msra.mxu0 %v5094_v31  ;;  %1791 = vmatpush1.msra.mxu1 %v5097_v32  ;;  %v6639_v31 = vld [vmem:[#allocation60_spill] sm:$0xff] }
 0x622   :  { %1721 = vmatprep.subr.mxu0 %v5100_v33  ;;  %1792 = vmatprep.subr.mxu1 %v5103_v34 }
 0x623   :  { %1722 = vmatpush1.msra.mxu0 %v5106_v35  ;;  %1793 = vmatpush1.msra.mxu1 %v5109_v36 }
 0x624   :  { %1723 = vmatprep.subr.mxu0 %v5112_v37  ;;  %1794 = vmatprep.subr.mxu1 %v5115_v39 }
 0x625   :  { %1724 = vmatpush1.msra.mxu0 %v5118_v40  ;;  %1795 = vmatpush1.msra.mxu1 %v5121_v41 }
 0x626   :  { %1725 = vmatprep.subr.mxu0 %v5124_v42  ;;  %1796 = vmatprep.subr.mxu1 %v6616_v55  ;;  %v1923_v55 = vld [vmem:[#allocation8 + $0x180] sm:$0xff] }
 0x627   :  { %1726 = vmatpush1.msra.mxu0 %v6617_v20  ;;  %1797 = vmatpush1.msra.mxu1 %v6618_v57  ;;  %v1925_v20 = vld [vmem:[#allocation8 + $0x190] sm:$0xff]  ;;  %v1920_v57 = vld [vmem:[#allocation8 + $0x168] sm:$0xff] }
 0x628   :  { %1727 = vmatprep.subr.mxu0 %v6619_v0  ;;  %1798 = vmatprep.subr.mxu1 %v6620_v2  ;;  %v1922_v0 = vld [vmem:[#allocation8 + $0x178] sm:$0xff]  ;;  %v1919_v2 = vld [vmem:[#allocation8 + $0x160] sm:$0xff] }
 0x629   :  { %1728 = vmatpush1.msra.mxu0 %v6621_v29  ;;  %1799 = vmatpush1.msra.mxu1 %v6622_v4  ;;  %v1921_v29 = vld [vmem:[#allocation8 + $0x170] sm:$0xff]  ;;  %v1916_v4 = vld [vmem:[#allocation8 + $0x148] sm:$0xff] }
 0x62a   :  { %1729 = vmatprep.subr.mxu0 %v6623_v62  ;;  %1800 = vmatprep.subr.mxu1 %v6624_v61  ;;  %v1918_v62 = vld [vmem:[#allocation8 + $0x158] sm:$0xff]  ;;  %v1915_v61 = vld [vmem:[#allocation8 + $0x140] sm:$0xff] }
 0x62b   :  { %1730 = vmatpush1.msra.mxu0 %v6625_v47  ;;  %1801 = vmatpush1.msra.mxu1 %v6626_v1  ;;  %v1917_v47 = vld [vmem:[#allocation8 + $0x150] sm:$0xff]  ;;  %v1912_v1 = vld [vmem:[#allocation8 + $0x128] sm:$0xff] }
 0x62c   :  { %1731 = vmatprep.subr.mxu0 %v6627_v63  ;;  %1802 = vmatprep.subr.mxu1 %v6628_v11  ;;  %v1914_v63 = vld [vmem:[#allocation8 + $0x138] sm:$0xff]  ;;  %v1911_v11 = vld [vmem:[#allocation8 + $0x120] sm:$0xff] }
 0x62d   :  { %1732 = vmatpush1.msra.mxu0 %v6629_v38  ;;  %1803 = vmatpush1.msra.mxu1 %v6630_v56  ;;  %v1913_v38 = vld [vmem:[#allocation8 + $0x130] sm:$0xff]  ;;  %v1908_v56 = vld [vmem:[#allocation8 + $0x108] sm:$0xff] }
 0x62e   :  { %1733 = vmatprep.subr.mxu0 %v6631_v51  ;;  %1804 = vmatprep.subr.mxu1 %v6632_v3  ;;  %v1910_v51 = vld [vmem:[#allocation8 + $0x118] sm:$0xff]  ;;  %v1907_v3 = vld [vmem:[#allocation8 + $0x100] sm:$0xff] }
 0x62f   :  { %1734 = vmatpush1.msra.mxu0 %v6633_v60  ;;  %1767 = vmatprep.mubr.f32.mxu0 %v6634_v58  ;;  %v1909_v60 = vld [vmem:[#allocation8 + $0x110] sm:$0xff] }
 0x630   :  { %1805 = vmatpush1.msra.mxu1 %v6635_v59  ;;  %1838 = vmatprep.mubr.f32.mxu1 %v6634_v58  ;;  %v1904_v59 = vld [vmem:[#allocation8 + $0xe8] sm:$0xff] }
 0x631   :  { %1961 = vmatprep.subr.mxu0 %v1936_v25  ;;  %2032 = vmatprep.subr.mxu1 %v1938_v48  ;;  %v1875_v25 = vld [vmem:[#allocation8] sm:$0xff]  ;;  %v1877_v48 = vld [vmem:[#allocation8 + $0x10] sm:$0xff] }
 0x6d0   :  { %v1598_v15 = vpop.f32.mrf.mxu0  ;;  %v1669_v18 = vpop.f32.mrf.mxu1 }
 0x6d1   :  { %v1674_v17 = vadd.f32 %v1598_v15, %v6636_v16  ;;  %v1676_v26 = vadd.f32 %v1669_v18, %v6638_v24  ;;  %v1906_v15 = vld [vmem:[#allocation8 + $0xf8] sm:$0xff]  ;;  %v1903_v16 = vld [vmem:[#allocation8 + $0xe0] sm:$0xff]  ;;  %v1900_v18 = vld [vmem:[#allocation8 + $0xc8] sm:$0xff] }
 0x6d2   :  { %v1600_v19 = vpop.f32.mrf.mxu0  ;;  %v1671_v30 = vpop.f32.mrf.mxu1  ;;  %v1898_v24 = vld [vmem:[#allocation8 + $0xb8] sm:$0xff] }
 0x6d3   :  { %v1678_v21 = vmul.f32 0.5, %v1674_v17  ;;  %v1675_v23 = vadd.f32 %v1600_v19, %v6637_v22  ;;  %v1677_v32 = vadd.f32 %v1671_v30, %v6639_v31  ;;  %v1905_v17 = vld [vmem:[#allocation8 + $0xf0] sm:$0xff]  ;;  %v1902_v19 = vld [vmem:[#allocation8 + $0xd8] sm:$0xff]  ;;  %v1892_v30 = vld [vmem:[#allocation8 + $0x88] sm:$0xff] }
 0x6d4   :  { %v1901_v22 = vld [vmem:[#allocation8 + $0xd0] sm:$0xff]  ;;  %v1894_v31 = vld [vmem:[#allocation8 + $0x98] sm:$0xff] }
 0x6d5   :  { %4034 = vtanh.f32 %v1678_v21  ;;  %v1682_v52 = vmul.f32 0.5, %v1675_v23  ;;  %v1687_v33 = vmul.f32 0.5, %v1677_v32  ;;  %v1899_v21 = vld [vmem:[#allocation8 + $0xc0] sm:$0xff]  ;;  %v1896_v23 = vld [vmem:[#allocation8 + $0xa8] sm:$0xff] }
 0x6d6   :  { %v1891_v32 = vld [vmem:[#allocation8 + $0x80] sm:$0xff] }
 0x6d7   :  { %4036 = vtanh.f32 %v1682_v52  ;;  %v1897_v52 = vld [vmem:[#allocation8 + $0xb0] sm:$0xff] }
 0x6d8   :  { %4038 = vtanh.f32 %v1676_v26  ;;  %v1895_v26 = vld [vmem:[#allocation8 + $0xa0] sm:$0xff] }
 0x6d9   :  { %4040 = vtanh.f32 %v1687_v33  ;;  %v1893_v33 = vld [vmem:[#allocation8 + $0x90] sm:$0xff] }
 0x6e2   :  { %v4035_v34 = vpop.eup %4034 }
 0x6e3   :  { %v1680_v35 = vmul.f32 0.5, %v4035_v34  ;;  %v1888_v34 = vld [vmem:[#allocation8 + $0x68] sm:$0xff] }
 0x6e4   :  { %v4037_v36 = vpop.eup %4036 }
 0x6e5   :  { %v1681_v37 = vadd.f32 0.5, %v1680_v35  ;;  %v1684_v39 = vmul.f32 0.5, %v4037_v36  ;;  %v4039_v40 = vpop.eup %4038  ;;  %v1890_v35 = vld [vmem:[#allocation8 + $0x78] sm:$0xff]  ;;  %v1887_v36 = vld [vmem:[#allocation8 + $0x60] sm:$0xff] }
 0x6e6   :  { %v4041_v28 = vpop.eup %4040 }
 0x6e7   :  { %v1685_v41 = vadd.f32 0.5, %v1684_v39  ;;  %v1692_v42 = vmul.f32 %v4039_v40, %v1681_v37  ;;  %v1689_v8 = vmul.f32 0.5, %v4041_v28  ;;  %v1889_v37 = vld [vmem:[#allocation8 + $0x70] sm:$0xff]  ;;  %v1884_v39 = vld [vmem:[#allocation8 + $0x48] sm:$0xff]  ;;  %v1886_v40 = vld [vmem:[#allocation8 + $0x58] sm:$0xff] }
 0x6e8   :  { %v1882_v28 = vld [vmem:[#allocation8 + $0x38] sm:$0xff] }
 0x6e9   :  { %v1691_v5 = vmul.f32 %v1685_v41, %v5267_v7  ;;  %v1690_v43 = vadd.f32 0.5, %v1689_v8  ;;  %v1928_v7 = vld [vmem:[#allocation8 + $0x1a8] sm:$0xff]  ;;  %v1883_v41 = vld [vmem:[#allocation8 + $0x40] sm:$0xff] }
 0x6ea   :  { %v1879_v8 = vld [vmem:[#allocation8 + $0x20] sm:$0xff] }
 0x6eb   :  { %v5339_v27 = vadd.f32 %v1692_v42, %v1691_v5  ;;  %v1885_v42 = vld [vmem:[#allocation8 + $0x50] sm:$0xff]  ;;  %v1880_v5 = vld [vmem:[#allocation8 + $0x28] sm:$0xff] }
 0x6ed   :  { %4042 = vtanh.f32 %v5339_v27 }
 0x6fa   :  { %v4043_v50 = vpop.eup %4042 }
 0x6fb   :  { %v1695_v54 = vmul.f32 %v4043_v50, %v1690_v43  ;;  %v1881_v43 = vld [vmem:[#allocation8 + $0x30] sm:$0xff]  ;;  %v1876_v50 = vld [vmem:[#allocation8 + $0x8] sm:$0xff] }
 0x6fd   :  { %1768 = vmatmul.mubr.f32.vlgmr.msra.gmra.mxu0 %v1695_v54  ;;  %1839 = vmatmul.mubr.f32.vlgmr.msra.gmra.mxu1 %v1695_v54  ;;  %v1878_v54 = vld [vmem:[#allocation8 + $0x18] sm:$0xff] }
 0x6fe   :  { %2025 = vmatprep.mubr.f32.mxu0 %v6634_v58  ;;  %2096 = vmatprep.mubr.f32.mxu1 %v6634_v58 }
 0x6ff   :  { %1962 = vmatpush1.msra.mxu0 %v1935_v14  ;;  %2033 = vmatpush1.msra.mxu1 %v1937_v12  ;;  %v5344_v14 = vld [vmem:[#allocation9 + $0x1e8] sm:$0xff]  ;;  %v5346_v12 = vld [vmem:[#allocation9 + $0x1f8] sm:$0xff] }
 0x700   :  { %1963 = vmatprep.subr.mxu0 %v1932_v13  ;;  %2034 = vmatprep.subr.mxu1 %v1934_v10  ;;  %6640 = vst [vmem:[#allocation34_spill] sm:$0xff] %v5344_v14  ;;  %6641 = vst [vmem:[#allocation35_spill] sm:$0xff] %v5346_v12  ;;  %v6642_v10 = vld [vmem:[#allocation61_spill] sm:$0xff] }
 0x701   :  { %1964 = vmatpush1.msra.mxu0 %v1931_v9  ;;  %2035 = vmatpush1.msra.mxu1 %v1933_v6 }
 0x702   :  { %1965 = vmatprep.subr.mxu0 %v1928_v7  ;;  %2036 = vmatprep.subr.mxu1 %v1930_v45 }
 0x703   :  { %1966 = vmatpush1.msra.mxu0 %v1927_v46  ;;  %2037 = vmatpush1.msra.mxu1 %v1929_v53  ;;  %v6643_v46 = vld [vmem:[#allocation63_spill] sm:$0xff] }
 0x704   :  { %1967 = vmatprep.subr.mxu0 %v1924_v49  ;;  %2038 = vmatprep.subr.mxu1 %v1926_v44  ;;  %v6644_v49 = vld [vmem:[#allocation62_spill] sm:$0xff] }
 0x705   :  { %1968 = vmatpush1.msra.mxu0 %v1923_v55  ;;  %2039 = vmatpush1.msra.mxu1 %v1925_v20 }
 0x706   :  { %1969 = vmatprep.subr.mxu0 %v1920_v57  ;;  %2040 = vmatprep.subr.mxu1 %v1922_v0  ;;  %v6645_v57 = vld [vmem:[#allocation64_spill] sm:$0xff] }
 0x707   :  { %1970 = vmatpush1.msra.mxu0 %v1919_v2  ;;  %2041 = vmatpush1.msra.mxu1 %v1921_v29 }
 0x708   :  { %1971 = vmatprep.subr.mxu0 %v1916_v4  ;;  %2042 = vmatprep.subr.mxu1 %v1918_v62 }
 0x709   :  { %1972 = vmatpush1.msra.mxu0 %v1915_v61  ;;  %2043 = vmatpush1.msra.mxu1 %v1917_v47 }
 0x70a   :  { %1973 = vmatprep.subr.mxu0 %v1912_v1  ;;  %2044 = vmatprep.subr.mxu1 %v1914_v63 }
 0x70b   :  { %1974 = vmatpush1.msra.mxu0 %v1911_v11  ;;  %2045 = vmatpush1.msra.mxu1 %v1913_v38 }
 0x70c   :  { %1975 = vmatprep.subr.mxu0 %v1908_v56  ;;  %2046 = vmatprep.subr.mxu1 %v1910_v51 }
 0x70d   :  { %1976 = vmatpush1.msra.mxu0 %v1907_v3  ;;  %2047 = vmatpush1.msra.mxu1 %v1909_v60 }
 0x70e   :  { %1977 = vmatprep.subr.mxu0 %v1904_v59  ;;  %2048 = vmatprep.subr.mxu1 %v1906_v15 }
 0x70f   :  { %1978 = vmatpush1.msra.mxu0 %v1903_v16  ;;  %2049 = vmatpush1.msra.mxu1 %v1905_v17  ;;  %v5355_v16 = vld [vmem:[#allocation9 + $0x1e0] sm:$0xff]  ;;  %v5357_v17 = vld [vmem:[#allocation9 + $0x1f0] sm:$0xff] }
 0x710   :  { %1979 = vmatprep.subr.mxu0 %v1900_v18  ;;  %2050 = vmatprep.subr.mxu1 %v1902_v19  ;;  %v5359_v18 = vld [vmem:[#allocation9 + $0x1c8] sm:$0xff]  ;;  %v5361_v19 = vld [vmem:[#allocation9 + $0x1d8] sm:$0xff] }
 0x711   :  { %1980 = vmatpush1.msra.mxu0 %v1899_v21  ;;  %2051 = vmatpush1.msra.mxu1 %v1901_v22  ;;  %v5389_v21 = vld [vmem:[#allocation9 + $0x1d0] sm:$0xff]  ;;  %v5393_v22 = vld [vmem:[#allocation9 + $0x1a8] sm:$0xff] }
 0x712   :  { %1981 = vmatprep.subr.mxu0 %v1896_v23  ;;  %2052 = vmatprep.subr.mxu1 %v1898_v24  ;;  %v5395_v23 = vld [vmem:[#allocation9 + $0x1b8] sm:$0xff]  ;;  %v5399_v24 = vld [vmem:[#allocation9 + $0x1a0] sm:$0xff] }
 0x713   :  { %1982 = vmatpush1.msra.mxu0 %v1895_v26  ;;  %2053 = vmatpush1.msra.mxu1 %v1897_v52  ;;  %v5401_v26 = vld [vmem:[#allocation9 + $0x1b0] sm:$0xff]  ;;  %v5405_v52 = vld [vmem:[#allocation9 + $0x188] sm:$0xff] }
 0x714   :  { %1983 = vmatprep.subr.mxu0 %v1892_v30  ;;  %2054 = vmatprep.subr.mxu1 %v1894_v31  ;;  %v5407_v30 = vld [vmem:[#allocation9 + $0x198] sm:$0xff]  ;;  %v5411_v31 = vld [vmem:[#allocation9 + $0x180] sm:$0xff] }
 0x715   :  { %1984 = vmatpush1.msra.mxu0 %v1891_v32  ;;  %2055 = vmatpush1.msra.mxu1 %v1893_v33  ;;  %v5413_v32 = vld [vmem:[#allocation9 + $0x190] sm:$0xff]  ;;  %v5417_v33 = vld [vmem:[#allocation9 + $0x168] sm:$0xff] }
 0x716   :  { %1985 = vmatprep.subr.mxu0 %v1888_v34  ;;  %2056 = vmatprep.subr.mxu1 %v1890_v35  ;;  %v5419_v34 = vld [vmem:[#allocation9 + $0x178] sm:$0xff]  ;;  %v5423_v35 = vld [vmem:[#allocation9 + $0x160] sm:$0xff] }
 0x717   :  { %1986 = vmatpush1.msra.mxu0 %v1887_v36  ;;  %2057 = vmatpush1.msra.mxu1 %v1889_v37  ;;  %v5425_v36 = vld [vmem:[#allocation9 + $0x170] sm:$0xff]  ;;  %v5429_v37 = vld [vmem:[#allocation9 + $0x148] sm:$0xff] }
 0x718   :  { %1987 = vmatprep.subr.mxu0 %v1884_v39  ;;  %2058 = vmatprep.subr.mxu1 %v1886_v40  ;;  %v5431_v39 = vld [vmem:[#allocation9 + $0x158] sm:$0xff]  ;;  %v5435_v40 = vld [vmem:[#allocation9 + $0x140] sm:$0xff] }
 0x719   :  { %1988 = vmatpush1.msra.mxu0 %v1883_v41  ;;  %2059 = vmatpush1.msra.mxu1 %v1885_v42  ;;  %v5437_v41 = vld [vmem:[#allocation9 + $0x150] sm:$0xff]  ;;  %v5441_v42 = vld [vmem:[#allocation9 + $0x128] sm:$0xff] }
 0x71a   :  { %1989 = vmatprep.subr.mxu0 %v1880_v5  ;;  %2060 = vmatprep.subr.mxu1 %v1882_v28  ;;  %v5443_v5 = vld [vmem:[#allocation9 + $0x138] sm:$0xff]  ;;  %v5447_v28 = vld [vmem:[#allocation9 + $0x120] sm:$0xff] }
 0x71b   :  { %1990 = vmatpush1.msra.mxu0 %v1879_v8  ;;  %2061 = vmatpush1.msra.mxu1 %v1881_v43  ;;  %v5449_v8 = vld [vmem:[#allocation9 + $0x130] sm:$0xff]  ;;  %v5453_v43 = vld [vmem:[#allocation9 + $0x108] sm:$0xff] }
 0x71c   :  { %1991 = vmatprep.subr.mxu0 %v1876_v50  ;;  %2062 = vmatprep.subr.mxu1 %v1878_v54  ;;  %v5455_v50 = vld [vmem:[#allocation9 + $0x118] sm:$0xff]  ;;  %v5459_v54 = vld [vmem:[#allocation9 + $0x100] sm:$0xff] }
 0x71d   :  { %1992 = vmatpush1.msra.mxu0 %v1875_v25  ;;  %2063 = vmatpush1.msra.mxu1 %v1877_v48  ;;  %v5461_v25 = vld [vmem:[#allocation9 + $0x110] sm:$0xff]  ;;  %v5465_v48 = vld [vmem:[#allocation9 + $0xe8] sm:$0xff] }
 0x71e   :  { %2167 = vmatprep.subr.mxu0 %v5344_v14  ;;  %2238 = vmatprep.subr.mxu1 %v5346_v12 }
 0x7bd   :  { %v1769_v13 = vpop.f32.mrf.mxu0  ;;  %v1840_v6 = vpop.f32.mrf.mxu1 }
 0x7be   :  { %v1845_v9 = vadd.f32 %v1769_v13, %v6642_v10  ;;  %v1847_v44 = vadd.f32 %v1840_v6, %v6644_v49  ;;  %v5467_v13 = vld [vmem:[#allocation9 + $0xf8] sm:$0xff]  ;;  %v5471_v10 = vld [vmem:[#allocation9 + $0xe0] sm:$0xff]  ;;  %v5477_v6 = vld [vmem:[#allocation9 + $0xc8] sm:$0xff] }
 0x7bf   :  { %v1771_v7 = vpop.f32.mrf.mxu0  ;;  %v1842_v20 = vpop.f32.mrf.mxu1  ;;  %v5491_v49 = vld [vmem:[#allocation9 + $0xb8] sm:$0xff] }
 0x7c0   :  { %v1849_v45 = vmul.f32 0.5, %v1845_v9  ;;  %v1846_v53 = vadd.f32 %v1771_v7, %v6643_v46  ;;  %v1848_v0 = vadd.f32 %v1842_v20, %v6645_v57  ;;  %v5473_v9 = vld [vmem:[#allocation9 + $0xf0] sm:$0xff]  ;;  %v5479_v7 = vld [vmem:[#allocation9 + $0xd8] sm:$0xff]  ;;  %v5501_v20 = vld [vmem:[#allocation9 + $0x88] sm:$0xff] }
 0x7c1   :  { %v5485_v46 = vld [vmem:[#allocation9 + $0xd0] sm:$0xff]  ;;  %v5503_v57 = vld [vmem:[#allocation9 + $0x98] sm:$0xff] }
 0x7c2   :  { %4044 = vtanh.f32 %v1849_v45  ;;  %v1853_v55 = vmul.f32 0.5, %v1846_v53  ;;  %v1858_v2 = vmul.f32 0.5, %v1848_v0  ;;  %v5483_v45 = vld [vmem:[#allocation9 + $0xc0] sm:$0xff]  ;;  %v5489_v53 = vld [vmem:[#allocation9 + $0xa8] sm:$0xff] }
 0x7c3   :  { %v5507_v0 = vld [vmem:[#allocation9 + $0x80] sm:$0xff] }
 0x7c4   :  { %4046 = vtanh.f32 %v1853_v55  ;;  %v5497_v55 = vld [vmem:[#allocation9 + $0xb0] sm:$0xff]  ;;  %6647 = vst [vmem:[#allocation14_spill] sm:$0xff] %v5507_v0 }
 0x7c5   :  { %4048 = vtanh.f32 %v1847_v44  ;;  %v5495_v44 = vld [vmem:[#allocation9 + $0xa0] sm:$0xff] }
 0x7c6   :  { %4050 = vtanh.f32 %v1858_v2  ;;  %6646 = vst [vmem:[#allocation36_spill] sm:$0xff] %v5495_v44  ;;  %v5509_v2 = vld [vmem:[#allocation9 + $0x90] sm:$0xff] }
 0x7c7   :  { %6648 = vst [vmem:[#allocation15_spill] sm:$0xff] %v5509_v2 }
 0x7cf   :  { %v4045_v29 = vpop.eup %4044 }
 0x7d0   :  { %v1851_v4 = vmul.f32 0.5, %v4045_v29  ;;  %v5513_v29 = vld [vmem:[#allocation9 + $0x68] sm:$0xff] }
 0x7d1   :  { %v4047_v62 = vpop.eup %4046  ;;  %6649 = vst [vmem:[#allocation41_spill] sm:$0xff] %v5513_v29 }
 0x7d2   :  { %v1852_v61 = vadd.f32 0.5, %v1851_v4  ;;  %v1855_v47 = vmul.f32 0.5, %v4047_v62  ;;  %v4049_v1 = vpop.eup %4048  ;;  %v5515_v4 = vld [vmem:[#allocation9 + $0x78] sm:$0xff]  ;;  %v5519_v62 = vld [vmem:[#allocation9 + $0x60] sm:$0xff] }
 0x7d3   :  { %v4051_v51 = vpop.eup %4050  ;;  %6650 = vst [vmem:[#allocation43_spill] sm:$0xff] %v5515_v4  ;;  %6651 = vst [vmem:[#allocation42_spill] sm:$0xff] %v5519_v62 }
 0x7d4   :  { %v1856_v63 = vadd.f32 0.5, %v1855_v47  ;;  %v1863_v11 = vmul.f32 %v4049_v1, %v1852_v61  ;;  %v1860_v3 = vmul.f32 0.5, %v4051_v51  ;;  %v5521_v61 = vld [vmem:[#allocation9 + $0x70] sm:$0xff]  ;;  %v5525_v47 = vld [vmem:[#allocation9 + $0x48] sm:$0xff]  ;;  %v5527_v1 = vld [vmem:[#allocation9 + $0x58] sm:$0xff] }
 0x7d5   :  { %6652 = vst [vmem:[#allocation44_spill] sm:$0xff] %v5521_v61  ;;  %6653 = vst [vmem:[#allocation45_spill] sm:$0xff] %v5525_v47  ;;  %v5543_v51 = vld [vmem:[#allocation9 + $0x20] sm:$0xff] }
 0x7d6   :  { %v1862_v38 = vmul.f32 %v1856_v63, %v5339_v27  ;;  %v1861_v60 = vadd.f32 0.5, %v1860_v3  ;;  %v5387_v27 = vld [vmem:[#allocation9 + $0x1c0] sm:$0xff]  ;;  %6654 = vst [vmem:[#allocation47_spill] sm:$0xff] %v5527_v1  ;;  %6659 = vst [vmem:[#allocation50_spill] sm:$0xff] %v5543_v51  ;;  %v5545_v3 = vld [vmem:[#allocation9 + $0x30] sm:$0xff] }
 0x7d7   :  { %v5531_v63 = vld [vmem:[#allocation9 + $0x40] sm:$0xff]  ;;  %6660 = vst [vmem:[#allocation52_spill] sm:$0xff] %v5545_v3 }
 0x7d8   :  { %v1864_v56 = vadd.f32 %v1863_v11, %v1862_v38  ;;  %6655 = vst [vmem:[#allocation46_spill] sm:$0xff] %v5531_v63  ;;  %v5533_v11 = vld [vmem:[#allocation9 + $0x50] sm:$0xff]  ;;  %v5537_v38 = vld [vmem:[#allocation9 + $0x28] sm:$0xff] }
 0x7d9   :  { %6656 = vst [vmem:[#allocation48_spill] sm:$0xff] %v5533_v11  ;;  %6657 = vst [vmem:[#allocation49_spill] sm:$0xff] %v5537_v38 }
 0x7da   :  { %4052 = vtanh.f32 %v1864_v56  ;;  %v5539_v56 = vld [vmem:[#allocation9 + $0x38] sm:$0xff] }
 0x7db   :  { %6658 = vst [vmem:[#allocation51_spill] sm:$0xff] %v5539_v56 }
 0x7e7   :  { %v4053_v59 = vpop.eup %4052 }
 0x7e8   :  { %v1866_v15 = vmul.f32 %v4053_v59, %v1861_v60  ;;  %v5549_v60 = vld [vmem:[#allocation9 + $0x8] sm:$0xff]  ;;  %v5551_v59 = vld [vmem:[#allocation9 + $0x18] sm:$0xff] }
 0x7e9   :  { %6661 = vst [vmem:[#allocation16_spill] sm:$0xff] %v5549_v60  ;;  %6662 = vst [vmem:[#allocation17_spill] sm:$0xff] %v5551_v59 }
 0x7ea   :  { %1867 = vst [vmem:[%s6265_s7] sm:$0xff] %v1866_v15  ;;  %1868 = vst [vmem:[%s6265_s7 + $0x8] sm:$0xff] %v1866_v15  ;;  %2026 = vmatmul.mubr.f32.vlgmr.msra.gmra.mxu0 %v1866_v15  ;;  %2097 = vmatmul.mubr.f32.vlgmr.msra.gmra.mxu1 %v1866_v15 }
 0x7eb   :  { %1869 = vst [vmem:[%s6265_s7 + $0x10] sm:$0xff] %v1866_v15  ;;  %1870 = vst [vmem:[%s6265_s7 + $0x18] sm:$0xff] %v1866_v15  ;;  %2168 = vmatpush1.msra.mxu0 %v5355_v16  ;;  %2239 = vmatpush1.msra.mxu1 %v5357_v17 }
 0x7ec   :  { %1871 = vst [vmem:[%s6265_s7 + $0x20] sm:$0xff] %v1866_v15  ;;  %1872 = vst [vmem:[%s6265_s7 + $0x28] sm:$0xff] %v1866_v15  ;;  %2169 = vmatprep.subr.mxu0 %v5359_v18  ;;  %2240 = vmatprep.subr.mxu1 %v5361_v19 }
 0x7ed   :  { %1873 = vst [vmem:[%s6265_s7 + $0x30] sm:$0xff] %v1866_v15  ;;  %1874 = vst [vmem:[%s6265_s7 + $0x38] sm:$0xff] %v1866_v15  ;;  %2170 = vmatpush1.msra.mxu0 %v5387_v27  ;;  %2241 = vmatpush1.msra.mxu1 %v5389_v21  ;;  %v5555_v15 = vld [vmem:[#allocation9] sm:$0xff] }
 0x7ee   :  { %2171 = vmatprep.subr.mxu0 %v5393_v22  ;;  %2242 = vmatprep.subr.mxu1 %v5395_v23  ;;  %6663 = vst [vmem:[#allocation53_spill] sm:$0xff] %v5555_v15 }
 0x7ef   :  { %2172 = vmatpush1.msra.mxu0 %v5399_v24  ;;  %2243 = vmatpush1.msra.mxu1 %v5401_v26 }
 0x7f0   :  { %2173 = vmatprep.subr.mxu0 %v5405_v52  ;;  %2244 = vmatprep.subr.mxu1 %v5407_v30 }
 0x7f1   :  { %2174 = vmatpush1.msra.mxu0 %v5411_v31  ;;  %2245 = vmatpush1.msra.mxu1 %v5413_v32 }
 0x7f2   :  { %2175 = vmatprep.subr.mxu0 %v5417_v33  ;;  %2246 = vmatprep.subr.mxu1 %v5419_v34 }
 0x7f3   :  { %2176 = vmatpush1.msra.mxu0 %v5423_v35  ;;  %2247 = vmatpush1.msra.mxu1 %v5425_v36 }
 0x7f4   :  { %2177 = vmatprep.subr.mxu0 %v5429_v37  ;;  %2248 = vmatprep.subr.mxu1 %v5431_v39 }
 0x7f5   :  { %2178 = vmatpush1.msra.mxu0 %v5435_v40  ;;  %2249 = vmatpush1.msra.mxu1 %v5437_v41 }
 0x7f6   :  { %2179 = vmatprep.subr.mxu0 %v5441_v42  ;;  %2250 = vmatprep.subr.mxu1 %v5443_v5 }
 0x7f7   :  { %2180 = vmatpush1.msra.mxu0 %v5447_v28  ;;  %2251 = vmatpush1.msra.mxu1 %v5449_v8 }
 0x7f8   :  { %2181 = vmatprep.subr.mxu0 %v5453_v43  ;;  %2252 = vmatprep.subr.mxu1 %v5455_v50 }
 0x7f9   :  { %2182 = vmatpush1.msra.mxu0 %v5459_v54  ;;  %2253 = vmatpush1.msra.mxu1 %v5461_v25 }
 0x7fa   :  { %2183 = vmatprep.subr.mxu0 %v5465_v48  ;;  %2254 = vmatprep.subr.mxu1 %v5467_v13 }
 0x7fb   :  { %2184 = vmatpush1.msra.mxu0 %v5471_v10  ;;  %2255 = vmatpush1.msra.mxu1 %v5473_v9 }
 0x7fc   :  { %2185 = vmatprep.subr.mxu0 %v5477_v6  ;;  %2256 = vmatprep.subr.mxu1 %v5479_v7 }
 0x7fd   :  { %2186 = vmatpush1.msra.mxu0 %v5483_v45  ;;  %2257 = vmatpush1.msra.mxu1 %v5485_v46 }
 0x7fe   :  { %2187 = vmatprep.subr.mxu0 %v5489_v53  ;;  %2258 = vmatprep.subr.mxu1 %v5491_v49 }
 0x7ff   :  { %2188 = vmatpush1.msra.mxu0 %v5495_v44  ;;  %2259 = vmatpush1.msra.mxu1 %v5497_v55 }
 0x800   :  { %2189 = vmatprep.subr.mxu0 %v5501_v20  ;;  %2260 = vmatprep.subr.mxu1 %v5503_v57 }
 0x801   :  { %2190 = vmatpush1.msra.mxu0 %v5507_v0  ;;  %2261 = vmatpush1.msra.mxu1 %v5509_v2 }
 0x802   :  { %2191 = vmatprep.subr.mxu0 %v5513_v29  ;;  %2262 = vmatprep.subr.mxu1 %v5515_v4 }
 0x803   :  { %2192 = vmatpush1.msra.mxu0 %v5519_v62  ;;  %2263 = vmatpush1.msra.mxu1 %v5521_v61 }
 0x804   :  { %2193 = vmatprep.subr.mxu0 %v5525_v47  ;;  %2264 = vmatprep.subr.mxu1 %v5527_v1  ;;  %v5559_v1 = vld [vmem:[#allocation9 + $0x10] sm:$0xff] }
 0x805   :  { %2194 = vmatpush1.msra.mxu0 %v5531_v63  ;;  %2265 = vmatpush1.msra.mxu1 %v5533_v11  ;;  %6664 = vst [vmem:[#allocation55_spill] sm:$0xff] %v5559_v1 }
 0x806   :  { %2195 = vmatprep.subr.mxu0 %v5537_v38  ;;  %2266 = vmatprep.subr.mxu1 %v5539_v56 }
 0x807   :  { %2196 = vmatpush1.msra.mxu0 %v5543_v51  ;;  %2267 = vmatpush1.msra.mxu1 %v5545_v3 }
 0x808   :  { %2197 = vmatprep.subr.mxu0 %v5549_v60  ;;  %2268 = vmatprep.subr.mxu1 %v5551_v59 }
 0x809   :  { %2198 = vmatpush1.msra.mxu0 %v5555_v15  ;;  %2231 = vmatprep.mubr.f32.mxu0 %v6634_v58 }
 0x80a   :  { %2269 = vmatpush1.msra.mxu1 %v5559_v1  ;;  %2302 = vmatprep.mubr.f32.mxu1 %v6634_v58 }
 0x80b   :  { %2232 = vmatmul.mubr.f32.vlgmr.msra.gmra.mxu0 %v6634_v58  ;;  %2303 = vmatmul.mubr.f32.vlgmr.msra.gmra.mxu1 %v6634_v58 }
 0x80c   :  { %2396 = vmatprep.subr.mxu0 %v5344_v14  ;;  %2467 = vmatprep.subr.mxu1 %v5346_v12 }
 0x80d   :  { %2397 = vmatpush1.msra.mxu0 %v5355_v16  ;;  %2468 = vmatpush1.msra.mxu1 %v5357_v17 }
 0x80e   :  { %2398 = vmatprep.subr.mxu0 %v5359_v18  ;;  %2469 = vmatprep.subr.mxu1 %v5361_v19 }
 0x80f   :  { %2399 = vmatpush1.msra.mxu0 %v5387_v27  ;;  %2470 = vmatpush1.msra.mxu1 %v5389_v21 }
 0x810   :  { %2400 = vmatprep.subr.mxu0 %v5393_v22  ;;  %2471 = vmatprep.subr.mxu1 %v5395_v23 }
 0x811   :  { %2401 = vmatpush1.msra.mxu0 %v5399_v24  ;;  %2472 = vmatpush1.msra.mxu1 %v5401_v26 }
 0x812   :  { %2402 = vmatprep.subr.mxu0 %v5405_v52  ;;  %2473 = vmatprep.subr.mxu1 %v5407_v30 }
 0x813   :  { %2403 = vmatpush1.msra.mxu0 %v5411_v31  ;;  %2474 = vmatpush1.msra.mxu1 %v5413_v32 }
 0x814   :  { %2404 = vmatprep.subr.mxu0 %v5417_v33  ;;  %2475 = vmatprep.subr.mxu1 %v5419_v34 }
 0x815   :  { %2405 = vmatpush1.msra.mxu0 %v5423_v35  ;;  %2476 = vmatpush1.msra.mxu1 %v5425_v36 }
 0x816   :  { %2406 = vmatprep.subr.mxu0 %v5429_v37  ;;  %2477 = vmatprep.subr.mxu1 %v5431_v39 }
 0x817   :  { %2407 = vmatpush1.msra.mxu0 %v5435_v40  ;;  %2478 = vmatpush1.msra.mxu1 %v5437_v41 }
 0x818   :  { %2408 = vmatprep.subr.mxu0 %v5441_v42  ;;  %2479 = vmatprep.subr.mxu1 %v5443_v5 }
 0x819   :  { %2409 = vmatpush1.msra.mxu0 %v5447_v28  ;;  %2480 = vmatpush1.msra.mxu1 %v5449_v8 }
 0x81a   :  { %2410 = vmatprep.subr.mxu0 %v5453_v43  ;;  %2481 = vmatprep.subr.mxu1 %v5455_v50 }
 0x81b   :  { %2411 = vmatpush1.msra.mxu0 %v5459_v54  ;;  %2482 = vmatpush1.msra.mxu1 %v5461_v25 }
 0x81c   :  { %2412 = vmatprep.subr.mxu0 %v5465_v48  ;;  %2483 = vmatprep.subr.mxu1 %v5467_v13 }
 0x81d   :  { %2413 = vmatpush1.msra.mxu0 %v5471_v10  ;;  %2484 = vmatpush1.msra.mxu1 %v5473_v9 }
 0x81e   :  { %2414 = vmatprep.subr.mxu0 %v5477_v6  ;;  %2485 = vmatprep.subr.mxu1 %v5479_v7 }
 0x81f   :  { %2415 = vmatpush1.msra.mxu0 %v5483_v45  ;;  %2486 = vmatpush1.msra.mxu1 %v5485_v46 }
 0x820   :  { %2416 = vmatprep.subr.mxu0 %v5489_v53  ;;  %2487 = vmatprep.subr.mxu1 %v5491_v49 }
 0x821   :  { %2417 = vmatpush1.msra.mxu0 %v5495_v44  ;;  %2488 = vmatpush1.msra.mxu1 %v5497_v55  ;;  %v6665_v44 = vld [vmem:[#allocation47_spill] sm:$0xff] }
 0x822   :  { %2418 = vmatprep.subr.mxu0 %v5501_v20  ;;  %2489 = vmatprep.subr.mxu1 %v5503_v57 }
 0x823   :  { %2419 = vmatpush1.msra.mxu0 %v5507_v0  ;;  %2490 = vmatpush1.msra.mxu1 %v5509_v2 }
 0x824   :  { %2420 = vmatprep.subr.mxu0 %v5513_v29  ;;  %2491 = vmatprep.subr.mxu1 %v5515_v4 }
 0x825   :  { %2421 = vmatpush1.msra.mxu0 %v5519_v62  ;;  %2492 = vmatpush1.msra.mxu1 %v5521_v61 }
 0x826   :  { %2422 = vmatprep.subr.mxu0 %v5525_v47  ;;  %2493 = vmatprep.subr.mxu1 %v6665_v44 }
 0x827   :  { %2423 = vmatpush1.msra.mxu0 %v5531_v63  ;;  %2494 = vmatpush1.msra.mxu1 %v5533_v11 }
 0x828   :  { %2424 = vmatprep.subr.mxu0 %v5537_v38  ;;  %2495 = vmatprep.subr.mxu1 %v5539_v56 }
 0x829   :  { %2425 = vmatpush1.msra.mxu0 %v5543_v51  ;;  %2496 = vmatpush1.msra.mxu1 %v5545_v3  ;;  %v1939_v3 = vld [vmem:[%s6264_s6] sm:$0xf] }
 0x82a   :  { %2426 = vmatprep.subr.mxu0 %v5549_v60  ;;  %2497 = vmatprep.subr.mxu1 %v5551_v59  ;;  %v6666_v60 = vld [vmem:[#allocation37_spill] sm:$0xff] }
 0x82b   :  { %2427 = vmatpush1.msra.mxu0 %v5555_v15  ;;  %2460 = vmatprep.mubr.f32.mxu0 %v6634_v58  ;;  %v6667_v56 = vsub.s32 0, %v6666_v60  ;;  %v6668_v15 = vsub.s32 1, %v6666_v60 }
 0x82c   :  { %2498 = vmatpush1.msra.mxu1 %v5559_v1  ;;  %2531 = vmatprep.mubr.f32.mxu1 %v6634_v58 }
 0x82d   :  { %2626 = vmatprep.subr.mxu0 %v5344_v14  ;;  %2697 = vmatprep.subr.mxu1 %v5346_v12  ;;  %v1944_v59 = vrot.slane %v1939_v3, %v6667_v56  ;;  %v1948_v38 = vrot.slane %v1939_v3, %v6668_v15  ;;  %v6670_v14 = vsub.s32 2, %v6666_v60 }
 0x82f   :  { %v1952_v44 = vrot.slane %v1939_v3, %v6670_v14 }
 0x8aa   :  { %v2027_v51 = vpop.f32.mrf.mxu0  ;;  %v2098_v11 = vpop.f32.mrf.mxu1 }
 0x8ab   :  { %v5644_v1 = vadd.f32 %v2027_v51, %v1944_v59  ;;  %v5652_v2 = vadd.f32 %v2098_v11, %v1952_v44  ;;  %v6672_v51 = vsub.s32 3, %v6666_v60 }
 0x8ac   :  { %v2029_v63 = vpop.f32.mrf.mxu0  ;;  %v2100_v61 = vpop.f32.mrf.mxu1 }
 0x8ad   :  { %6669 = vst [vmem:[#allocation54_spill] sm:$0xff] %v5644_v1  ;;  %v5648_v12 = vadd.f32 %v2029_v63, %v1948_v38  ;;  %v1956_v59 = vrot.slane %v1939_v3, %v6672_v51 }
 0x8af   :  { %6671 = vst [vmem:[#allocation56_spill] sm:$0xff] %v5648_v12  ;;  %v5657_v63 = vadd.f32 %v2100_v61, %v1956_v59 }
 0x8cb   :  { %v2233_v58 = vpop.f32.mrf.mxu0  ;;  %v2304_v29 = vpop.f32.mrf.mxu1 }
 0x8cc   :  { %v2309_v47 = vadd.f32 %v2233_v58, %v5644_v1  ;;  %v2311_v0 = vadd.f32 %v2304_v29, %v5652_v2 }
 0x8cd   :  { %v2235_v62 = vpop.f32.mrf.mxu0  ;;  %v2306_v14 = vpop.f32.mrf.mxu1 }
 0x8ce   :  { %v2313_v4 = vmul.f32 0.5, %v2309_v47  ;;  %v2310_v56 = vadd.f32 %v2235_v62, %v5648_v12  ;;  %v2312_v58 = vadd.f32 %v2306_v14, %v5657_v63  ;;  %v6674_v14 = vld [vmem:[#allocation14_spill] sm:$0xff] }
 0x8d0   :  { %4054 = vtanh.f32 %v2313_v4  ;;  %v2317_v15 = vmul.f32 0.5, %v2310_v56  ;;  %v2322_v47 = vmul.f32 0.5, %v2312_v58  ;;  %v6675_v58 = vld [vmem:[#allocation15_spill] sm:$0xff] }
 0x8d2   :  { %4056 = vtanh.f32 %v2317_v15 }
 0x8d3   :  { %4058 = vtanh.f32 %v2311_v0 }
 0x8d4   :  { %4060 = vtanh.f32 %v2322_v47  ;;  %v6676_v47 = vld [vmem:[#allocation41_spill] sm:$0xff] }
 0x8dd   :  { %v4055_v38 = vpop.eup %4054 }
 0x8de   :  { %v2315_v62 = vmul.f32 0.5, %v4055_v38  ;;  %v6677_v38 = vld [vmem:[#allocation43_spill] sm:$0xff] }
 0x8df   :  { %v4057_v12 = vpop.eup %4056 }
 0x8e0   :  { %v2316_v44 = vadd.f32 0.5, %v2315_v62  ;;  %v2319_v11 = vmul.f32 0.5, %v4057_v12  ;;  %v4059_v56 = vpop.eup %4058  ;;  %v6673_v12 = vld [vmem:[#allocation36_spill] sm:$0xff]  ;;  %v6678_v62 = vld [vmem:[#allocation42_spill] sm:$0xff] }
 0x8e1   :  { %v4061_v29 = vpop.eup %4060 }
 0x8e2   :  { %v2320_v4 = vadd.f32 0.5, %v2319_v11  ;;  %v2327_v3 = vmul.f32 %v4059_v56, %v2316_v44  ;;  %v2324_v61 = vmul.f32 0.5, %v4061_v29  ;;  %v6679_v44 = vld [vmem:[#allocation44_spill] sm:$0xff]  ;;  %v6680_v11 = vld [vmem:[#allocation45_spill] sm:$0xff]  ;;  %v6682_v56 = vld [vmem:[#allocation46_spill] sm:$0xff] }
 0x8e3   :  { %v6685_v29 = vld [vmem:[#allocation51_spill] sm:$0xff] }
 0x8e4   :  { %v2326_v60 = vmul.f32 0.0, %v2320_v4  ;;  %v2325_v0 = vadd.f32 0.5, %v2324_v61  ;;  %v6681_v4 = vld [vmem:[#allocation47_spill] sm:$0xff]  ;;  %v6686_v61 = vld [vmem:[#allocation50_spill] sm:$0xff] }
 0x8e6   :  { %v5660_v51 = vadd.f32 %v2327_v3, %v2326_v60  ;;  %v6683_v60 = vld [vmem:[#allocation48_spill] sm:$0xff]  ;;  %v6684_v3 = vld [vmem:[#allocation49_spill] sm:$0xff] }
 0x8e8   :  { %4062 = vtanh.f32 %v5660_v51 }
 0x8f5   :  { %v4063_v15 = vpop.eup %4062 }
 0x8f6   :  { %v2330_v59 = vmul.f32 %v4063_v15, %v2325_v0  ;;  %v6687_v0 = vld [vmem:[#allocation52_spill] sm:$0xff] }
 0x8f7   :  { %v6688_v15 = vld [vmem:[#allocation16_spill] sm:$0xff] }
 0x8f8   :  { %2331 = vst [vmem:[%s6266_s8] sm:$0xff] %v2330_v59  ;;  %2461 = vmatmul.mubr.f32.vlgmr.msra.gmra.mxu0 %v2330_v59  ;;  %2532 = vmatmul.mubr.f32.vlgmr.msra.gmra.mxu1 %v2330_v59  ;;  %v6689_v59 = vld [vmem:[#allocation17_spill] sm:$0xff] }
 0x8f9   :  { %2627 = vmatpush1.msra.mxu0 %v5355_v16  ;;  %2698 = vmatpush1.msra.mxu1 %v5357_v17 }
 0x8fa   :  { %2628 = vmatprep.subr.mxu0 %v5359_v18  ;;  %2699 = vmatprep.subr.mxu1 %v5361_v19 }
 0x8fb   :  { %2629 = vmatpush1.msra.mxu0 %v5387_v27  ;;  %2700 = vmatpush1.msra.mxu1 %v5389_v21 }
 0x8fc   :  { %2630 = vmatprep.subr.mxu0 %v5393_v22  ;;  %2701 = vmatprep.subr.mxu1 %v5395_v23 }
 0x8fd   :  { %2631 = vmatpush1.msra.mxu0 %v5399_v24  ;;  %2702 = vmatpush1.msra.mxu1 %v5401_v26 }
 0x8fe   :  { %2632 = vmatprep.subr.mxu0 %v5405_v52  ;;  %2703 = vmatprep.subr.mxu1 %v5407_v30 }
 0x8ff   :  { %2633 = vmatpush1.msra.mxu0 %v5411_v31  ;;  %2704 = vmatpush1.msra.mxu1 %v5413_v32 }
 0x900   :  { %2634 = vmatprep.subr.mxu0 %v5417_v33  ;;  %2705 = vmatprep.subr.mxu1 %v5419_v34 }
 0x901   :  { %2635 = vmatpush1.msra.mxu0 %v5423_v35  ;;  %2706 = vmatpush1.msra.mxu1 %v5425_v36 }
 0x902   :  { %2636 = vmatprep.subr.mxu0 %v5429_v37  ;;  %2707 = vmatprep.subr.mxu1 %v5431_v39 }
 0x903   :  { %2637 = vmatpush1.msra.mxu0 %v5435_v40  ;;  %2708 = vmatpush1.msra.mxu1 %v5437_v41 }
 0x904   :  { %2638 = vmatprep.subr.mxu0 %v5441_v42  ;;  %2709 = vmatprep.subr.mxu1 %v5443_v5 }
 0x905   :  { %2639 = vmatpush1.msra.mxu0 %v5447_v28  ;;  %2710 = vmatpush1.msra.mxu1 %v5449_v8 }
 0x906   :  { %2640 = vmatprep.subr.mxu0 %v5453_v43  ;;  %2711 = vmatprep.subr.mxu1 %v5455_v50 }
 0x907   :  { %2641 = vmatpush1.msra.mxu0 %v5459_v54  ;;  %2712 = vmatpush1.msra.mxu1 %v5461_v25 }
 0x908   :  { %2642 = vmatprep.subr.mxu0 %v5465_v48  ;;  %2713 = vmatprep.subr.mxu1 %v5467_v13 }
 0x909   :  { %2643 = vmatpush1.msra.mxu0 %v5471_v10  ;;  %2714 = vmatpush1.msra.mxu1 %v5473_v9 }
 0x90a   :  { %2644 = vmatprep.subr.mxu0 %v5477_v6  ;;  %2715 = vmatprep.subr.mxu1 %v5479_v7 }
 0x90b   :  { %2645 = vmatpush1.msra.mxu0 %v5483_v45  ;;  %2716 = vmatpush1.msra.mxu1 %v5485_v46 }
 0x90c   :  { %2646 = vmatprep.subr.mxu0 %v5489_v53  ;;  %2717 = vmatprep.subr.mxu1 %v5491_v49 }
 0x90d   :  { %2647 = vmatpush1.msra.mxu0 %v6673_v12  ;;  %2718 = vmatpush1.msra.mxu1 %v5497_v55 }
 0x90e   :  { %2648 = vmatprep.subr.mxu0 %v5501_v20  ;;  %2719 = vmatprep.subr.mxu1 %v5503_v57 }
 0x90f   :  { %2649 = vmatpush1.msra.mxu0 %v6674_v14  ;;  %2720 = vmatpush1.msra.mxu1 %v6675_v58 }
 0x910   :  { %2650 = vmatprep.subr.mxu0 %v6676_v47  ;;  %2721 = vmatprep.subr.mxu1 %v6677_v38 }
 0x911   :  { %2651 = vmatpush1.msra.mxu0 %v6678_v62  ;;  %2722 = vmatpush1.msra.mxu1 %v6679_v44  ;;  %v6690_v44 = vld [vmem:[#allocation53_spill] sm:$0xff] }
 0x912   :  { %2652 = vmatprep.subr.mxu0 %v6680_v11  ;;  %2723 = vmatprep.subr.mxu1 %v6681_v4  ;;  %v6691_v11 = vmov 0.0   ;;  %v6692_v4 = vld [vmem:[#allocation55_spill] sm:$0xff] }
 0x913   :  { %2653 = vmatpush1.msra.mxu0 %v6682_v56  ;;  %2724 = vmatpush1.msra.mxu1 %v6683_v60  ;;  %v6693_v60 = vld [vmem:[#allocation34_spill] sm:$0xff] }
 0x914   :  { %2654 = vmatprep.subr.mxu0 %v6684_v3  ;;  %2725 = vmatprep.subr.mxu1 %v6685_v29  ;;  %v6694_v3 = vld [vmem:[#allocation35_spill] sm:$0xff] }
 0x915   :  { %2655 = vmatpush1.msra.mxu0 %v6686_v61  ;;  %2726 = vmatpush1.msra.mxu1 %v6687_v0 }
 0x916   :  { %2656 = vmatprep.subr.mxu0 %v6688_v15  ;;  %2727 = vmatprep.subr.mxu1 %v6689_v59  ;;  %v6695_v15 = vld [vmem:[#allocation56_spill] sm:$0xff] }
 0x917   :  { %2657 = vmatpush1.msra.mxu0 %v6690_v44  ;;  %2690 = vmatprep.mubr.f32.mxu0 %v6691_v11 }
 0x918   :  { %2728 = vmatpush1.msra.mxu1 %v6692_v4  ;;  %2761 = vmatprep.mubr.f32.mxu1 %v6691_v11 }
 0x919   :  { %2856 = vmatprep.subr.mxu0 %v6693_v60  ;;  %2927 = vmatprep.subr.mxu1 %v6694_v3 }
 0x9b8   :  { %v2462_v29 = vpop.f32.mrf.mxu0  ;;  %v2533_v59 = vpop.f32.mrf.mxu1 }
 0x9b9   :  { %v2538_v61 = vadd.f32 %v2462_v29, %v5644_v1  ;;  %v2540_v38 = vadd.f32 %v2533_v59, %v5652_v2 }
 0x9ba   :  { %v2464_v0 = vpop.f32.mrf.mxu0  ;;  %v2535_v4 = vpop.f32.mrf.mxu1 }
 0x9bb   :  { %v2542_v56 = vmul.f32 0.5, %v2538_v61  ;;  %v2539_v62 = vadd.f32 %v2464_v0, %v6695_v15  ;;  %v2541_v11 = vadd.f32 %v2535_v4, %v5657_v63 }
 0x9bd   :  { %4064 = vtanh.f32 %v2542_v56  ;;  %v2546_v44 = vmul.f32 0.5, %v2539_v62  ;;  %v2551_v60 = vmul.f32 0.5, %v2541_v11 }
 0x9bf   :  { %4066 = vtanh.f32 %v2546_v44 }
 0x9c0   :  { %4068 = vtanh.f32 %v2540_v38 }
 0x9c1   :  { %4070 = vtanh.f32 %v2551_v60  ;;  %v5828_v60 = vld [vmem:[#allocation9 + $0x1f0] sm:$0xff] }
 0x9ca   :  { %v4065_v47 = vpop.eup %4064 }
 0x9cb   :  { %v2544_v3 = vmul.f32 0.5, %v4065_v47  ;;  %v5826_v47 = vld [vmem:[#allocation9 + $0x1e0] sm:$0xff] }
 0x9cc   :  { %v4067_v58 = vpop.eup %4066 }
 0x9cd   :  { %v2545_v14 = vadd.f32 0.5, %v2544_v3  ;;  %v2548_v29 = vmul.f32 0.5, %v4067_v58  ;;  %v4069_v1 = vpop.eup %4068  ;;  %v5822_v58 = vld [vmem:[#allocation9 + $0x1f8] sm:$0xff]  ;;  %v5832_v3 = vld [vmem:[#allocation9 + $0x1c8] sm:$0xff] }
 0x9ce   :  { %v4071_v44 = vpop.eup %4070  ;;  %6717 = vst [vmem:[#allocation38_spill] sm:$0xff] %v5822_v58 }
 0x9cf   :  { %v2549_v61 = vadd.f32 0.5, %v2548_v29  ;;  %v2556_v56 = vmul.f32 %v4069_v1, %v2545_v14  ;;  %v2553_v38 = vmul.f32 0.5, %v4071_v44  ;;  %v5820_v14 = vld [vmem:[#allocation9 + $0x1e8] sm:$0xff]  ;;  %v5834_v29 = vld [vmem:[#allocation9 + $0x1d8] sm:$0xff]  ;;  %v5850_v44 = vld [vmem:[#allocation9 + $0x1a0] sm:$0xff] }
 0x9d0   :  { %6716 = vst [vmem:[#allocation39_spill] sm:$0xff] %v5820_v14 }
 0x9d1   :  { %v2555_v0 = vmul.f32 %v2549_v61, %v5660_v51  ;;  %v2554_v59 = vadd.f32 0.5, %v2553_v38  ;;  %v5838_v61 = vld [vmem:[#allocation9 + $0x1c0] sm:$0xff]  ;;  %v5852_v38 = vld [vmem:[#allocation9 + $0x1b0] sm:$0xff] }
 0x9d3   :  { %v5737_v62 = vadd.f32 %v2556_v56, %v2555_v0  ;;  %v5840_v0 = vld [vmem:[#allocation9 + $0x1d0] sm:$0xff]  ;;  %v5844_v56 = vld [vmem:[#allocation9 + $0x1a8] sm:$0xff] }
 0x9d5   :  { %4072 = vtanh.f32 %v5737_v62 }
 0x9e2   :  { %v4073_v4 = vpop.eup %4072 }
 0x9e3   :  { %v2559_v11 = vmul.f32 %v4073_v4, %v2554_v59  ;;  %v5856_v59 = vld [vmem:[#allocation9 + $0x188] sm:$0xff]  ;;  %v5858_v4 = vld [vmem:[#allocation9 + $0x198] sm:$0xff] }
 0x9e5   :  { %3960 = vst [vmem:[%s6266_s8 + $0x8] sm:$0xff] %v2559_v11  ;;  %2691 = vmatmul.mubr.f32.vlgmr.msra.gmra.mxu0 %v2559_v11  ;;  %2762 = vmatmul.mubr.f32.vlgmr.msra.gmra.mxu1 %v2559_v11  ;;  %v5862_v11 = vld [vmem:[#allocation9 + $0x180] sm:$0xff] }
 0x9e6   :  { %2857 = vmatpush1.msra.mxu0 %v5355_v16  ;;  %2928 = vmatpush1.msra.mxu1 %v5357_v17  ;;  %v6696_v16 = vld [vmem:[#allocation14_spill] sm:$0xff]  ;;  %v6697_v17 = vld [vmem:[#allocation15_spill] sm:$0xff] }
 0x9e7   :  { %2858 = vmatprep.subr.mxu0 %v5359_v18  ;;  %2929 = vmatprep.subr.mxu1 %v5361_v19  ;;  %v6698_v18 = vld [vmem:[#allocation41_spill] sm:$0xff]  ;;  %v6699_v19 = vld [vmem:[#allocation43_spill] sm:$0xff] }
 0x9e8   :  { %2859 = vmatpush1.msra.mxu0 %v5387_v27  ;;  %2930 = vmatpush1.msra.mxu1 %v5389_v21  ;;  %v6700_v27 = vld [vmem:[#allocation42_spill] sm:$0xff]  ;;  %v6701_v21 = vld [vmem:[#allocation44_spill] sm:$0xff] }
 0x9e9   :  { %2860 = vmatprep.subr.mxu0 %v5393_v22  ;;  %2931 = vmatprep.subr.mxu1 %v5395_v23  ;;  %v6702_v22 = vld [vmem:[#allocation45_spill] sm:$0xff]  ;;  %v6703_v23 = vld [vmem:[#allocation47_spill] sm:$0xff] }
 0x9ea   :  { %2861 = vmatpush1.msra.mxu0 %v5399_v24  ;;  %2932 = vmatpush1.msra.mxu1 %v5401_v26  ;;  %v6704_v24 = vld [vmem:[#allocation46_spill] sm:$0xff]  ;;  %v6705_v26 = vld [vmem:[#allocation48_spill] sm:$0xff] }
 0x9eb   :  { %2862 = vmatprep.subr.mxu0 %v5405_v52  ;;  %2933 = vmatprep.subr.mxu1 %v5407_v30  ;;  %v6706_v52 = vld [vmem:[#allocation49_spill] sm:$0xff]  ;;  %v6707_v30 = vld [vmem:[#allocation51_spill] sm:$0xff] }
 0x9ec   :  { %2863 = vmatpush1.msra.mxu0 %v5411_v31  ;;  %2934 = vmatpush1.msra.mxu1 %v5413_v32  ;;  %v6708_v31 = vld [vmem:[#allocation50_spill] sm:$0xff]  ;;  %v6709_v32 = vld [vmem:[#allocation52_spill] sm:$0xff] }
 0x9ed   :  { %2864 = vmatprep.subr.mxu0 %v5417_v33  ;;  %2935 = vmatprep.subr.mxu1 %v5419_v34  ;;  %v6710_v33 = vld [vmem:[#allocation16_spill] sm:$0xff]  ;;  %v6711_v34 = vld [vmem:[#allocation17_spill] sm:$0xff] }
 0x9ee   :  { %2865 = vmatpush1.msra.mxu0 %v5423_v35  ;;  %2936 = vmatpush1.msra.mxu1 %v5425_v36  ;;  %v6712_v35 = vld [vmem:[#allocation53_spill] sm:$0xff]  ;;  %v6713_v36 = vmov 0.0  }
 0x9ef   :  { %2866 = vmatprep.subr.mxu0 %v5429_v37  ;;  %2937 = vmatprep.subr.mxu1 %v5431_v39  ;;  %v6714_v37 = vld [vmem:[#allocation55_spill] sm:$0xff] }
 0x9f0   :  { %2867 = vmatpush1.msra.mxu0 %v5435_v40  ;;  %2938 = vmatpush1.msra.mxu1 %v5437_v41  ;;  %v6715_v40 = vld [vmem:[#allocation54_spill] sm:$0xff] }
 0x9f1   :  { %2868 = vmatprep.subr.mxu0 %v5441_v42  ;;  %2939 = vmatprep.subr.mxu1 %v5443_v5 }
 0x9f2   :  { %2869 = vmatpush1.msra.mxu0 %v5447_v28  ;;  %2940 = vmatpush1.msra.mxu1 %v5449_v8 }
 0x9f3   :  { %2870 = vmatprep.subr.mxu0 %v5453_v43  ;;  %2941 = vmatprep.subr.mxu1 %v5455_v50 }
 0x9f4   :  { %2871 = vmatpush1.msra.mxu0 %v5459_v54  ;;  %2942 = vmatpush1.msra.mxu1 %v5461_v25 }
 0x9f5   :  { %2872 = vmatprep.subr.mxu0 %v5465_v48  ;;  %2943 = vmatprep.subr.mxu1 %v5467_v13 }
 0x9f6   :  { %2873 = vmatpush1.msra.mxu0 %v5471_v10  ;;  %2944 = vmatpush1.msra.mxu1 %v5473_v9 }
 0x9f7   :  { %2874 = vmatprep.subr.mxu0 %v5477_v6  ;;  %2945 = vmatprep.subr.mxu1 %v5479_v7 }
 0x9f8   :  { %2875 = vmatpush1.msra.mxu0 %v5483_v45  ;;  %2946 = vmatpush1.msra.mxu1 %v5485_v46 }
 0x9f9   :  { %2876 = vmatprep.subr.mxu0 %v5489_v53  ;;  %2947 = vmatprep.subr.mxu1 %v5491_v49 }
 0x9fa   :  { %2877 = vmatpush1.msra.mxu0 %v6673_v12  ;;  %2948 = vmatpush1.msra.mxu1 %v5497_v55 }
 0x9fb   :  { %2878 = vmatprep.subr.mxu0 %v5501_v20  ;;  %2949 = vmatprep.subr.mxu1 %v5503_v57 }
 0x9fc   :  { %2879 = vmatpush1.msra.mxu0 %v6696_v16  ;;  %2950 = vmatpush1.msra.mxu1 %v6697_v17  ;;  %v5864_v16 = vld [vmem:[#allocation9 + $0x190] sm:$0xff]  ;;  %v5868_v17 = vld [vmem:[#allocation9 + $0x168] sm:$0xff] }
 0x9fd   :  { %2880 = vmatprep.subr.mxu0 %v6698_v18  ;;  %2951 = vmatprep.subr.mxu1 %v6699_v19  ;;  %v5870_v18 = vld [vmem:[#allocation9 + $0x178] sm:$0xff]  ;;  %v5874_v19 = vld [vmem:[#allocation9 + $0x160] sm:$0xff] }
 0x9fe   :  { %2881 = vmatpush1.msra.mxu0 %v6700_v27  ;;  %2952 = vmatpush1.msra.mxu1 %v6701_v21  ;;  %v5876_v27 = vld [vmem:[#allocation9 + $0x170] sm:$0xff]  ;;  %v5880_v21 = vld [vmem:[#allocation9 + $0x148] sm:$0xff] }
 0x9ff   :  { %2882 = vmatprep.subr.mxu0 %v6702_v22  ;;  %2953 = vmatprep.subr.mxu1 %v6703_v23  ;;  %v5882_v22 = vld [vmem:[#allocation9 + $0x158] sm:$0xff]  ;;  %v5886_v23 = vld [vmem:[#allocation9 + $0x140] sm:$0xff] }
 0xa00   :  { %2883 = vmatpush1.msra.mxu0 %v6704_v24  ;;  %2954 = vmatpush1.msra.mxu1 %v6705_v26  ;;  %v5888_v24 = vld [vmem:[#allocation9 + $0x150] sm:$0xff]  ;;  %v5892_v26 = vld [vmem:[#allocation9 + $0x128] sm:$0xff] }
 0xa01   :  { %2884 = vmatprep.subr.mxu0 %v6706_v52  ;;  %2955 = vmatprep.subr.mxu1 %v6707_v30  ;;  %v5894_v52 = vld [vmem:[#allocation9 + $0x138] sm:$0xff]  ;;  %v5898_v30 = vld [vmem:[#allocation9 + $0x120] sm:$0xff] }
 0xa02   :  { %2885 = vmatpush1.msra.mxu0 %v6708_v31  ;;  %2956 = vmatpush1.msra.mxu1 %v6709_v32  ;;  %v5900_v31 = vld [vmem:[#allocation9 + $0x130] sm:$0xff]  ;;  %v5904_v32 = vld [vmem:[#allocation9 + $0x108] sm:$0xff] }
 0xa03   :  { %2886 = vmatprep.subr.mxu0 %v6710_v33  ;;  %2957 = vmatprep.subr.mxu1 %v6711_v34  ;;  %v5906_v33 = vld [vmem:[#allocation9 + $0x118] sm:$0xff]  ;;  %v5910_v34 = vld [vmem:[#allocation9 + $0x100] sm:$0xff] }
 0xa04   :  { %2887 = vmatpush1.msra.mxu0 %v6712_v35  ;;  %2920 = vmatprep.mubr.f32.mxu0 %v6713_v36  ;;  %v5912_v35 = vld [vmem:[#allocation9 + $0x110] sm:$0xff] }
 0xa05   :  { %2958 = vmatpush1.msra.mxu1 %v6714_v37  ;;  %2991 = vmatprep.mubr.f32.mxu1 %v6713_v36  ;;  %v5916_v37 = vld [vmem:[#allocation9 + $0xe8] sm:$0xff] }
 0xa06   :  { %3086 = vmatprep.subr.mxu0 %v5820_v14  ;;  %3157 = vmatprep.subr.mxu1 %v5822_v58 }
 0xaa5   :  { %v2692_v39 = vpop.f32.mrf.mxu0  ;;  %v2763_v8 = vpop.f32.mrf.mxu1 }
 0xaa6   :  { %v2768_v41 = vadd.f32 %v2692_v39, %v6715_v40  ;;  %v2770_v50 = vadd.f32 %v2763_v8, %v5652_v2  ;;  %v5918_v39 = vld [vmem:[#allocation9 + $0xf8] sm:$0xff]  ;;  %v5932_v8 = vld [vmem:[#allocation9 + $0xc0] sm:$0xff] }
 0xaa7   :  { %v2694_v42 = vpop.f32.mrf.mxu0  ;;  %v2765_v54 = vpop.f32.mrf.mxu1 }
 0xaa8   :  { %v2772_v5 = vmul.f32 0.5, %v2768_v41  ;;  %v2769_v28 = vadd.f32 %v2694_v42, %v6695_v15  ;;  %v2771_v25 = vadd.f32 %v2765_v54, %v5657_v63  ;;  %v5920_v41 = vld [vmem:[#allocation9 + $0xe0] sm:$0xff]  ;;  %v5924_v42 = vld [vmem:[#allocation9 + $0xf0] sm:$0xff]  ;;  %v5940_v54 = vld [vmem:[#allocation9 + $0xb8] sm:$0xff] }
 0xaaa   :  { %4074 = vtanh.f32 %v2772_v5  ;;  %v2776_v43 = vmul.f32 0.5, %v2769_v28  ;;  %v2781_v48 = vmul.f32 0.5, %v2771_v25  ;;  %v5926_v5 = vld [vmem:[#allocation9 + $0xc8] sm:$0xff]  ;;  %v5928_v28 = vld [vmem:[#allocation9 + $0xd8] sm:$0xff]  ;;  %v5942_v25 = vld [vmem:[#allocation9 + $0xa0] sm:$0xff] }
 0xaac   :  { %4076 = vtanh.f32 %v2776_v43  ;;  %v5934_v43 = vld [vmem:[#allocation9 + $0xd0] sm:$0xff] }
 0xaad   :  { %4078 = vtanh.f32 %v2770_v50  ;;  %v5936_v50 = vld [vmem:[#allocation9 + $0xa8] sm:$0xff] }
 0xaae   :  { %4080 = vtanh.f32 %v2781_v48  ;;  %v5944_v48 = vld [vmem:[#allocation9 + $0xb0] sm:$0xff] }
 0xab7   :  { %v4075_v13 = vpop.eup %4074 }
 0xab8   :  { %v2774_v10 = vmul.f32 0.5, %v4075_v13  ;;  %v5948_v13 = vld [vmem:[#allocation9 + $0x88] sm:$0xff] }
 0xab9   :  { %v4077_v9 = vpop.eup %4076 }
 0xaba   :  { %v2775_v6 = vadd.f32 0.5, %v2774_v10  ;;  %v2778_v7 = vmul.f32 0.5, %v4077_v9  ;;  %v4079_v46 = vpop.eup %4078  ;;  %v5950_v10 = vld [vmem:[#allocation9 + $0x98] sm:$0xff]  ;;  %v5954_v9 = vld [vmem:[#allocation9 + $0x80] sm:$0xff] }
 0xabb   :  { %v4081_v20 = vpop.eup %4080  ;;  %6718 = vst [vmem:[#allocation40_spill] sm:$0xff] %v5954_v9 }
 0xabc   :  { %v2779_v45 = vadd.f32 0.5, %v2778_v7  ;;  %v2786_v49 = vmul.f32 %v4079_v46, %v2775_v6  ;;  %v2783_v57 = vmul.f32 0.5, %v4081_v20  ;;  %v5956_v6 = vld [vmem:[#allocation9 + $0x90] sm:$0xff]  ;;  %v5960_v7 = vld [vmem:[#allocation9 + $0x68] sm:$0xff]  ;;  %v5966_v46 = vld [vmem:[#allocation9 + $0x60] sm:$0xff] }
 0xabd   :  { %6719 = vst [vmem:[#allocation18_spill] sm:$0xff] %v5956_v6  ;;  %6720 = vst [vmem:[#allocation19_spill] sm:$0xff] %v5960_v7  ;;  %v5974_v20 = vld [vmem:[#allocation9 + $0x58] sm:$0xff] }
 0xabe   :  { %v2785_v53 = vmul.f32 %v2779_v45, %v5737_v62  ;;  %v2784_v1 = vadd.f32 0.5, %v2783_v57  ;;  %v5846_v62 = vld [vmem:[#allocation9 + $0x1b8] sm:$0xff]  ;;  %6722 = vst [vmem:[#allocation21_spill] sm:$0xff] %v5966_v46  ;;  %6725 = vst [vmem:[#allocation24_spill] sm:$0xff] %v5974_v20  ;;  %v5978_v57 = vld [vmem:[#allocation9 + $0x40] sm:$0xff] }
 0xabf   :  { %v5962_v45 = vld [vmem:[#allocation9 + $0x78] sm:$0xff]  ;;  %6726 = vst [vmem:[#allocation25_spill] sm:$0xff] %v5978_v57 }
 0xac0   :  { %v5812_v55 = vadd.f32 %v2786_v49, %v2785_v53  ;;  %6721 = vst [vmem:[#allocation20_spill] sm:$0xff] %v5962_v45  ;;  %v5968_v53 = vld [vmem:[#allocation9 + $0x70] sm:$0xff]  ;;  %v5972_v49 = vld [vmem:[#allocation9 + $0x48] sm:$0xff] }
 0xac1   :  { %6723 = vst [vmem:[#allocation22_spill] sm:$0xff] %v5968_v53  ;;  %6724 = vst [vmem:[#allocation23_spill] sm:$0xff] %v5972_v49 }
 0xac2   :  { %4082 = vtanh.f32 %v5812_v55 }
 0xacf   :  { %v4083_v51 = vpop.eup %4082 }
 0xad0   :  { %v2789_v12 = vmul.f32 %v4083_v51, %v2784_v1  ;;  %v5980_v1 = vld [vmem:[#allocation9 + $0x50] sm:$0xff]  ;;  %v5984_v51 = vld [vmem:[#allocation9 + $0x28] sm:$0xff] }
 0xad1   :  { %6727 = vst [vmem:[#allocation26_spill] sm:$0xff] %v5980_v1  ;;  %6728 = vst [vmem:[#allocation27_spill] sm:$0xff] %v5984_v51 }
 0xad2   :  { %3961 = vst [vmem:[%s6266_s8 + $0x10] sm:$0xff] %v2789_v12  ;;  %2921 = vmatmul.mubr.f32.vlgmr.msra.gmra.mxu0 %v2789_v12  ;;  %2992 = vmatmul.mubr.f32.vlgmr.msra.gmra.mxu1 %v2789_v12  ;;  %v5986_v12 = vld [vmem:[#allocation9 + $0x38] sm:$0xff] }
 0xad3   :  { %3150 = vmatprep.mubr.f32.mxu0 %v6713_v36  ;;  %3221 = vmatprep.mubr.f32.mxu1 %v6713_v36  ;;  %6729 = vst [vmem:[#allocation28_spill] sm:$0xff] %v5986_v12  ;;  %v5990_v36 = vld [vmem:[#allocation9 + $0x20] sm:$0xff] }
 0xad4   :  { %3087 = vmatpush1.msra.mxu0 %v5826_v47  ;;  %3158 = vmatpush1.msra.mxu1 %v5828_v60  ;;  %6730 = vst [vmem:[#allocation29_spill] sm:$0xff] %v5990_v36 }
 0xad5   :  { %3088 = vmatprep.subr.mxu0 %v5832_v3  ;;  %3159 = vmatprep.subr.mxu1 %v5834_v29 }
 0xad6   :  { %3089 = vmatpush1.msra.mxu0 %v5838_v61  ;;  %3160 = vmatpush1.msra.mxu1 %v5840_v0 }
 0xad7   :  { %3090 = vmatprep.subr.mxu0 %v5844_v56  ;;  %3161 = vmatprep.subr.mxu1 %v5846_v62 }
 0xad8   :  { %3091 = vmatpush1.msra.mxu0 %v5850_v44  ;;  %3162 = vmatpush1.msra.mxu1 %v5852_v38 }
 0xad9   :  { %3092 = vmatprep.subr.mxu0 %v5856_v59  ;;  %3163 = vmatprep.subr.mxu1 %v5858_v4 }
 0xada   :  { %3093 = vmatpush1.msra.mxu0 %v5862_v11  ;;  %3164 = vmatpush1.msra.mxu1 %v5864_v16 }
 0xadb   :  { %3094 = vmatprep.subr.mxu0 %v5868_v17  ;;  %3165 = vmatprep.subr.mxu1 %v5870_v18 }
 0xadc   :  { %3095 = vmatpush1.msra.mxu0 %v5874_v19  ;;  %3166 = vmatpush1.msra.mxu1 %v5876_v27 }
 0xadd   :  { %3096 = vmatprep.subr.mxu0 %v5880_v21  ;;  %3167 = vmatprep.subr.mxu1 %v5882_v22 }
 0xade   :  { %3097 = vmatpush1.msra.mxu0 %v5886_v23  ;;  %3168 = vmatpush1.msra.mxu1 %v5888_v24 }
 0xadf   :  { %3098 = vmatprep.subr.mxu0 %v5892_v26  ;;  %3169 = vmatprep.subr.mxu1 %v5894_v52 }
 0xae0   :  { %3099 = vmatpush1.msra.mxu0 %v5898_v30  ;;  %3170 = vmatpush1.msra.mxu1 %v5900_v31 }
 0xae1   :  { %3100 = vmatprep.subr.mxu0 %v5904_v32  ;;  %3171 = vmatprep.subr.mxu1 %v5906_v33 }
 0xae2   :  { %3101 = vmatpush1.msra.mxu0 %v5910_v34  ;;  %3172 = vmatpush1.msra.mxu1 %v5912_v35 }
 0xae3   :  { %3102 = vmatprep.subr.mxu0 %v5916_v37  ;;  %3173 = vmatprep.subr.mxu1 %v5918_v39 }
 0xae4   :  { %3103 = vmatpush1.msra.mxu0 %v5920_v41  ;;  %3174 = vmatpush1.msra.mxu1 %v5924_v42 }
 0xae5   :  { %3104 = vmatprep.subr.mxu0 %v5926_v5  ;;  %3175 = vmatprep.subr.mxu1 %v5928_v28 }
 0xae6   :  { %3105 = vmatpush1.msra.mxu0 %v5932_v8  ;;  %3176 = vmatpush1.msra.mxu1 %v5934_v43 }
 0xae7   :  { %3106 = vmatprep.subr.mxu0 %v5936_v50  ;;  %3177 = vmatprep.subr.mxu1 %v5940_v54 }
 0xae8   :  { %3107 = vmatpush1.msra.mxu0 %v5942_v25  ;;  %3178 = vmatpush1.msra.mxu1 %v5944_v48 }
 0xae9   :  { %3108 = vmatprep.subr.mxu0 %v5948_v13  ;;  %3179 = vmatprep.subr.mxu1 %v5950_v10 }
 0xaea   :  { %3109 = vmatpush1.msra.mxu0 %v5954_v9  ;;  %3180 = vmatpush1.msra.mxu1 %v5956_v6 }
 0xaeb   :  { %3110 = vmatprep.subr.mxu0 %v5960_v7  ;;  %3181 = vmatprep.subr.mxu1 %v5962_v45  ;;  %v5992_v7 = vld [vmem:[#allocation9 + $0x30] sm:$0xff]  ;;  %v5996_v45 = vld [vmem:[#allocation9 + $0x8] sm:$0xff] }
 0xaec   :  { %3111 = vmatpush1.msra.mxu0 %v5966_v46  ;;  %3182 = vmatpush1.msra.mxu1 %v5968_v53  ;;  %6731 = vst [vmem:[#allocation30_spill] sm:$0xff] %v5992_v7  ;;  %6732 = vst [vmem:[#allocation31_spill] sm:$0xff] %v5996_v45  ;;  %v5998_v46 = vld [vmem:[#allocation9 + $0x18] sm:$0xff]  ;;  %v6002_v53 = vld [vmem:[#allocation9] sm:$0xff] }
 0xaed   :  { %3112 = vmatprep.subr.mxu0 %v5972_v49  ;;  %3183 = vmatprep.subr.mxu1 %v5974_v20  ;;  %6733 = vst [vmem:[#allocation32_spill] sm:$0xff] %v5998_v46  ;;  %6734 = vst [vmem:[#allocation33_spill] sm:$0xff] %v6002_v53  ;;  %v6004_v49 = vld [vmem:[#allocation9 + $0x10] sm:$0xff] }
 0xaee   :  { %3113 = vmatpush1.msra.mxu0 %v5978_v57  ;;  %3184 = vmatpush1.msra.mxu1 %v5980_v1  ;;  %6735 = vst [vmem:[#allocation57_spill] sm:$0xff] %v6004_v49 }
 0xaef   :  { %3114 = vmatprep.subr.mxu0 %v5984_v51  ;;  %3185 = vmatprep.subr.mxu1 %v5986_v12 }
 0xaf0   :  { %3115 = vmatpush1.msra.mxu0 %v5990_v36  ;;  %3186 = vmatpush1.msra.mxu1 %v5992_v7 }
 0xaf1   :  { %3116 = vmatprep.subr.mxu0 %v5996_v45  ;;  %3187 = vmatprep.subr.mxu1 %v5998_v46 }
 0xaf2   :  { %3117 = vmatpush1.msra.mxu0 %v6002_v53  ;;  %3188 = vmatpush1.msra.mxu1 %v6004_v49 }
 0xaf3   :  { %3316 = vmatprep.subr.mxu0 %v5820_v14  ;;  %3387 = vmatprep.subr.mxu1 %v5822_v58 }
 0xb92   :  { %v2922_v12 = vpop.f32.mrf.mxu0  ;;  %v2993_v7 = vpop.f32.mrf.mxu1 }
 0xb93   :  { %v2998_v51 = vadd.f32 %v2922_v12, %v6715_v40  ;;  %v3000_v46 = vadd.f32 %v2993_v7, %v5652_v2 }
 0xb94   :  { %v2924_v1 = vpop.f32.mrf.mxu0  ;;  %v2995_v53 = vpop.f32.mrf.mxu1 }
 0xb95   :  { %v3002_v57 = vmul.f32 0.5, %v2998_v51  ;;  %v2999_v36 = vadd.f32 %v2924_v1, %v6695_v15  ;;  %v3001_v49 = vadd.f32 %v2995_v53, %v5657_v63 }
 0xb97   :  { %4084 = vtanh.f32 %v3002_v57  ;;  %v3006_v45 = vmul.f32 0.5, %v2999_v36  ;;  %v3011_v14 = vmul.f32 0.5, %v3001_v49 }
 0xb99   :  { %4086 = vtanh.f32 %v3006_v45 }
 0xb9a   :  { %4088 = vtanh.f32 %v3000_v46 }
 0xb9b   :  { %4090 = vtanh.f32 %v3011_v14  ;;  %v6738_v14 = vld [vmem:[#allocation19_spill] sm:$0xff] }
 0xba4   :  { %v4085_v20 = vpop.eup %4084 }
 0xba5   :  { %v3004_v58 = vmul.f32 0.5, %v4085_v20  ;;  %v6742_v20 = vld [vmem:[#allocation23_spill] sm:$0xff] }
 0xba6   :  { %v4087_v6 = vpop.eup %4086 }
 0xba7   :  { %v3005_v9 = vadd.f32 0.5, %v3004_v58  ;;  %v3008_v12 = vmul.f32 0.5, %v4087_v6  ;;  %v4089_v40 = vpop.eup %4088  ;;  %v6739_v58 = vld [vmem:[#allocation20_spill] sm:$0xff]  ;;  %v6741_v6 = vld [vmem:[#allocation22_spill] sm:$0xff] }
 0xba8   :  { %v4091_v7 = vpop.eup %4090 }
 0xba9   :  { %v3009_v51 = vadd.f32 0.5, %v3008_v12  ;;  %v3016_v57 = vmul.f32 %v4089_v40, %v3005_v9  ;;  %v3013_v45 = vmul.f32 0.5, %v4091_v7  ;;  %v6736_v40 = vld [vmem:[#allocation40_spill] sm:$0xff]  ;;  %v6740_v9 = vld [vmem:[#allocation21_spill] sm:$0xff] }
 0xbaa   :  { %v6743_v12 = vld [vmem:[#allocation24_spill] sm:$0xff] }
 0xbab   :  { %v3015_v1 = vmul.f32 %v3009_v51, %v5812_v55  ;;  %v3014_v46 = vadd.f32 0.5, %v3013_v45  ;;  %v6737_v55 = vld [vmem:[#allocation18_spill] sm:$0xff]  ;;  %v6744_v51 = vld [vmem:[#allocation25_spill] sm:$0xff]  ;;  %v6747_v7 = vld [vmem:[#allocation28_spill] sm:$0xff] }
 0xbac   :  { %v6748_v45 = vld [vmem:[#allocation29_spill] sm:$0xff] }
 0xbad   :  { %v6019_v36 = vadd.f32 %v3016_v57, %v3015_v1  ;;  %v6745_v1 = vld [vmem:[#allocation26_spill] sm:$0xff]  ;;  %v6746_v57 = vld [vmem:[#allocation27_spill] sm:$0xff] }
 0xbaf   :  { %4092 = vtanh.f32 %v6019_v36 }
 0xbbc   :  { %v4093_v53 = vpop.eup %4092 }
 0xbbd   :  { %v3019_v49 = vmul.f32 %v4093_v53, %v3014_v46  ;;  %v6749_v46 = vld [vmem:[#allocation30_spill] sm:$0xff]  ;;  %v6750_v53 = vld [vmem:[#allocation31_spill] sm:$0xff] }
 0xbbf   :  { %3962 = vst [vmem:[%s6266_s8 + $0x18] sm:$0xff] %v3019_v49  ;;  %3151 = vmatmul.mubr.f32.vlgmr.msra.gmra.mxu0 %v3019_v49  ;;  %3222 = vmatmul.mubr.f32.vlgmr.msra.gmra.mxu1 %v3019_v49  ;;  %v6751_v49 = vld [vmem:[#allocation32_spill] sm:$0xff] }
 0xbc0   :  { %3317 = vmatpush1.msra.mxu0 %v5826_v47  ;;  %3388 = vmatpush1.msra.mxu1 %v5828_v60 }
 0xbc1   :  { %3318 = vmatprep.subr.mxu0 %v5832_v3  ;;  %3389 = vmatprep.subr.mxu1 %v5834_v29 }
 0xbc2   :  { %3319 = vmatpush1.msra.mxu0 %v5838_v61  ;;  %3390 = vmatpush1.msra.mxu1 %v5840_v0 }
 0xbc3   :  { %3320 = vmatprep.subr.mxu0 %v5844_v56  ;;  %3391 = vmatprep.subr.mxu1 %v5846_v62 }
 0xbc4   :  { %3321 = vmatpush1.msra.mxu0 %v5850_v44  ;;  %3392 = vmatpush1.msra.mxu1 %v5852_v38 }
 0xbc5   :  { %3322 = vmatprep.subr.mxu0 %v5856_v59  ;;  %3393 = vmatprep.subr.mxu1 %v5858_v4 }
 0xbc6   :  { %3323 = vmatpush1.msra.mxu0 %v5862_v11  ;;  %3394 = vmatpush1.msra.mxu1 %v5864_v16 }
 0xbc7   :  { %3324 = vmatprep.subr.mxu0 %v5868_v17  ;;  %3395 = vmatprep.subr.mxu1 %v5870_v18 }
 0xbc8   :  { %3325 = vmatpush1.msra.mxu0 %v5874_v19  ;;  %3396 = vmatpush1.msra.mxu1 %v5876_v27 }
 0xbc9   :  { %3326 = vmatprep.subr.mxu0 %v5880_v21  ;;  %3397 = vmatprep.subr.mxu1 %v5882_v22 }
 0xbca   :  { %3327 = vmatpush1.msra.mxu0 %v5886_v23  ;;  %3398 = vmatpush1.msra.mxu1 %v5888_v24 }
 0xbcb   :  { %3328 = vmatprep.subr.mxu0 %v5892_v26  ;;  %3399 = vmatprep.subr.mxu1 %v5894_v52 }
 0xbcc   :  { %3329 = vmatpush1.msra.mxu0 %v5898_v30  ;;  %3400 = vmatpush1.msra.mxu1 %v5900_v31 }
 0xbcd   :  { %3330 = vmatprep.subr.mxu0 %v5904_v32  ;;  %3401 = vmatprep.subr.mxu1 %v5906_v33 }
 0xbce   :  { %3331 = vmatpush1.msra.mxu0 %v5910_v34  ;;  %3402 = vmatpush1.msra.mxu1 %v5912_v35 }
 0xbcf   :  { %3332 = vmatprep.subr.mxu0 %v5916_v37  ;;  %3403 = vmatprep.subr.mxu1 %v5918_v39 }
 0xbd0   :  { %3333 = vmatpush1.msra.mxu0 %v5920_v41  ;;  %3404 = vmatpush1.msra.mxu1 %v5924_v42 }
 0xbd1   :  { %3334 = vmatprep.subr.mxu0 %v5926_v5  ;;  %3405 = vmatprep.subr.mxu1 %v5928_v28 }
 0xbd2   :  { %3335 = vmatpush1.msra.mxu0 %v5932_v8  ;;  %3406 = vmatpush1.msra.mxu1 %v5934_v43 }
 0xbd3   :  { %3336 = vmatprep.subr.mxu0 %v5936_v50  ;;  %3407 = vmatprep.subr.mxu1 %v5940_v54 }
 0xbd4   :  { %3337 = vmatpush1.msra.mxu0 %v5942_v25  ;;  %3408 = vmatpush1.msra.mxu1 %v5944_v48 }
 0xbd5   :  { %3338 = vmatprep.subr.mxu0 %v5948_v13  ;;  %3409 = vmatprep.subr.mxu1 %v5950_v10 }
 0xbd6   :  { %3339 = vmatpush1.msra.mxu0 %v6736_v40  ;;  %3410 = vmatpush1.msra.mxu1 %v6737_v55 }
 0xbd7   :  { %3340 = vmatprep.subr.mxu0 %v6738_v14  ;;  %3411 = vmatprep.subr.mxu1 %v6739_v58 }
 0xbd8   :  { %3341 = vmatpush1.msra.mxu0 %v6740_v9  ;;  %3412 = vmatpush1.msra.mxu1 %v6741_v6  ;;  %v6752_v6 = vld [vmem:[#allocation33_spill] sm:$0xff] }
 0xbd9   :  { %3342 = vmatprep.subr.mxu0 %v6742_v20  ;;  %3413 = vmatprep.subr.mxu1 %v6743_v12  ;;  %v6753_v20 = vmov 0.0   ;;  %v6754_v12 = vld [vmem:[#allocation57_spill] sm:$0xff] }
 0xbda   :  { %3343 = vmatpush1.msra.mxu0 %v6744_v51  ;;  %3414 = vmatpush1.msra.mxu1 %v6745_v1  ;;  %v6755_v1 = vld [vmem:[#allocation39_spill] sm:$0xff] }
 0xbdb   :  { %3344 = vmatprep.subr.mxu0 %v6746_v57  ;;  %3415 = vmatprep.subr.mxu1 %v6747_v7  ;;  %v6756_v57 = vld [vmem:[#allocation38_spill] sm:$0xff] }
 0xbdc   :  { %3345 = vmatpush1.msra.mxu0 %v6748_v45  ;;  %3416 = vmatpush1.msra.mxu1 %v6749_v46  ;;  %v6757_v45 = vld [vmem:[#allocation54_spill] sm:$0xff] }
 0xbdd   :  { %3346 = vmatprep.subr.mxu0 %v6750_v53  ;;  %3417 = vmatprep.subr.mxu1 %v6751_v49 }
 0xbde   :  { %3347 = vmatpush1.msra.mxu0 %v6752_v6  ;;  %3380 = vmatprep.mubr.f32.mxu0 %v6753_v20 }
 0xbdf   :  { %3418 = vmatpush1.msra.mxu1 %v6754_v12  ;;  %3451 = vmatprep.mubr.f32.mxu1 %v6753_v20 }
 0xbe0   :  { %3546 = vmatprep.subr.mxu0 %v6755_v1  ;;  %3617 = vmatprep.subr.mxu1 %v6756_v57 }
 0xc7f   :  { %v3152_v7 = vpop.f32.mrf.mxu0  ;;  %v3223_v49 = vpop.f32.mrf.mxu1 }
 0xc80   :  { %v3228_v51 = vadd.f32 %v3152_v7, %v6757_v45  ;;  %v3230_v58 = vadd.f32 %v3223_v49, %v5652_v2 }
 0xc81   :  { %v3154_v46 = vpop.f32.mrf.mxu0  ;;  %v3225_v12 = vpop.f32.mrf.mxu1 }
 0xc82   :  { %v3232_v9 = vmul.f32 0.5, %v3228_v51  ;;  %v3229_v53 = vadd.f32 %v3154_v46, %v6695_v15  ;;  %v3231_v20 = vadd.f32 %v3225_v12, %v5657_v63 }
 0xc84   :  { %4094 = vtanh.f32 %v3232_v9  ;;  %v3236_v6 = vmul.f32 0.5, %v3229_v53  ;;  %v3241_v1 = vmul.f32 0.5, %v3231_v20 }
 0xc86   :  { %4096 = vtanh.f32 %v3236_v6 }
 0xc87   :  { %4098 = vtanh.f32 %v3230_v58 }
 0xc88   :  { %4100 = vtanh.f32 %v3241_v1  ;;  %v6762_v1 = vld [vmem:[#allocation21_spill] sm:$0xff] }
 0xc91   :  { %v4095_v14 = vpop.eup %4094 }
 0xc92   :  { %v3234_v57 = vmul.f32 0.5, %v4095_v14  ;;  %v6761_v14 = vld [vmem:[#allocation20_spill] sm:$0xff] }
 0xc93   :  { %v4097_v55 = vpop.eup %4096 }
 0xc94   :  { %v3235_v40 = vadd.f32 0.5, %v3234_v57  ;;  %v3238_v7 = vmul.f32 0.5, %v4097_v55  ;;  %v4099_v45 = vpop.eup %4098  ;;  %v6760_v55 = vld [vmem:[#allocation19_spill] sm:$0xff]  ;;  %v6763_v57 = vld [vmem:[#allocation22_spill] sm:$0xff] }
 0xc95   :  { %v4101_v6 = vpop.eup %4100 }
 0xc96   :  { %v3239_v51 = vadd.f32 0.5, %v3238_v7  ;;  %v3246_v9 = vmul.f32 %v4099_v45, %v3235_v40  ;;  %v3243_v58 = vmul.f32 0.5, %v4101_v6  ;;  %v6759_v40 = vld [vmem:[#allocation18_spill] sm:$0xff]  ;;  %v6764_v45 = vld [vmem:[#allocation23_spill] sm:$0xff]  ;;  %v6765_v7 = vld [vmem:[#allocation24_spill] sm:$0xff] }
 0xc97   :  { %v6769_v6 = vld [vmem:[#allocation28_spill] sm:$0xff] }
 0xc98   :  { %v3245_v46 = vmul.f32 %v3239_v51, %v6019_v36  ;;  %v3244_v49 = vadd.f32 0.5, %v3243_v58  ;;  %v6758_v36 = vld [vmem:[#allocation40_spill] sm:$0xff]  ;;  %v6766_v51 = vld [vmem:[#allocation25_spill] sm:$0xff] }
 0xc99   :  { %v6770_v58 = vld [vmem:[#allocation29_spill] sm:$0xff] }
 0xc9a   :  { %v6096_v53 = vadd.f32 %v3246_v9, %v3245_v46  ;;  %v6767_v46 = vld [vmem:[#allocation26_spill] sm:$0xff]  ;;  %v6768_v9 = vld [vmem:[#allocation27_spill] sm:$0xff] }
 0xc9c   :  { %4102 = vtanh.f32 %v6096_v53 }
 0xca9   :  { %v4103_v12 = vpop.eup %4102 }
 0xcaa   :  { %v3249_v20 = vmul.f32 %v4103_v12, %v3244_v49  ;;  %v6771_v49 = vld [vmem:[#allocation30_spill] sm:$0xff]  ;;  %v6772_v12 = vld [vmem:[#allocation31_spill] sm:$0xff] }
 0xcac   :  { %3963 = vst [vmem:[%s6266_s8 + $0x20] sm:$0xff] %v3249_v20  ;;  %3381 = vmatmul.mubr.f32.vlgmr.msra.gmra.mxu0 %v3249_v20  ;;  %3452 = vmatmul.mubr.f32.vlgmr.msra.gmra.mxu1 %v3249_v20  ;;  %v6773_v20 = vld [vmem:[#allocation32_spill] sm:$0xff] }
 0xcad   :  { %3547 = vmatpush1.msra.mxu0 %v5826_v47  ;;  %3618 = vmatpush1.msra.mxu1 %v5828_v60 }
 0xcae   :  { %3548 = vmatprep.subr.mxu0 %v5832_v3  ;;  %3619 = vmatprep.subr.mxu1 %v5834_v29 }
 0xcaf   :  { %3549 = vmatpush1.msra.mxu0 %v5838_v61  ;;  %3620 = vmatpush1.msra.mxu1 %v5840_v0 }
 0xcb0   :  { %3550 = vmatprep.subr.mxu0 %v5844_v56  ;;  %3621 = vmatprep.subr.mxu1 %v5846_v62 }
 0xcb1   :  { %3551 = vmatpush1.msra.mxu0 %v5850_v44  ;;  %3622 = vmatpush1.msra.mxu1 %v5852_v38 }
 0xcb2   :  { %3552 = vmatprep.subr.mxu0 %v5856_v59  ;;  %3623 = vmatprep.subr.mxu1 %v5858_v4 }
 0xcb3   :  { %3553 = vmatpush1.msra.mxu0 %v5862_v11  ;;  %3624 = vmatpush1.msra.mxu1 %v5864_v16 }
 0xcb4   :  { %3554 = vmatprep.subr.mxu0 %v5868_v17  ;;  %3625 = vmatprep.subr.mxu1 %v5870_v18 }
 0xcb5   :  { %3555 = vmatpush1.msra.mxu0 %v5874_v19  ;;  %3626 = vmatpush1.msra.mxu1 %v5876_v27 }
 0xcb6   :  { %3556 = vmatprep.subr.mxu0 %v5880_v21  ;;  %3627 = vmatprep.subr.mxu1 %v5882_v22 }
 0xcb7   :  { %3557 = vmatpush1.msra.mxu0 %v5886_v23  ;;  %3628 = vmatpush1.msra.mxu1 %v5888_v24 }
 0xcb8   :  { %3558 = vmatprep.subr.mxu0 %v5892_v26  ;;  %3629 = vmatprep.subr.mxu1 %v5894_v52 }
 0xcb9   :  { %3559 = vmatpush1.msra.mxu0 %v5898_v30  ;;  %3630 = vmatpush1.msra.mxu1 %v5900_v31 }
 0xcba   :  { %3560 = vmatprep.subr.mxu0 %v5904_v32  ;;  %3631 = vmatprep.subr.mxu1 %v5906_v33 }
 0xcbb   :  { %3561 = vmatpush1.msra.mxu0 %v5910_v34  ;;  %3632 = vmatpush1.msra.mxu1 %v5912_v35 }
 0xcbc   :  { %3562 = vmatprep.subr.mxu0 %v5916_v37  ;;  %3633 = vmatprep.subr.mxu1 %v5918_v39 }
 0xcbd   :  { %3563 = vmatpush1.msra.mxu0 %v5920_v41  ;;  %3634 = vmatpush1.msra.mxu1 %v5924_v42 }
 0xcbe   :  { %3564 = vmatprep.subr.mxu0 %v5926_v5  ;;  %3635 = vmatprep.subr.mxu1 %v5928_v28 }
 0xcbf   :  { %3565 = vmatpush1.msra.mxu0 %v5932_v8  ;;  %3636 = vmatpush1.msra.mxu1 %v5934_v43 }
 0xcc0   :  { %3566 = vmatprep.subr.mxu0 %v5936_v50  ;;  %3637 = vmatprep.subr.mxu1 %v5940_v54 }
 0xcc1   :  { %3567 = vmatpush1.msra.mxu0 %v5942_v25  ;;  %3638 = vmatpush1.msra.mxu1 %v5944_v48 }
 0xcc2   :  { %3568 = vmatprep.subr.mxu0 %v5948_v13  ;;  %3639 = vmatprep.subr.mxu1 %v5950_v10 }
 0xcc3   :  { %3569 = vmatpush1.msra.mxu0 %v6758_v36  ;;  %3640 = vmatpush1.msra.mxu1 %v6759_v40 }
 0xcc4   :  { %3570 = vmatprep.subr.mxu0 %v6760_v55  ;;  %3641 = vmatprep.subr.mxu1 %v6761_v14 }
 0xcc5   :  { %3571 = vmatpush1.msra.mxu0 %v6762_v1  ;;  %3642 = vmatpush1.msra.mxu1 %v6763_v57  ;;  %v6774_v57 = vld [vmem:[#allocation33_spill] sm:$0xff] }
 0xcc6   :  { %3572 = vmatprep.subr.mxu0 %v6764_v45  ;;  %3643 = vmatprep.subr.mxu1 %v6765_v7  ;;  %v6775_v45 = vmov 0.0   ;;  %v6776_v7 = vld [vmem:[#allocation57_spill] sm:$0xff] }
 0xcc7   :  { %3573 = vmatpush1.msra.mxu0 %v6766_v51  ;;  %3644 = vmatpush1.msra.mxu1 %v6767_v46  ;;  %v6777_v46 = vld [vmem:[#allocation39_spill] sm:$0xff] }
 0xcc8   :  { %3574 = vmatprep.subr.mxu0 %v6768_v9  ;;  %3645 = vmatprep.subr.mxu1 %v6769_v6  ;;  %v6778_v9 = vld [vmem:[#allocation38_spill] sm:$0xff] }
 0xcc9   :  { %3575 = vmatpush1.msra.mxu0 %v6770_v58  ;;  %3646 = vmatpush1.msra.mxu1 %v6771_v49  ;;  %v6779_v58 = vld [vmem:[#allocation54_spill] sm:$0xff] }
 0xcca   :  { %3576 = vmatprep.subr.mxu0 %v6772_v12  ;;  %3647 = vmatprep.subr.mxu1 %v6773_v20 }
 0xccb   :  { %3577 = vmatpush1.msra.mxu0 %v6774_v57  ;;  %3610 = vmatprep.mubr.f32.mxu0 %v6775_v45 }
 0xccc   :  { %3648 = vmatpush1.msra.mxu1 %v6776_v7  ;;  %3681 = vmatprep.mubr.f32.mxu1 %v6775_v45 }
 0xccd   :  { %3776 = vmatprep.subr.mxu0 %v6777_v46  ;;  %3847 = vmatprep.subr.mxu1 %v6778_v9 }
 0xd6c   :  { %v3382_v6 = vpop.f32.mrf.mxu0  ;;  %v3453_v20 = vpop.f32.mrf.mxu1 }
 0xd6d   :  { %v3458_v51 = vadd.f32 %v3382_v6, %v6779_v58  ;;  %v3460_v14 = vadd.f32 %v3453_v20, %v5652_v2 }
 0xd6e   :  { %v3384_v49 = vpop.f32.mrf.mxu0  ;;  %v3455_v7 = vpop.f32.mrf.mxu1 }
 0xd6f   :  { %v3462_v1 = vmul.f32 0.5, %v3458_v51  ;;  %v3459_v12 = vadd.f32 %v3384_v49, %v6695_v15  ;;  %v3461_v45 = vadd.f32 %v3455_v7, %v5657_v63 }
 0xd71   :  { %4104 = vtanh.f32 %v3462_v1  ;;  %v3466_v57 = vmul.f32 0.5, %v3459_v12  ;;  %v3471_v46 = vmul.f32 0.5, %v3461_v45 }
 0xd73   :  { %4106 = vtanh.f32 %v3466_v57 }
 0xd74   :  { %4108 = vtanh.f32 %v3460_v14 }
 0xd75   :  { %4110 = vtanh.f32 %v3471_v46 }
 0xd7e   :  { %v4105_v55 = vpop.eup %4104 }
 0xd7f   :  { %v3464_v9 = vmul.f32 0.5, %v4105_v55 }
 0xd80   :  { %v4107_v40 = vpop.eup %4106 }
 0xd81   :  { %v3465_v36 = vadd.f32 0.5, %v3464_v9  ;;  %v3468_v6 = vmul.f32 0.5, %v4107_v40  ;;  %v4109_v58 = vpop.eup %4108 }
 0xd82   :  { %v4111_v57 = vpop.eup %4110 }
 0xd83   :  { %v3469_v51 = vadd.f32 0.5, %v3468_v6  ;;  %v3476_v1 = vmul.f32 %v4109_v58, %v3465_v36  ;;  %v3473_v14 = vmul.f32 0.5, %v4111_v57 }
 0xd85   :  { %v3475_v49 = vmul.f32 %v3469_v51, %v6096_v53  ;;  %v3474_v20 = vadd.f32 0.5, %v3473_v14 }
 0xd87   :  { %v6173_v12 = vadd.f32 %v3476_v1, %v3475_v49 }
 0xd89   :  { %4112 = vtanh.f32 %v6173_v12 }
 0xd96   :  { %v4113_v7 = vpop.eup %4112 }
 0xd97   :  { %v3479_v45 = vmul.f32 %v4113_v7, %v3474_v20 }
 0xd99   :  { %3964 = vst [vmem:[%s6266_s8 + $0x28] sm:$0xff] %v3479_v45  ;;  %3611 = vmatmul.mubr.f32.vlgmr.msra.gmra.mxu0 %v3479_v45  ;;  %3682 = vmatmul.mubr.f32.vlgmr.msra.gmra.mxu1 %v3479_v45 }
 0xd9a   :  { %3777 = vmatpush1.msra.mxu0 %v5826_v47  ;;  %3848 = vmatpush1.msra.mxu1 %v5828_v60  ;;  %v6780_v47 = vld [vmem:[#allocation40_spill] sm:$0xff]  ;;  %v6781_v60 = vld [vmem:[#allocation18_spill] sm:$0xff] }
 0xd9b   :  { %3778 = vmatprep.subr.mxu0 %v5832_v3  ;;  %3849 = vmatprep.subr.mxu1 %v5834_v29  ;;  %v6782_v3 = vld [vmem:[#allocation19_spill] sm:$0xff]  ;;  %v6783_v29 = vld [vmem:[#allocation20_spill] sm:$0xff] }
 0xd9c   :  { %3779 = vmatpush1.msra.mxu0 %v5838_v61  ;;  %3850 = vmatpush1.msra.mxu1 %v5840_v0  ;;  %v6784_v61 = vld [vmem:[#allocation21_spill] sm:$0xff]  ;;  %v6785_v0 = vld [vmem:[#allocation22_spill] sm:$0xff] }
 0xd9d   :  { %3780 = vmatprep.subr.mxu0 %v5844_v56  ;;  %3851 = vmatprep.subr.mxu1 %v5846_v62  ;;  %v6786_v56 = vld [vmem:[#allocation23_spill] sm:$0xff]  ;;  %v6787_v62 = vld [vmem:[#allocation24_spill] sm:$0xff] }
 0xd9e   :  { %3781 = vmatpush1.msra.mxu0 %v5850_v44  ;;  %3852 = vmatpush1.msra.mxu1 %v5852_v38  ;;  %v6788_v44 = vld [vmem:[#allocation25_spill] sm:$0xff]  ;;  %v6789_v38 = vld [vmem:[#allocation26_spill] sm:$0xff] }
 0xd9f   :  { %3782 = vmatprep.subr.mxu0 %v5856_v59  ;;  %3853 = vmatprep.subr.mxu1 %v5858_v4  ;;  %v6790_v59 = vld [vmem:[#allocation27_spill] sm:$0xff]  ;;  %v6791_v4 = vld [vmem:[#allocation28_spill] sm:$0xff] }
 0xda0   :  { %3783 = vmatpush1.msra.mxu0 %v5862_v11  ;;  %3854 = vmatpush1.msra.mxu1 %v5864_v16  ;;  %v6792_v11 = vld [vmem:[#allocation29_spill] sm:$0xff]  ;;  %v6793_v16 = vld [vmem:[#allocation30_spill] sm:$0xff] }
 0xda1   :  { %3784 = vmatprep.subr.mxu0 %v5868_v17  ;;  %3855 = vmatprep.subr.mxu1 %v5870_v18  ;;  %v6794_v17 = vld [vmem:[#allocation31_spill] sm:$0xff]  ;;  %v6795_v18 = vld [vmem:[#allocation32_spill] sm:$0xff] }
 0xda2   :  { %3785 = vmatpush1.msra.mxu0 %v5874_v19  ;;  %3856 = vmatpush1.msra.mxu1 %v5876_v27  ;;  %v6796_v19 = vld [vmem:[#allocation33_spill] sm:$0xff]  ;;  %v6797_v27 = vmov 0.0  }
 0xda3   :  { %3786 = vmatprep.subr.mxu0 %v5880_v21  ;;  %3857 = vmatprep.subr.mxu1 %v5882_v22  ;;  %v6798_v21 = vld [vmem:[#allocation57_spill] sm:$0xff] }
 0xda4   :  { %3787 = vmatpush1.msra.mxu0 %v5886_v23  ;;  %3858 = vmatpush1.msra.mxu1 %v5888_v24  ;;  %v6799_v23 = vld [vmem:[#allocation54_spill] sm:$0xff] }
 0xda5   :  { %3788 = vmatprep.subr.mxu0 %v5892_v26  ;;  %3859 = vmatprep.subr.mxu1 %v5894_v52 }
 0xda6   :  { %3789 = vmatpush1.msra.mxu0 %v5898_v30  ;;  %3860 = vmatpush1.msra.mxu1 %v5900_v31 }
 0xda7   :  { %3790 = vmatprep.subr.mxu0 %v5904_v32  ;;  %3861 = vmatprep.subr.mxu1 %v5906_v33 }
 0xda8   :  { %3791 = vmatpush1.msra.mxu0 %v5910_v34  ;;  %3862 = vmatpush1.msra.mxu1 %v5912_v35 }
 0xda9   :  { %3792 = vmatprep.subr.mxu0 %v5916_v37  ;;  %3863 = vmatprep.subr.mxu1 %v5918_v39 }
 0xdaa   :  { %3793 = vmatpush1.msra.mxu0 %v5920_v41  ;;  %3864 = vmatpush1.msra.mxu1 %v5924_v42 }
 0xdab   :  { %3794 = vmatprep.subr.mxu0 %v5926_v5  ;;  %3865 = vmatprep.subr.mxu1 %v5928_v28 }
 0xdac   :  { %3795 = vmatpush1.msra.mxu0 %v5932_v8  ;;  %3866 = vmatpush1.msra.mxu1 %v5934_v43 }
 0xdad   :  { %3796 = vmatprep.subr.mxu0 %v5936_v50  ;;  %3867 = vmatprep.subr.mxu1 %v5940_v54 }
 0xdae   :  { %3797 = vmatpush1.msra.mxu0 %v5942_v25  ;;  %3868 = vmatpush1.msra.mxu1 %v5944_v48 }
 0xdaf   :  { %3798 = vmatprep.subr.mxu0 %v5948_v13  ;;  %3869 = vmatprep.subr.mxu1 %v5950_v10 }
 0xdb0   :  { %3799 = vmatpush1.msra.mxu0 %v6780_v47  ;;  %3870 = vmatpush1.msra.mxu1 %v6781_v60 }
 0xdb1   :  { %3800 = vmatprep.subr.mxu0 %v6782_v3  ;;  %3871 = vmatprep.subr.mxu1 %v6783_v29 }
 0xdb2   :  { %3801 = vmatpush1.msra.mxu0 %v6784_v61  ;;  %3872 = vmatpush1.msra.mxu1 %v6785_v0 }
 0xdb3   :  { %3802 = vmatprep.subr.mxu0 %v6786_v56  ;;  %3873 = vmatprep.subr.mxu1 %v6787_v62 }
 0xdb4   :  { %3803 = vmatpush1.msra.mxu0 %v6788_v44  ;;  %3874 = vmatpush1.msra.mxu1 %v6789_v38 }
 0xdb5   :  { %3804 = vmatprep.subr.mxu0 %v6790_v59  ;;  %3875 = vmatprep.subr.mxu1 %v6791_v4 }
 0xdb6   :  { %3805 = vmatpush1.msra.mxu0 %v6792_v11  ;;  %3876 = vmatpush1.msra.mxu1 %v6793_v16 }
 0xdb7   :  { %3806 = vmatprep.subr.mxu0 %v6794_v17  ;;  %3877 = vmatprep.subr.mxu1 %v6795_v18 }
 0xdb8   :  { %3807 = vmatpush1.msra.mxu0 %v6796_v19  ;;  %3840 = vmatprep.mubr.f32.mxu0 %v6797_v27 }
 0xdb9   :  { %3878 = vmatpush1.msra.mxu1 %v6798_v21  ;;  %3911 = vmatprep.mubr.f32.mxu1 %v6797_v27 }
 0xe59   :  { %v3612_v22 = vpop.f32.mrf.mxu0  ;;  %v3683_v31 = vpop.f32.mrf.mxu1 }
 0xe5a   :  { %v3688_v24 = vadd.f32 %v3612_v22, %v6799_v23  ;;  %v3690_v33 = vadd.f32 %v3683_v31, %v5652_v2 }
 0xe5b   :  { %v3614_v26 = vpop.f32.mrf.mxu0  ;;  %v3685_v34 = vpop.f32.mrf.mxu1 }
 0xe5c   :  { %v3692_v52 = vmul.f32 0.5, %v3688_v24  ;;  %v3689_v30 = vadd.f32 %v3614_v26, %v6695_v15  ;;  %v3691_v35 = vadd.f32 %v3685_v34, %v5657_v63 }
 0xe5e   :  { %4114 = vtanh.f32 %v3692_v52  ;;  %v3696_v32 = vmul.f32 0.5, %v3689_v30  ;;  %v3701_v37 = vmul.f32 0.5, %v3691_v35 }
 0xe60   :  { %4116 = vtanh.f32 %v3696_v32 }
 0xe61   :  { %4118 = vtanh.f32 %v3690_v33 }
 0xe62   :  { %4120 = vtanh.f32 %v3701_v37 }
 0xe6b   :  { %v4115_v39 = vpop.eup %4114 }
 0xe6c   :  { %v3694_v41 = vmul.f32 0.5, %v4115_v39 }
 0xe6d   :  { %v4117_v42 = vpop.eup %4116 }
 0xe6e   :  { %v3695_v5 = vadd.f32 0.5, %v3694_v41  ;;  %v3698_v28 = vmul.f32 0.5, %v4117_v42  ;;  %v4119_v43 = vpop.eup %4118 }
 0xe6f   :  { %v4121_v48 = vpop.eup %4120 }
 0xe70   :  { %v3699_v8 = vadd.f32 0.5, %v3698_v28  ;;  %v3706_v54 = vmul.f32 %v4119_v43, %v3695_v5  ;;  %v3703_v13 = vmul.f32 0.5, %v4121_v48 }
 0xe72   :  { %v3705_v50 = vmul.f32 %v3699_v8, %v6173_v12  ;;  %v3704_v10 = vadd.f32 0.5, %v3703_v13 }
 0xe74   :  { %v3707_v25 = vadd.f32 %v3706_v54, %v3705_v50 }
 0xe76   :  { %4122 = vtanh.f32 %v3707_v25 }
 0xe83   :  { %v4123_v53 = vpop.eup %4122 }
 0xe84   :  { %v3709_v36 = vmul.f32 %v4123_v53, %v3704_v10 }
 0xe86   :  { %3965 = vst [vmem:[%s6266_s8 + $0x30] sm:$0xff] %v3709_v36  ;;  %3841 = vmatmul.mubr.f32.vlgmr.msra.gmra.mxu0 %v3709_v36  ;;  %3912 = vmatmul.mubr.f32.vlgmr.msra.gmra.mxu1 %v3709_v36 }
 0xf46   :  { %v3842_v40 = vpop.f32.mrf.mxu0  ;;  %v3913_v6 = vpop.f32.mrf.mxu1 }
 0xf47   :  { %v3918_v55 = vadd.f32 %v3842_v40, %v6799_v23  ;;  %v3920_v49 = vadd.f32 %v3913_v6, %v5652_v2 }
 0xf48   :  { %v3844_v58 = vpop.f32.mrf.mxu0  ;;  %v3915_v1 = vpop.f32.mrf.mxu1 }
 0xf49   :  { %v3922_v46 = vmul.f32 0.5, %v3918_v55  ;;  %v3919_v9 = vadd.f32 %v3844_v58, %v6695_v15  ;;  %v3921_v12 = vadd.f32 %v3915_v1, %v5657_v63 }
 0xf4b   :  { %4124 = vtanh.f32 %v3922_v46  ;;  %v3926_v51 = vmul.f32 0.5, %v3919_v9  ;;  %v3931_v57 = vmul.f32 0.5, %v3921_v12 }
 0xf4d   :  { %4126 = vtanh.f32 %v3926_v51 }
 0xf4e   :  { %4128 = vtanh.f32 %v3920_v49 }
 0xf4f   :  { %4130 = vtanh.f32 %v3931_v57 }
 0xf58   :  { %v4125_v14 = vpop.eup %4124 }
 0xf59   :  { %v3924_v20 = vmul.f32 0.5, %v4125_v14 }
 0xf5a   :  { %v4127_v7 = vpop.eup %4126 }
 0xf5b   :  { %v3925_v45 = vadd.f32 0.5, %v3924_v20  ;;  %v3928_v47 = vmul.f32 0.5, %v4127_v7  ;;  %v4129_v3 = vpop.eup %4128 }
 0xf5c   :  { %v4131_v0 = vpop.eup %4130 }
 0xf5d   :  { %v3929_v60 = vadd.f32 0.5, %v3928_v47  ;;  %v3936_v29 = vmul.f32 %v4129_v3, %v3925_v45  ;;  %v3933_v2 = vmul.f32 0.5, %v4131_v0 }
 0xf5f   :  { %v3935_v15 = vmul.f32 %v3929_v60, %v3707_v25  ;;  %v3934_v56 = vadd.f32 0.5, %v3933_v2 }
 0xf61   :  { %v3937_v61 = vadd.f32 %v3936_v29, %v3935_v15 }
 0xf63   :  { %4132 = vtanh.f32 %v3937_v61 }
 0xf70   :  { %v4133_v62 = vpop.eup %4132 }
 0xf71   :  { %v3939_v44 = vmul.f32 %v4133_v62, %v3934_v56 }
 0xf73   :  { %3966 = vst [vmem:[%s6266_s8 + $0x38] sm:$0xff] %v3939_v44 }
 0xf74   :  { %3950 = vsyncpa [#allocation5], 1 }
 0xf75   :  { %3951 = vsyncpa [#allocation7], 1 }
 0xf76   :  { %3952 = vsyncpa [#allocation10], 1 }

</bundles_post_ra>
